<compile_context>
chip_gen: v7x
topology: tpu7x:2x2x1
jax: 0.10.0
libtpu: 0.0.40
codegen_flags: <defaults>
</compile_context>

<pallas_src>
import functools
import math

import jax
import jax.numpy as jnp
import numpy as np
from jax.experimental import pallas as pl
from jax.experimental.pallas import tpu as pltpu


# ----------------------------- small helpers -----------------------------

def _round_up(a, m):
    return ((a + m - 1) // m) * m


def _act(x, activation):
    # Elementwise math kept in fp32 (v5e VPU has no bf16 path).
    if activation == "gelu":
        # TODO(synk): torch F.gelu defaults to the exact erf GELU; tanh approximation used here
        # (tanh has a guaranteed EUP lowering, erf does not).
        return 0.5 * x * (1.0 + jnp.tanh(0.7978845608028654 * (x + 0.044715 * x * x * x)))
    if activation == "relu":
        return jnp.maximum(x, 0.0)
    return x


# ----------------------------- tiled dense (matmul + bias + activation) -----------------------------

# MXU-friendly tile caps. 32 MiB VMEM cap is v7x-safe (64 MiB physical); on v6e/v5e (128 MiB)
# larger configs could raise this and grow tn / buffering depth.
_TM_MAX, _TN_MAX, _TK_MAX = 256, 256, 512


def _dense_k1_bias_kernel(x_ref, w_ref, b_ref, o_ref, *, activation):
    # Single K step: no accumulator scratch, no pl.when init/finalize.
    y = jnp.dot(x_ref[...], w_ref[...], preferred_element_type=jnp.float32)
    o_ref[...] = _act(y + b_ref[...], activation)


def _dense_k1_nobias_kernel(x_ref, w_ref, o_ref, *, activation):
    y = jnp.dot(x_ref[...], w_ref[...], preferred_element_type=jnp.float32)
    o_ref[...] = _act(y, activation)


def _dense_accum(x_ref, w_ref, acc_ref):
    @pl.when(pl.program_id(2) == 0)
    def _():
        acc_ref[...] = jnp.zeros_like(acc_ref)

    acc_ref[...] += jnp.dot(x_ref[...], w_ref[...], preferred_element_type=jnp.float32)


def _dense_bias_kernel(x_ref, w_ref, b_ref, o_ref, acc_ref, *, activation):
    _dense_accum(x_ref, w_ref, acc_ref)

    @pl.when(pl.program_id(2) == pl.num_programs(2) - 1)
    def _():
        o_ref[...] = _act(acc_ref[...] + b_ref[...], activation)


def _dense_nobias_kernel(x_ref, w_ref, o_ref, acc_ref, *, activation):
    _dense_accum(x_ref, w_ref, acc_ref)

    @pl.when(pl.program_id(2) == pl.num_programs(2) - 1)
    def _():
        o_ref[...] = _act(acc_ref[...], activation)


def dense(x2d, w, b=None, activation="none"):
    """y = act(x2d @ w (+ b)). x2d: (M, K), w: (K, N). Operands are DMA'd as bf16 (the MXU
    sees bf16 anyway), accumulation/output are fp32."""
    M, K = x2d.shape
    K2, N = w.shape
    assert K == K2

    x2d = x2d.astype(jnp.bfloat16)
    w = w.astype(jnp.bfloat16)

    tm = M if M <= _TM_MAX else _TM_MAX
    tn = N if N <= _TN_MAX else _TN_MAX
    tk = K if K <= _TK_MAX else _TK_MAX
    # v7x: a 1x1 output grid leaves one of the two TensorCores idle -> split M into 2 blocks.
    if M == tm and N == tn and M >= 16 and M % 16 == 0:
        tm = M // 2
    Mp, Np, Kp = _round_up(M, tm), _round_up(N, tn), _round_up(K, tk)

    if (Mp, Kp) != (M, K):
        x2d = jnp.pad(x2d, ((0, Mp - M), (0, Kp - K)))
    if (Kp, Np) != (K, N):
        w = jnp.pad(w, ((0, Kp - K), (0, Np - N)))

    gm, gn, gk = Mp // tm, Np // tn, Kp // tk
    cost = pl.CostEstimate(
        flops=2 * Mp * Np * Kp,
        transcendentals=Mp * Np if activation == "gelu" else 0,
        bytes_accessed=2 * (Mp * Kp + Kp * Np) + 4 * Mp * Np,
    )

    if b is not None:
        b2 = jnp.reshape(b, (1, N)).astype(jnp.float32)
        if Np != N:
            b2 = jnp.pad(b2, ((0, 0), (0, Np - N)))

    if gk == 1:
        cparams = pltpu.CompilerParams(
            dimension_semantics=("parallel", "parallel"),
            vmem_limit_bytes=32 * 1024 * 1024,
        )
        x_spec = pl.BlockSpec((tm, tk), lambda i, j: (i, 0))
        w_spec = pl.BlockSpec((tk, tn), lambda i, j: (0, j))
        o_spec = pl.BlockSpec((tm, tn), lambda i, j: (i, j))
        if b is not None:
            out = pl.pallas_call(
                functools.partial(_dense_k1_bias_kernel, activation=activation),
                grid=(gm, gn),
                in_specs=[x_spec, w_spec, pl.BlockSpec((1, tn), lambda i, j: (0, j))],
                out_specs=o_spec,
                out_shape=jax.ShapeDtypeStruct((Mp, Np), jnp.float32),
                compiler_params=cparams,
                cost_estimate=cost,
            )(x2d, w, b2)
        else:
            out = pl.pallas_call(
                functools.partial(_dense_k1_nobias_kernel, activation=activation),
                grid=(gm, gn),
                in_specs=[x_spec, w_spec],
                out_specs=o_spec,
                out_shape=jax.ShapeDtypeStruct((Mp, Np), jnp.float32),
                compiler_params=cparams,
                cost_estimate=cost,
            )(x2d, w)
    else:
        cparams = pltpu.CompilerParams(
            dimension_semantics=("parallel", "parallel", "arbitrary"),
            vmem_limit_bytes=32 * 1024 * 1024,
        )
        x_spec = pl.BlockSpec((tm, tk), lambda i, j, k: (i, k))
        w_spec = pl.BlockSpec((tk, tn), lambda i, j, k: (k, j))
        o_spec = pl.BlockSpec((tm, tn), lambda i, j, k: (i, j))
        if b is not None:
            out = pl.pallas_call(
                functools.partial(_dense_bias_kernel, activation=activation),
                grid=(gm, gn, gk),
                in_specs=[x_spec, w_spec, pl.BlockSpec((1, tn), lambda i, j, k: (0, j))],
                out_specs=o_spec,
                out_shape=jax.ShapeDtypeStruct((Mp, Np), jnp.float32),
                scratch_shapes=[pltpu.VMEM((tm, tn), jnp.float32)],
                compiler_params=cparams,
                cost_estimate=cost,
            )(x2d, w, b2)
        else:
            out = pl.pallas_call(
                functools.partial(_dense_nobias_kernel, activation=activation),
                grid=(gm, gn, gk),
                in_specs=[x_spec, w_spec],
                out_specs=o_spec,
                out_shape=jax.ShapeDtypeStruct((Mp, Np), jnp.float32),
                scratch_shapes=[pltpu.VMEM((tm, tn), jnp.float32)],
                compiler_params=cparams,
                cost_estimate=cost,
            )(x2d, w)

    if (Mp, Np) != (M, N):
        out = out[:M, :N]
    return out


# ----------------------------- series decomposition (moving average) -----------------------------

@functools.lru_cache(maxsize=None)
def _avgpool_matrix(L, kernel_size):
    """(L, L) matrix M with (M @ x)[t] = AvgPool1d(kernel, stride=1) of edge-replicated x."""
    assert kernel_size % 2 == 1, "torch series_decomp requires an odd moving_avg kernel"
    p = (kernel_size - 1) // 2
    m = np.zeros((L, L), np.float32)
    for t in range(L):
        for j in range(-p, p + 1):
            m[t, min(max(t + j, 0), L - 1)] += 1.0 / kernel_size
    return jnp.asarray(m)


def _decomp_kernel(m_ref, x_ref, res_ref, trend_ref):
    xb = x_ref[0]                                                   # (L, D)
    tr = jnp.dot(m_ref[...], xb, preferred_element_type=jnp.float32)
    trend_ref[0] = tr
    res_ref[0] = xb - tr


def _add_decomp_kernel(m_ref, x_ref, y_ref, res_ref, trend_ref):
    s = x_ref[0] + y_ref[0]                                         # fused residual add
    tr = jnp.dot(m_ref[...], s, preferred_element_type=jnp.float32)
    trend_ref[0] = tr
    res_ref[0] = s - tr


def series_decomp(x, kernel_size, y=None):
    """Moving-average decomposition of (x [+ y]). Edge-replicated AvgPool1d folded into one
    (L, L) fp32 matrix -> a single MXU matmul per batch. Grid over batch keeps both v7x
    TensorCores busy. Returns (residual, trend)."""
    B, L, D = x.shape
    mm = _avgpool_matrix(L, kernel_size)
    bld = pl.BlockSpec((1, L, D), lambda b: (b, 0, 0))
    in_specs = [pl.BlockSpec((L, L), lambda b: (0, 0)), bld]
    args = [mm, x.astype(jnp.float32)]
    kern = _decomp_kernel
    if y is not None:
        in_specs.append(bld)
        args.append(y.astype(jnp.float32))
        kern = _add_decomp_kernel
    return pl.pallas_call(
        kern,
        grid=(B,),
        in_specs=in_specs,
        out_specs=(bld, bld),
        out_shape=(jax.ShapeDtypeStruct((B, L, D), jnp.float32),
                   jax.ShapeDtypeStruct((B, L, D), jnp.float32)),
        compiler_params=pltpu.CompilerParams(dimension_semantics=("parallel",)),
    )(*args)


# ----------------------------- fused: output projection + residual add + decomposition -----------------------------

def _proj_add_decomp_kernel(m_ref, a_ref, w_ref, b_ref, x_ref, res_ref, trend_ref):
    y = jnp.dot(a_ref[0], w_ref[...], preferred_element_type=jnp.float32) + b_ref[...]
    s = x_ref[0] + y
    tr = jnp.dot(m_ref[...], s, preferred_element_type=jnp.float32)
    trend_ref[0] = tr
    res_ref[0] = s - tr


def proj_add_decomp(attn_out, wo_bf16, bo_row, x, kernel_size):
    """attn_out @ Wo + bo, + residual x, then series decomposition — one launch, no HBM
    round trip for the projected value. attn_out is DMA'd as bf16."""
    B, L, Din = attn_out.shape
    D = wo_bf16.shape[1]
    mm = _avgpool_matrix(L, kernel_size)
    bld = pl.BlockSpec((1, L, D), lambda b: (b, 0, 0))
    return pl.pallas_call(
        _proj_add_decomp_kernel,
        grid=(B,),
        in_specs=[pl.BlockSpec((L, L), lambda b: (0, 0)),
                  pl.BlockSpec((1, L, Din), lambda b: (b, 0, 0)),
                  pl.BlockSpec((Din, D), lambda b: (0, 0)),
                  pl.BlockSpec((1, D), lambda b: (0, 0)),
                  bld],
        out_specs=(bld, bld),
        out_shape=(jax.ShapeDtypeStruct((B, L, D), jnp.float32),
                   jax.ShapeDtypeStruct((B, L, D), jnp.float32)),
        compiler_params=pltpu.CompilerParams(dimension_semantics=("parallel",)),
    )(mm, attn_out.astype(jnp.bfloat16), wo_bf16, bo_row, x.astype(jnp.float32))


# ----------------------------- fused: FFN + residual add + decomposition -----------------------------

def _ffn_add_decomp_kernel(m_ref, x_ref, w1_ref, w2_ref, res_ref, trend_ref, *, activation):
    xb = x_ref[0]                                                   # (L, D) fp32
    h = jnp.dot(xb.astype(jnp.bfloat16), w1_ref[...], preferred_element_type=jnp.float32)
    h = _act(h, activation)
    y = jnp.dot(h.astype(jnp.bfloat16), w2_ref[...], preferred_element_type=jnp.float32)
    s = xb + y
    tr = jnp.dot(m_ref[...], s, preferred_element_type=jnp.float32)
    trend_ref[0] = tr
    res_ref[0] = s - tr


def ffn_add_decomp(x, w1_bf16, w2_bf16, kernel_size, activation):
    """conv1(k=1, no bias) -> act -> conv2(k=1, no bias) + residual add + series decomposition
    fused in one kernel; the (L, d_ff) intermediate never leaves VMEM."""
    B, L, D = x.shape
    F = w1_bf16.shape[1]
    mm = _avgpool_matrix(L, kernel_size)
    bld = pl.BlockSpec((1, L, D), lambda b: (b, 0, 0))
    return pl.pallas_call(
        functools.partial(_ffn_add_decomp_kernel, activation=activation),
        grid=(B,),
        in_specs=[pl.BlockSpec((L, L), lambda b: (0, 0)),
                  bld,
                  pl.BlockSpec((D, F), lambda b: (0, 0)),
                  pl.BlockSpec((F, D), lambda b: (0, 0))],
        out_specs=(bld, bld),
        out_shape=(jax.ShapeDtypeStruct((B, L, D), jnp.float32),
                   jax.ShapeDtypeStruct((B, L, D), jnp.float32)),
        compiler_params=pltpu.CompilerParams(dimension_semantics=("parallel",)),
    )(mm, x.astype(jnp.float32), w1_bf16, w2_bf16)


# ----------------------------- embedding: circular k=3 token conv + temporal add -----------------------------

def _embed_conv_kernel(xm1_ref, x0_ref, xp1_ref, w0_ref, w1_ref, w2_ref, t_ref, o_ref):
    def mix(a_ref, w_ref):
        a = a_ref[0]                                    # (L, Cin)
        w = w_ref[...]                                  # (Cin, D)
        if a.shape[1] == 1:
            return a * w                                # VPU broadcast; avoids a K=1 MXU matmul
        return jnp.dot(a.astype(jnp.bfloat16), w.astype(jnp.bfloat16),
                       preferred_element_type=jnp.float32)

    o_ref[0] = mix(xm1_ref, w0_ref) + mix(x0_ref, w1_ref) + mix(xp1_ref, w2_ref) + t_ref[0]


def temporal_embedding(x_mark, tables):
    """TemporalEmbedding (learned nn.Embedding lookups), freq='t'."""
    xm = x_mark.astype(jnp.int32)
    month = jnp.take(tables["month"], xm[:, :, 0], axis=0)
    day = jnp.take(tables["day"], xm[:, :, 1], axis=0)
    weekday = jnp.take(tables["weekday"], xm[:, :, 2], axis=0)
    hour = jnp.take(tables["hour"], xm[:, :, 3], axis=0)
    minute = jnp.take(tables["minute"], xm[:, :, 4], axis=0)
    return hour + weekday + minute + day + month


def data_embedding_wo_pos(x, x_mark, emb):
    """DataEmbedding_wo_pos: circular k=3 token conv + temporal embedding add, fused in one
    kernel. The two circular time shifts are precomputed with tiny wrapper jnp.rolls (no
    (L,L) shift matrices, no N=1 shift matmuls in-kernel). Dropout = identity (eval)."""
    B, L, Cin = x.shape
    temporal = temporal_embedding(x_mark, emb["temporal"])          # (B, L, D) plain-JAX gathers
    D = temporal.shape[-1]
    x = x.astype(jnp.float32)
    xm1 = jnp.roll(x, 1, axis=1)                                    # x[t-1] (circular)
    xp1 = jnp.roll(x, -1, axis=1)                                   # x[t+1] (circular)
    xspec = pl.BlockSpec((1, L, Cin), lambda b: (b, 0, 0))
    wspec = pl.BlockSpec((Cin, D), lambda b: (0, 0))
    return pl.pallas_call(
        _embed_conv_kernel,
        grid=(B,),
        in_specs=[xspec, xspec, xspec, wspec, wspec, wspec,
                  pl.BlockSpec((1, L, D), lambda b: (b, 0, 0))],
        out_specs=pl.BlockSpec((1, L, D), lambda b: (b, 0, 0)),
        out_shape=jax.ShapeDtypeStruct((B, L, D), jnp.float32),
        compiler_params=pltpu.CompilerParams(dimension_semantics=("parallel",)),
    )(xm1, x, xp1, emb["tap0"], emb["tap1"], emb["tap2"], temporal)


# ----------------------------- decoder residual-trend projection (circular k=3, d_model -> c_out) -----------------------------

def _trend_proj_kernel(xm1_ref, x0_ref, xp1_ref, w0_ref, w1_ref, w2_ref, o_ref, *, cout):
    if cout == 1:
        # N=1 projection as VPU multiply + lane reduction (no 1-lane MXU matmul / masked lanes).
        s = xm1_ref[0] * w0_ref[...] + x0_ref[0] * w1_ref[...] + xp1_ref[0] * w2_ref[...]
        o_ref[0] = jnp.sum(s, axis=-1, keepdims=True)
    else:
        acc = jnp.dot(xm1_ref[0].astype(jnp.bfloat16), w0_ref[...],
                      preferred_element_type=jnp.float32)
        acc += jnp.dot(x0_ref[0].astype(jnp.bfloat16), w1_ref[...],
                       preferred_element_type=jnp.float32)
        acc += jnp.dot(xp1_ref[0].astype(jnp.bfloat16), w2_ref[...],
                       preferred_element_type=jnp.float32)
        o_ref[0] = acc


def trend_projection(x, taps, cout):
    """Conv1d(d_model -> c_out, kernel=3, padding=1, padding_mode='circular', bias=False)."""
    B, L, D = x.shape
    x = x.astype(jnp.float32)
    xm1 = jnp.roll(x, 1, axis=1)
    xp1 = jnp.roll(x, -1, axis=1)
    w0, w1, w2 = taps
    xspec = pl.BlockSpec((1, L, D), lambda b: (b, 0, 0))
    wspec = pl.BlockSpec(w0.shape, lambda b: (0, 0))
    return pl.pallas_call(
        functools.partial(_trend_proj_kernel, cout=cout),
        grid=(B,),
        in_specs=[xspec, xspec, xspec, wspec, wspec, wspec],
        out_specs=pl.BlockSpec((1, L, cout), lambda b: (b, 0, 0)),
        out_shape=jax.ShapeDtypeStruct((B, L, cout), jnp.float32),
        compiler_params=pltpu.CompilerParams(dimension_semantics=("parallel",)),
    )(xm1, x, xp1, w0, w1, w2)


# ----------------------------- my_Layernorm (optionally fused with final Linear projection) -----------------------------

def _my_layernorm_kernel(x_ref, g_ref, b_ref, o_ref):
    x = x_ref[0]                                                    # (L, D)
    mu = jnp.mean(x, axis=-1, keepdims=True)
    var = jnp.mean((x - mu) * (x - mu), axis=-1, keepdims=True)
    xhat = (x - mu) * jax.lax.rsqrt(var + 1e-5)
    xhat = xhat * g_ref[...] + b_ref[...]
    o_ref[0] = xhat - jnp.mean(xhat, axis=0, keepdims=True)         # subtract time mean


def _my_layernorm_proj_kernel(x_ref, g_ref, b_ref, pw_ref, pb_ref, o_ref, *, cout):
    x = x_ref[0]
    mu = jnp.mean(x, axis=-1, keepdims=True)
    var = jnp.mean((x - mu) * (x - mu), axis=-1, keepdims=True)
    xhat = (x - mu) * jax.lax.rsqrt(var + 1e-5)
    xhat = xhat * g_ref[...] + b_ref[...]
    y = xhat - jnp.mean(xhat, axis=0, keepdims=True)
    if cout == 1:
        # nn.Linear(d_model, 1): VPU multiply + lane reduction instead of a 1-lane MXU matmul.
        o_ref[0] = jnp.sum(y * pw_ref[...], axis=-1, keepdims=True) + pb_ref[...]
    else:
        o_ref[0] = jnp.dot(y.astype(jnp.bfloat16), pw_ref[...],
                           preferred_element_type=jnp.float32) + pb_ref[...]


def my_layernorm(x, gamma_row, beta_row, proj_w=None, proj_b=None, cout=None):
    B, L, D = x.shape
    x = x.astype(jnp.float32)
    xspec = pl.BlockSpec((1, L, D), lambda b: (b, 0, 0))
    gspec = pl.BlockSpec((1, D), lambda b: (0, 0))
    if proj_w is None:
        return pl.pallas_call(
            _my_layernorm_kernel,
            grid=(B,),
            in_specs=[xspec, gspec, gspec],
            out_specs=xspec,
            out_shape=jax.ShapeDtypeStruct((B, L, D), jnp.float32),
            compiler_params=pltpu.CompilerParams(dimension_semantics=("parallel",)),
        )(x, gamma_row, beta_row)
    C = cout
    return pl.pallas_call(
        functools.partial(_my_layernorm_proj_kernel, cout=C),
        grid=(B,),
        in_specs=[xspec, gspec, gspec,
                  pl.BlockSpec(proj_w.shape, lambda b: (0, 0)),
                  pl.BlockSpec((1, C), lambda b: (0, 0))],
        out_specs=pl.BlockSpec((1, L, C), lambda b: (b, 0, 0)),
        out_shape=jax.ShapeDtypeStruct((B, L, C), jnp.float32),
        compiler_params=pltpu.CompilerParams(dimension_semantics=("parallel",)),
    )(x, gamma_row, beta_row, proj_w, proj_b)


# ----------------------------- autocorrelation (plain-JAX FFT + top-k gather) -----------------------------

def time_delay_agg_inference(values, corr, factor):
    """values, corr: (B, H, E, L)."""
    B, H, E, L = values.shape
    top_k = int(factor * math.log(L))
    mean_value = jnp.mean(jnp.mean(corr, axis=1), axis=1)            # (B, L)
    weights, delay = jax.lax.top_k(mean_value, top_k)                # (B, top_k)
    tmp_corr = jax.nn.softmax(weights, axis=-1)
    init_index = jnp.arange(L)
    agg = jnp.zeros_like(values)
    for i in range(top_k):
        idx = (init_index[None, :] + delay[:, i][:, None]) % L       # circular shift per batch
        idx_b = jnp.broadcast_to(idx[:, None, None, :], values.shape)
        pattern = jnp.take_along_axis(values, idx_b, axis=-1)
        agg = agg + pattern * tmp_corr[:, i][:, None, None, None]
    return agg


def auto_correlation(q, k, v, factor):
    """q: (B, L, H, E); k, v: (B, S, H, E) -> (B, L, H, E)."""
    B, L, H, E = q.shape
    S = k.shape[1]
    if L > S:
        zeros = jnp.zeros((B, L - S, H, E), q.dtype)
        v = jnp.concatenate([v, zeros], axis=1)
        k = jnp.concatenate([k, zeros], axis=1)
    else:
        v = v[:, :L]
        k = k[:, :L]
    qp = jnp.transpose(q, (0, 2, 3, 1))
    kp = jnp.transpose(k, (0, 2, 3, 1))
    vp = jnp.transpose(v, (0, 2, 3, 1))
    # TODO(synk): no Pallas FFT primitive on TPU; period-based correlation uses jnp.fft (XLA op).
    q_fft = jnp.fft.rfft(qp, axis=-1)
    k_fft = jnp.fft.rfft(kp, axis=-1)
    corr = jnp.fft.irfft(q_fft * jnp.conj(k_fft), n=L, axis=-1)
    agg = time_delay_agg_inference(vp, corr, factor)
    return jnp.transpose(agg, (0, 3, 1, 2))


def autocorr_heads(p, q_in, k_in, v_in, n_heads, factor):
    """QKV projections (fused where possible) + FFT autocorrelation + time-delay aggregation.
    Returns (B, L, n_heads*E); the output projection is fused into the following
    proj_add_decomp kernel."""
    B, L, D = q_in.shape
    S = k_in.shape[1]
    if q_in is k_in and k_in is v_in:
        # self-attention: fused Q|K|V projection (1 launch, lane-dense 3*D output)
        qkv = dense(q_in.reshape(B * L, D), p["w_qkv"], p["b_qkv"])
        q = qkv[:, :D].reshape(B, L, n_heads, -1)
        k = qkv[:, D:2 * D].reshape(B, S, n_heads, -1)
        v = qkv[:, 2 * D:].reshape(B, S, n_heads, -1)
    else:
        # cross-attention: separate Q + fused K|V projection on the cross sequence
        q = dense(q_in.reshape(B * L, D), p["wq"], p["bq"]).reshape(B, L, n_heads, -1)
        kv = dense(k_in.reshape(B * S, D), p["w_kv"], p["b_kv"])
        k = kv[:, :D].reshape(B, S, n_heads, -1)
        v = kv[:, D:].reshape(B, S, n_heads, -1)
    return auto_correlation(q, k, v, factor).reshape(B, L, -1)


# ----------------------------- encoder / decoder -----------------------------

def encoder_layer(p, x, cfg):
    attn_out = autocorr_heads(p["attn"], x, x, x, cfg["n_heads"], cfg["factor"])
    x, _ = proj_add_decomp(attn_out, p["attn"]["wo"], p["attn"]["bo"], x, cfg["moving_avg"])
    res, _ = ffn_add_decomp(x, p["w1"], p["w2"], cfg["moving_avg"], cfg["activation"])
    return res


def encoder(p, x, cfg):
    for lp in p["layers"]:
        x = encoder_layer(lp, x, cfg)
    return my_layernorm(x, p["norm_g"], p["norm_b"])


def decoder_layer(p, x, cross, cfg):
    attn_out = autocorr_heads(p["self_attn"], x, x, x, cfg["n_heads"], cfg["factor"])
    x, trend1 = proj_add_decomp(attn_out, p["self_attn"]["wo"], p["self_attn"]["bo"], x,
                                cfg["moving_avg"])
    attn_out = autocorr_heads(p["cross_attn"], x, cross, cross, cfg["n_heads"], cfg["factor"])
    x, trend2 = proj_add_decomp(attn_out, p["cross_attn"]["wo"], p["cross_attn"]["bo"], x,
                                cfg["moving_avg"])
    x, trend3 = ffn_add_decomp(x, p["w1"], p["w2"], cfg["moving_avg"], cfg["activation"])
    residual_trend = trend1 + trend2 + trend3
    residual_trend = trend_projection(residual_trend, p["proj_taps"], cfg["c_out"])
    return x, residual_trend


def decoder(p, x, cross, trend, cfg):
    for lp in p["layers"]:
        x, residual_trend = decoder_layer(lp, x, cross, cfg)
        trend = trend + residual_trend
    # final my_Layernorm + nn.Linear(d_model, c_out) fused into one kernel
    x = my_layernorm(x, p["norm_g"], p["norm_b"], p["proj_w"], p["proj_b"], cfg["c_out"])
    return x, trend


def autoformer_forward(params, cfg, x_enc, x_mark_enc, x_dec, x_mark_dec):
    label_len, pred_len = cfg["label_len"], cfg["pred_len"]
    x_mark = jnp.concatenate([x_mark_enc, x_mark_dec], axis=1)
    x_mark_dec = x_mark[:, -(label_len + pred_len):, :]
    mean = jnp.mean(x_enc, axis=1, keepdims=True)
    mean = jnp.tile(mean, (1, pred_len, 1))
    zeros = jnp.zeros((x_dec.shape[0], pred_len, x_dec.shape[2]), jnp.float32)
    seasonal_init, trend_init = series_decomp(x_enc, cfg["moving_avg"])
    trend_init = jnp.concatenate([trend_init[:, -label_len:, :], mean], axis=1)
    seasonal_init = jnp.concatenate([seasonal_init[:, -label_len:, :], zeros], axis=1)

    enc_out = data_embedding_wo_pos(x_enc, x_mark_enc, params["enc_emb"])
    enc_out = encoder(params["encoder"], enc_out, cfg)

    dec_out = data_embedding_wo_pos(seasonal_init, x_mark_dec, params["dec_emb"])
    seasonal_part, trend_part = decoder(params["decoder"], dec_out, enc_out, trend_init, cfg)
    dec_out = trend_part + seasonal_part
    return dec_out[:, -pred_len:, :]


# ----------------------------- parameters -----------------------------

def init_params(key, cfg):
    """Parameters in the torch module's layout."""
    d_model, d_ff = cfg["d_model"], cfg["d_ff"]
    enc_in, dec_in, c_out = cfg["enc_in"], cfg["dec_in"], cfg["c_out"]
    keys = iter(jax.random.split(key, 512))

    def nrm(shape, scale=0.02):
        return scale * jax.random.normal(next(keys), shape, jnp.float32)

    def emb_params(c_in):
        return {
            "token_conv": nrm((d_model, c_in, 3)),                   # (Cout, Cin, 3) torch layout
            "temporal": {
                "minute": nrm((4, d_model)),
                "hour": nrm((24, d_model)),
                "weekday": nrm((7, d_model)),
                "day": nrm((32, d_model)),
                "month": nrm((13, d_model)),
            },
        }

    def attn_params():
        return {
            "wq": nrm((d_model, d_model)), "bq": jnp.zeros((d_model,), jnp.float32),
            "wk": nrm((d_model, d_model)), "bk": jnp.zeros((d_model,), jnp.float32),
            "wv": nrm((d_model, d_model)), "bv": jnp.zeros((d_model,), jnp.float32),
            "wo": nrm((d_model, d_model)), "bo": jnp.zeros((d_model,), jnp.float32),
        }

    enc_layers = [{"attn": attn_params(),
                   "w1": nrm((d_model, d_ff)),
                   "w2": nrm((d_ff, d_model))}
                  for _ in range(cfg["e_layers"])]
    dec_layers = [{"self_attn": attn_params(),
                   "cross_attn": attn_params(),
                   "w1": nrm((d_model, d_ff)),
                   "w2": nrm((d_ff, d_model)),
                   "proj_conv": nrm((c_out, d_model, 3))}
                  for _ in range(cfg["d_layers"])]

    return {
        "enc_emb": emb_params(enc_in),
        "dec_emb": emb_params(dec_in),
        "encoder": {"layers": enc_layers,
                    "norm_g": jnp.ones((d_model,), jnp.float32),
                    "norm_b": jnp.zeros((d_model,), jnp.float32)},
        "decoder": {"layers": dec_layers,
                    "norm_g": jnp.ones((d_model,), jnp.float32),
                    "norm_b": jnp.zeros((d_model,), jnp.float32),
                    "proj_w": nrm((d_model, c_out)),
                    "proj_b": jnp.zeros((c_out,), jnp.float32)},
    }


def prepare_params(params, cfg):
    """One-time, outside-jit conversion into kernel-friendly form: fused + bf16-cast matmul
    weights (no per-call concat/cast/pad), conv weights split per tap, (1, D) bias/gamma rows."""
    D = cfg["d_model"]
    c_out = cfg["c_out"]

    def prep_attn(a, fuse_qkv):
        out = {"wo": a["wo"].astype(jnp.bfloat16),
               "bo": a["bo"].reshape(1, D).astype(jnp.float32)}
        if fuse_qkv:
            out["w_qkv"] = jnp.concatenate([a["wq"], a["wk"], a["wv"]], axis=1).astype(jnp.bfloat16)
            out["b_qkv"] = jnp.concatenate([a["bq"], a["bk"], a["bv"]], axis=0).astype(jnp.float32)
        else:
            out["wq"] = a["wq"].astype(jnp.bfloat16)
            out["bq"] = a["bq"].astype(jnp.float32)
            out["w_kv"] = jnp.concatenate([a["wk"], a["wv"]], axis=1).astype(jnp.bfloat16)
            out["b_kv"] = jnp.concatenate([a["bk"], a["bv"]], axis=0).astype(jnp.float32)
        return out

    def prep_emb(e):
        w = e["token_conv"]                                          # (D, Cin, 3)
        return {"tap0": jnp.transpose(w[:, :, 0]).astype(jnp.float32),   # (Cin, D)
                "tap1": jnp.transpose(w[:, :, 1]).astype(jnp.float32),
                "tap2": jnp.transpose(w[:, :, 2]).astype(jnp.float32),
                "temporal": e["temporal"]}

    enc_layers = [{"attn": prep_attn(lp["attn"], True),
                   "w1": lp["w1"].astype(jnp.bfloat16),
                   "w2": lp["w2"].astype(jnp.bfloat16)}
                  for lp in params["encoder"]["layers"]]

    dec_layers = []
    for lp in params["decoder"]["layers"]:
        w = lp["proj_conv"]                                          # (c_out, D, 3)
        if c_out == 1:
            taps = tuple(w[0, :, j].reshape(1, D).astype(jnp.float32) for j in range(3))
        else:
            taps = tuple(jnp.transpose(w[:, :, j]).astype(jnp.bfloat16) for j in range(3))
        dec_layers.append({"self_attn": prep_attn(lp["self_attn"], True),
                           "cross_attn": prep_attn(lp["cross_attn"], False),
                           "w1": lp["w1"].astype(jnp.bfloat16),
                           "w2": lp["w2"].astype(jnp.bfloat16),
                           "proj_taps": taps})

    dec = params["decoder"]
    if c_out == 1:
        proj_w = dec["proj_w"][:, 0].reshape(1, D).astype(jnp.float32)
    else:
        proj_w = dec["proj_w"].astype(jnp.bfloat16)

    return {
        "enc_emb": prep_emb(params["enc_emb"]),
        "dec_emb": prep_emb(params["dec_emb"]),
        "encoder": {"layers": enc_layers,
                    "norm_g": params["encoder"]["norm_g"].reshape(1, D).astype(jnp.float32),
                    "norm_b": params["encoder"]["norm_b"].reshape(1, D).astype(jnp.float32)},
        "decoder": {"layers": dec_layers,
                    "norm_g": dec["norm_g"].reshape(1, D).astype(jnp.float32),
                    "norm_b": dec["norm_b"].reshape(1, D).astype(jnp.float32),
                    "proj_w": proj_w,
                    "proj_b": dec["proj_b"].reshape(1, c_out).astype(jnp.float32)},
    }


# ----------------------------- main -----------------------------

if __name__ == "__main__":
    cfg = dict(seq_len=16, label_len=8, pred_len=16, moving_avg=13,
               enc_in=1, dec_in=1, c_out=1, d_model=64, d_ff=32,
               n_heads=8, e_layers=1, d_layers=1, factor=4, activation="gelu")
    B = 2
    L_enc = cfg["seq_len"]
    L_dec = cfg["label_len"] + cfg["pred_len"]

    key = jax.random.PRNGKey(0)
    kp, k1, k2, k3, k4 = jax.random.split(key, 5)
    params = prepare_params(init_params(kp, cfg), cfg)

    x_enc = jax.random.normal(k1, (B, L_enc, cfg["enc_in"]), jnp.float32)
    x_dec = jax.random.normal(k2, (B, L_dec, cfg["dec_in"]), jnp.float32)

    def make_marks(k, L):
        ks = jax.random.split(k, 5)
        month = jax.random.randint(ks[0], (B, L, 1), 0, 13)
        day = jax.random.randint(ks[1], (B, L, 1), 0, 32)
        weekday = jax.random.randint(ks[2], (B, L, 1), 0, 7)
        hour = jax.random.randint(ks[3], (B, L, 1), 0, 24)
        minute = jax.random.randint(ks[4], (B, L, 1), 0, 4)
        return jnp.concatenate([month, day, weekday, hour, minute], axis=-1).astype(jnp.float32)

    x_mark_enc = make_marks(k3, L_enc)
    x_mark_dec = make_marks(k4, L_dec)

    fwd = jax.jit(functools.partial(autoformer_forward, params, cfg))
    out = fwd(x_enc, x_mark_enc, x_dec, x_mark_dec)
    out = jax.block_until_ready(out)
    assert out.shape == (B, cfg["pred_len"], cfg["c_out"]), out.shape
    assert bool(jnp.all(jnp.isfinite(out)))
    print("KERNEL_OK")
</pallas_src>

<mosaic_0001>
module attributes {stable_mosaic.version = 11 : i64} {
  func.func private @main(%arg0: i32) attributes {dimension_semantics = [#tpu.dimension_semantics<core_parallel>], iteration_bounds = array<i64: 2>, tpu.core_type = #tpu.core_type<sc_scalar_subcore>, window_params = []} {
    return
  }
}

module attributes {stable_mosaic.version = 11 : i64} {
  func.func private @main(%arg0: i32) attributes {dimension_semantics = [#tpu.dimension_semantics<core_parallel>], iteration_bounds = array<i64: 2>, tpu.core_type = #tpu.core_type<sc_scalar_subcore>, window_params = []} {
    return
  }
}

module attributes {stable_mosaic.version = 11 : i64} {
  func.func @_decomp_kernel(%arg0: i32, %arg1: memref<16x16xf32, #tpu.memory_space<vmem>>, %arg2: memref<1x16x1xf32, #tpu.memory_space<vmem>>, %arg3: memref<1x16x1xf32, #tpu.memory_space<vmem>>, %arg4: memref<1x16x1xf32, #tpu.memory_space<vmem>>) attributes {dimension_semantics = [#tpu.dimension_semantics<parallel>], iteration_bounds = array<i64: 2>, scalar_prefetch = 0 : i64, scratch_operands = 0 : i64, tpu.core_type = #tpu.core_type<tc>, window_params = [{pipeline_mode = #tpu.pipeline_mode<synchronous>, transform_indices = @transform_0, window_bounds = array<i64: 16, 16>}, {transform_indices = @transform_1, window_bounds = array<i64: 1, 16, 1>}, {transform_indices = @transform_2, window_bounds = array<i64: 1, 16, 1>}, {transform_indices = @transform_3, window_bounds = array<i64: 1, 16, 1>}]} {
    %c0 = arith.constant 0 : index
    %c0_0 = arith.constant 0 : index
    %c0_1 = arith.constant 0 : index
    %0 = vector.load %arg2[%c0, %c0_0, %c0_1] : memref<1x16x1xf32, #tpu.memory_space<vmem>>, vector<1x16x1xf32>
    %1 = vector.shape_cast %0 : vector<1x16x1xf32> to vector<16x1xf32>
    %c0_2 = arith.constant 0 : index
    %c0_3 = arith.constant 0 : index
    %2 = vector.load %arg1[%c0_2, %c0_3] : memref<16x16xf32, #tpu.memory_space<vmem>>, vector<16x16xf32>
    %cst = arith.constant dense<0.000000e+00> : vector<16x1xf32>
    %3 = tpu.matmul %2, %1, %cst {dimension_numbers = #tpu.dot_dimension_numbers<[1], [0], [0], [1], [0, 0, 1, 1], [], []>} : vector<16x16xf32>, vector<16x1xf32>, vector<16x1xf32> -> vector<16x1xf32>
    %c0_4 = arith.constant 0 : index
    %c0_5 = arith.constant 0 : index
    %c0_6 = arith.constant 0 : index
    %4 = vector.load %arg4[%c0_4, %c0_5, %c0_6] : memref<1x16x1xf32, #tpu.memory_space<vmem>>, vector<1x16x1xf32>
    %5 = vector.shape_cast %4 : vector<1x16x1xf32> to vector<16x1xf32>
    %6 = vector.shape_cast %3 : vector<16x1xf32> to vector<1x16x1xf32>
    tpu.vector_store %arg4[%c0_4, %c0_5, %c0_6], %6 {strides = array<i32>} : memref<1x16x1xf32, #tpu.memory_space<vmem>>, vector<1x16x1xf32>,
    %7 = arith.subf %1, %3 : vector<16x1xf32>
    %c0_7 = arith.constant 0 : index
    %c0_8 = arith.constant 0 : index
    %c0_9 = arith.constant 0 : index
    %8 = vector.load %arg3[%c0_7, %c0_8, %c0_9] : memref<1x16x1xf32, #tpu.memory_space<vmem>>, vector<1x16x1xf32>
    %9 = vector.shape_cast %8 : vector<1x16x1xf32> to vector<16x1xf32>
    %10 = vector.shape_cast %7 : vector<16x1xf32> to vector<1x16x1xf32>
    tpu.vector_store %arg3[%c0_7, %c0_8, %c0_9], %10 {strides = array<i32>} : memref<1x16x1xf32, #tpu.memory_space<vmem>>, vector<1x16x1xf32>,
    return
  }
  func.func @transform_0(%arg0: i32) -> (i32, i32) {
    %c0_i32 = arith.constant 0 : i32
    %c0_i32_0 = arith.constant 0 : i32
    %c0_i32_1 = arith.constant 0 : i32
    return %c0_i32, %c0_i32_0 : i32, i32
  }
  func.func @transform_1(%arg0: i32) -> (i32, i32, i32) {
    %c0_i32 = arith.constant 0 : i32
    %c0_i32_0 = arith.constant 0 : i32
    %c0_i32_1 = arith.constant 0 : i32
    return %arg0, %c0_i32, %c0_i32_0 : i32, i32, i32
  }
  func.func @transform_2(%arg0: i32) -> (i32, i32, i32) {
    %c0_i32 = arith.constant 0 : i32
    %c0_i32_0 = arith.constant 0 : i32
    %c0_i32_1 = arith.constant 0 : i32
    return %arg0, %c0_i32, %c0_i32_0 : i32, i32, i32
  }
  func.func @transform_3(%arg0: i32) -> (i32, i32, i32) {
    %c0_i32 = arith.constant 0 : i32
    %c0_i32_0 = arith.constant 0 : i32
    %c0_i32_1 = arith.constant 0 : i32
    return %arg0, %c0_i32, %c0_i32_0 : i32, i32, i32
  }
}

module attributes {stable_mosaic.version = 11 : i64} {
  func.func @_embed_conv_kernel(%arg0: i32, %arg1: memref<1x24x1xf32, #tpu.memory_space<vmem>>, %arg2: memref<1x24x1xf32, #tpu.memory_space<vmem>>, %arg3: memref<1x24x1xf32, #tpu.memory_space<vmem>>, %arg4: memref<1x64xf32, #tpu.memory_space<vmem>>, %arg5: memref<1x64xf32, #tpu.memory_space<vmem>>, %arg6: memref<1x64xf32, #tpu.memory_space<vmem>>, %arg7: memref<1x24x64xf32, #tpu.memory_space<vmem>>, %arg8: memref<1x24x64xf32, #tpu.memory_space<vmem>>) attributes {dimension_semantics = [#tpu.dimension_semantics<parallel>], iteration_bounds = array<i64: 2>, scalar_prefetch = 0 : i64, scratch_operands = 0 : i64, tpu.core_type = #tpu.core_type<tc>, window_params = [{transform_indices = @transform_0, window_bounds = array<i64: 1, 24, 1>}, {transform_indices = @transform_1, window_bounds = array<i64: 1, 24, 1>}, {transform_indices = @transform_2, window_bounds = array<i64: 1, 24, 1>}, {pipeline_mode = #tpu.pipeline_mode<synchronous>, transform_indices = @transform_3, window_bounds = array<i64: 1, 64>}, {pipeline_mode = #tpu.pipeline_mode<synchronous>, transform_indices = @transform_4, window_bounds = array<i64: 1, 64>}, {pipeline_mode = #tpu.pipeline_mode<synchronous>, transform_indices = @transform_5, window_bounds = array<i64: 1, 64>}, {transform_indices = @transform_6, window_bounds = array<i64: 1, 24, 64>}, {transform_indices = @transform_7, window_bounds = array<i64: 1, 24, 64>}]} {
    %c0 = arith.constant 0 : index
    %c0_0 = arith.constant 0 : index
    %c0_1 = arith.constant 0 : index
    %0 = vector.load %arg1[%c0, %c0_0, %c0_1] : memref<1x24x1xf32, #tpu.memory_space<vmem>>, vector<1x24x1xf32>
    %1 = vector.shape_cast %0 : vector<1x24x1xf32> to vector<24x1xf32>
    %c0_2 = arith.constant 0 : index
    %c0_3 = arith.constant 0 : index
    %2 = vector.load %arg4[%c0_2, %c0_3] : memref<1x64xf32, #tpu.memory_space<vmem>>, vector<1x64xf32>
    %3 = vector.broadcast %1 : vector<24x1xf32> to vector<24x64xf32>
    %4 = vector.broadcast %2 : vector<1x64xf32> to vector<24x64xf32>
    %5 = arith.mulf %3, %4 : vector<24x64xf32>
    %c0_4 = arith.constant 0 : index
    %c0_5 = arith.constant 0 : index
    %c0_6 = arith.constant 0 : index
    %6 = vector.load %arg2[%c0_4, %c0_5, %c0_6] : memref<1x24x1xf32, #tpu.memory_space<vmem>>, vector<1x24x1xf32>
    %7 = vector.shape_cast %6 : vector<1x24x1xf32> to vector<24x1xf32>
    %c0_7 = arith.constant 0 : index
    %c0_8 = arith.constant 0 : index
    %8 = vector.load %arg5[%c0_7, %c0_8] : memref<1x64xf32, #tpu.memory_space<vmem>>, vector<1x64xf32>
    %9 = vector.broadcast %7 : vector<24x1xf32> to vector<24x64xf32>
    %10 = vector.broadcast %8 : vector<1x64xf32> to vector<24x64xf32>
    %11 = arith.mulf %9, %10 : vector<24x64xf32>
    %12 = arith.addf %5, %11 : vector<24x64xf32>
    %c0_9 = arith.constant 0 : index
    %c0_10 = arith.constant 0 : index
    %c0_11 = arith.constant 0 : index
    %13 = vector.load %arg3[%c0_9, %c0_10, %c0_11] : memref<1x24x1xf32, #tpu.memory_space<vmem>>, vector<1x24x1xf32>
    %14 = vector.shape_cast %13 : vector<1x24x1xf32> to vector<24x1xf32>
    %c0_12 = arith.constant 0 : index
    %c0_13 = arith.constant 0 : index
    %15 = vector.load %arg6[%c0_12, %c0_13] : memref<1x64xf32, #tpu.memory_space<vmem>>, vector<1x64xf32>
    %16 = vector.broadcast %14 : vector<24x1xf32> to vector<24x64xf32>
    %17 = vector.broadcast %15 : vector<1x64xf32> to vector<24x64xf32>
    %18 = arith.mulf %16, %17 : vector<24x64xf32>
    %19 = arith.addf %12, %18 : vector<24x64xf32>
    %c0_14 = arith.constant 0 : index
    %c0_15 = arith.constant 0 : index
    %c0_16 = arith.constant 0 : index
    %20 = vector.load %arg7[%c0_14, %c0_15, %c0_16] : memref<1x24x64xf32, #tpu.memory_space<vmem>>, vector<1x24x64xf32>
    %21 = vector.shape_cast %20 : vector<1x24x64xf32> to vector<24x64xf32>
    %22 = arith.addf %19, %21 : vector<24x64xf32>
    %c0_17 = arith.constant 0 : index
    %c0_18 = arith.constant 0 : index
    %c0_19 = arith.constant 0 : index
    %23 = vector.load %arg8[%c0_17, %c0_18, %c0_19] : memref<1x24x64xf32, #tpu.memory_space<vmem>>, vector<1x24x64xf32>
    %24 = vector.shape_cast %23 : vector<1x24x64xf32> to vector<24x64xf32>
    %25 = vector.shape_cast %22 : vector<24x64xf32> to vector<1x24x64xf32>
    tpu.vector_store %arg8[%c0_17, %c0_18, %c0_19], %25 {strides = array<i32>} : memref<1x24x64xf32, #tpu.memory_space<vmem>>, vector<1x24x64xf32>,
    return
  }
  func.func @transform_0(%arg0: i32) -> (i32, i32, i32) {
    %c0_i32 = arith.constant 0 : i32
    %c0_i32_0 = arith.constant 0 : i32
    %c0_i32_1 = arith.constant 0 : i32
    return %arg0, %c0_i32, %c0_i32_0 : i32, i32, i32
  }
  func.func @transform_1(%arg0: i32) -> (i32, i32, i32) {
    %c0_i32 = arith.constant 0 : i32
    %c0_i32_0 = arith.constant 0 : i32
    %c0_i32_1 = arith.constant 0 : i32
    return %arg0, %c0_i32, %c0_i32_0 : i32, i32, i32
  }
  func.func @transform_2(%arg0: i32) -> (i32, i32, i32) {
    %c0_i32 = arith.constant 0 : i32
    %c0_i32_0 = arith.constant 0 : i32
    %c0_i32_1 = arith.constant 0 : i32
    return %arg0, %c0_i32, %c0_i32_0 : i32, i32, i32
  }
  func.func @transform_3(%arg0: i32) -> (i32, i32) {
    %c0_i32 = arith.constant 0 : i32
    %c0_i32_0 = arith.constant 0 : i32
    %c0_i32_1 = arith.constant 0 : i32
    return %c0_i32, %c0_i32_0 : i32, i32
  }
  func.func @transform_4(%arg0: i32) -> (i32, i32) {
    %c0_i32 = arith.constant 0 : i32
    %c0_i32_0 = arith.constant 0 : i32
    %c0_i32_1 = arith.constant 0 : i32
    return %c0_i32, %c0_i32_0 : i32, i32
  }
  func.func @transform_5(%arg0: i32) -> (i32, i32) {
    %c0_i32 = arith.constant 0 : i32
    %c0_i32_0 = arith.constant 0 : i32
    %c0_i32_1 = arith.constant 0 : i32
    return %c0_i32, %c0_i32_0 : i32, i32
  }
  func.func @transform_6(%arg0: i32) -> (i32, i32, i32) {
    %c0_i32 = arith.constant 0 : i32
    %c0_i32_0 = arith.constant 0 : i32
    %c0_i32_1 = arith.constant 0 : i32
    return %arg0, %c0_i32, %c0_i32_0 : i32, i32, i32
  }
  func.func @transform_7(%arg0: i32) -> (i32, i32, i32) {
    %c0_i32 = arith.constant 0 : i32
    %c0_i32_0 = arith.constant 0 : i32
    %c0_i32_1 = arith.constant 0 : i32
    return %arg0, %c0_i32, %c0_i32_0 : i32, i32, i32
  }
}

module attributes {stable_mosaic.version = 11 : i64} {
  func.func @_dense_k1_bias_kernel(%arg0: i32, %arg1: i32, %arg2: memref<24x64xbf16, #tpu.memory_space<vmem>>, %arg3: memref<64x192xbf16, #tpu.memory_space<vmem>>, %arg4: memref<1x192xf32, #tpu.memory_space<vmem>>, %arg5: memref<24x192xf32, #tpu.memory_space<vmem>>) attributes {dimension_semantics = [#tpu.dimension_semantics<parallel>, #tpu.dimension_semantics<parallel>], iteration_bounds = array<i64: 2, 1>, scalar_prefetch = 0 : i64, scratch_operands = 0 : i64, tpu.core_type = #tpu.core_type<tc>, window_params = [{transform_indices = @transform_0, window_bounds = array<i64: 24, 64>}, {transform_indices = @transform_1, window_bounds = array<i64: 64, 192>}, {transform_indices = @transform_2, window_bounds = array<i64: 1, 192>}, {transform_indices = @transform_3, window_bounds = array<i64: 24, 192>}]} {
    %c0 = arith.constant 0 : index
    %c0_0 = arith.constant 0 : index
    %0 = vector.load %arg2[%c0, %c0_0] : memref<24x64xbf16, #tpu.memory_space<vmem>>, vector<24x64xbf16>
    %c0_1 = arith.constant 0 : index
    %c0_2 = arith.constant 0 : index
    %1 = vector.load %arg3[%c0_1, %c0_2] : memref<64x192xbf16, #tpu.memory_space<vmem>>, vector<64x192xbf16>
    %cst = arith.constant dense<0.000000e+00> : vector<24x192xf32>
    %2 = tpu.matmul %0, %1, %cst {dimension_numbers = #tpu.dot_dimension_numbers<[1], [0], [0], [1], [0, 0, 1, 1], [], []>} : vector<24x64xbf16>, vector<64x192xbf16>, vector<24x192xf32> -> vector<24x192xf32>
    %c0_3 = arith.constant 0 : index
    %c0_4 = arith.constant 0 : index
    %3 = vector.load %arg4[%c0_3, %c0_4] : memref<1x192xf32, #tpu.memory_space<vmem>>, vector<1x192xf32>
    %4 = vector.broadcast %3 : vector<1x192xf32> to vector<24x192xf32>
    %5 = arith.addf %2, %4 : vector<24x192xf32>
    %c0_5 = arith.constant 0 : index
    %c0_6 = arith.constant 0 : index
    %6 = vector.load %arg5[%c0_5, %c0_6] : memref<24x192xf32, #tpu.memory_space<vmem>>, vector<24x192xf32>
    tpu.vector_store %arg5[%c0_5, %c0_6], %5 {strides = array<i32>} : memref<24x192xf32, #tpu.memory_space<vmem>>, vector<24x192xf32>,
    return
  }
  func.func @transform_0(%arg0: i32, %arg1: i32) -> (i32, i32) {
    %c0_i32 = arith.constant 0 : i32
    %c0_i32_0 = arith.constant 0 : i32
    return %arg0, %c0_i32 : i32, i32
  }
  func.func @transform_1(%arg0: i32, %arg1: i32) -> (i32, i32) {
    %c0_i32 = arith.constant 0 : i32
    %c0_i32_0 = arith.constant 0 : i32
    return %c0_i32, %arg1 : i32, i32
  }
  func.func @transform_2(%arg0: i32, %arg1: i32) -> (i32, i32) {
    %c0_i32 = arith.constant 0 : i32
    %c0_i32_0 = arith.constant 0 : i32
    return %c0_i32, %arg1 : i32, i32
  }
  func.func @transform_3(%arg0: i32, %arg1: i32) -> (i32, i32) {
    %c0_i32 = arith.constant 0 : i32
    return %arg0, %arg1 : i32, i32
  }
}

module attributes {stable_mosaic.version = 11 : i64} {
  func.func @_embed_conv_kernel(%arg0: i32, %arg1: memref<1x16x1xf32, #tpu.memory_space<vmem>>, %arg2: memref<1x16x1xf32, #tpu.memory_space<vmem>>, %arg3: memref<1x16x1xf32, #tpu.memory_space<vmem>>, %arg4: memref<1x64xf32, #tpu.memory_space<vmem>>, %arg5: memref<1x64xf32, #tpu.memory_space<vmem>>, %arg6: memref<1x64xf32, #tpu.memory_space<vmem>>, %arg7: memref<1x16x64xf32, #tpu.memory_space<vmem>>, %arg8: memref<1x16x64xf32, #tpu.memory_space<vmem>>) attributes {dimension_semantics = [#tpu.dimension_semantics<parallel>], iteration_bounds = array<i64: 2>, scalar_prefetch = 0 : i64, scratch_operands = 0 : i64, tpu.core_type = #tpu.core_type<tc>, window_params = [{transform_indices = @transform_0, window_bounds = array<i64: 1, 16, 1>}, {transform_indices = @transform_1, window_bounds = array<i64: 1, 16, 1>}, {transform_indices = @transform_2, window_bounds = array<i64: 1, 16, 1>}, {pipeline_mode = #tpu.pipeline_mode<synchronous>, transform_indices = @transform_3, window_bounds = array<i64: 1, 64>}, {pipeline_mode = #tpu.pipeline_mode<synchronous>, transform_indices = @transform_4, window_bounds = array<i64: 1, 64>}, {pipeline_mode = #tpu.pipeline_mode<synchronous>, transform_indices = @transform_5, window_bounds = array<i64: 1, 64>}, {transform_indices = @transform_6, window_bounds = array<i64: 1, 16, 64>}, {transform_indices = @transform_7, window_bounds = array<i64: 1, 16, 64>}]} {
    %c0 = arith.constant 0 : index
    %c0_0 = arith.constant 0 : index
    %c0_1 = arith.constant 0 : index
    %0 = vector.load %arg1[%c0, %c0_0, %c0_1] : memref<1x16x1xf32, #tpu.memory_space<vmem>>, vector<1x16x1xf32>
    %1 = vector.shape_cast %0 : vector<1x16x1xf32> to vector<16x1xf32>
    %c0_2 = arith.constant 0 : index
    %c0_3 = arith.constant 0 : index
    %2 = vector.load %arg4[%c0_2, %c0_3] : memref<1x64xf32, #tpu.memory_space<vmem>>, vector<1x64xf32>
    %3 = vector.broadcast %1 : vector<16x1xf32> to vector<16x64xf32>
    %4 = vector.broadcast %2 : vector<1x64xf32> to vector<16x64xf32>
    %5 = arith.mulf %3, %4 : vector<16x64xf32>
    %c0_4 = arith.constant 0 : index
    %c0_5 = arith.constant 0 : index
    %c0_6 = arith.constant 0 : index
    %6 = vector.load %arg2[%c0_4, %c0_5, %c0_6] : memref<1x16x1xf32, #tpu.memory_space<vmem>>, vector<1x16x1xf32>
    %7 = vector.shape_cast %6 : vector<1x16x1xf32> to vector<16x1xf32>
    %c0_7 = arith.constant 0 : index
    %c0_8 = arith.constant 0 : index
    %8 = vector.load %arg5[%c0_7, %c0_8] : memref<1x64xf32, #tpu.memory_space<vmem>>, vector<1x64xf32>
    %9 = vector.broadcast %7 : vector<16x1xf32> to vector<16x64xf32>
    %10 = vector.broadcast %8 : vector<1x64xf32> to vector<16x64xf32>
    %11 = arith.mulf %9, %10 : vector<16x64xf32>
    %12 = arith.addf %5, %11 : vector<16x64xf32>
    %c0_9 = arith.constant 0 : index
    %c0_10 = arith.constant 0 : index
    %c0_11 = arith.constant 0 : index
    %13 = vector.load %arg3[%c0_9, %c0_10, %c0_11] : memref<1x16x1xf32, #tpu.memory_space<vmem>>, vector<1x16x1xf32>
    %14 = vector.shape_cast %13 : vector<1x16x1xf32> to vector<16x1xf32>
    %c0_12 = arith.constant 0 : index
    %c0_13 = arith.constant 0 : index
    %15 = vector.load %arg6[%c0_12, %c0_13] : memref<1x64xf32, #tpu.memory_space<vmem>>, vector<1x64xf32>
    %16 = vector.broadcast %14 : vector<16x1xf32> to vector<16x64xf32>
    %17 = vector.broadcast %15 : vector<1x64xf32> to vector<16x64xf32>
    %18 = arith.mulf %16, %17 : vector<16x64xf32>
    %19 = arith.addf %12, %18 : vector<16x64xf32>
    %c0_14 = arith.constant 0 : index
    %c0_15 = arith.constant 0 : index
    %c0_16 = arith.constant 0 : index
    %20 = vector.load %arg7[%c0_14, %c0_15, %c0_16] : memref<1x16x64xf32, #tpu.memory_space<vmem>>, vector<1x16x64xf32>
    %21 = vector.shape_cast %20 : vector<1x16x64xf32> to vector<16x64xf32>
    %22 = arith.addf %19, %21 : vector<16x64xf32>
    %c0_17 = arith.constant 0 : index
    %c0_18 = arith.constant 0 : index
    %c0_19 = arith.constant 0 : index
    %23 = vector.load %arg8[%c0_17, %c0_18, %c0_19] : memref<1x16x64xf32, #tpu.memory_space<vmem>>, vector<1x16x64xf32>
    %24 = vector.shape_cast %23 : vector<1x16x64xf32> to vector<16x64xf32>
    %25 = vector.shape_cast %22 : vector<16x64xf32> to vector<1x16x64xf32>
    tpu.vector_store %arg8[%c0_17, %c0_18, %c0_19], %25 {strides = array<i32>} : memref<1x16x64xf32, #tpu.memory_space<vmem>>, vector<1x16x64xf32>,
    return
  }
  func.func @transform_0(%arg0: i32) -> (i32, i32, i32) {
    %c0_i32 = arith.constant 0 : i32
    %c0_i32_0 = arith.constant 0 : i32
    %c0_i32_1 = arith.constant 0 : i32
    return %arg0, %c0_i32, %c0_i32_0 : i32, i32, i32
  }
  func.func @transform_1(%arg0: i32) -> (i32, i32, i32) {
    %c0_i32 = arith.constant 0 : i32
    %c0_i32_0 = arith.constant 0 : i32
    %c0_i32_1 = arith.constant 0 : i32
    return %arg0, %c0_i32, %c0_i32_0 : i32, i32, i32
  }
  func.func @transform_2(%arg0: i32) -> (i32, i32, i32) {
    %c0_i32 = arith.constant 0 : i32
    %c0_i32_0 = arith.constant 0 : i32
    %c0_i32_1 = arith.constant 0 : i32
    return %arg0, %c0_i32, %c0_i32_0 : i32, i32, i32
  }
  func.func @transform_3(%arg0: i32) -> (i32, i32) {
    %c0_i32 = arith.constant 0 : i32
    %c0_i32_0 = arith.constant 0 : i32
    %c0_i32_1 = arith.constant 0 : i32
    return %c0_i32, %c0_i32_0 : i32, i32
  }
  func.func @transform_4(%arg0: i32) -> (i32, i32) {
    %c0_i32 = arith.constant 0 : i32
    %c0_i32_0 = arith.constant 0 : i32
    %c0_i32_1 = arith.constant 0 : i32
    return %c0_i32, %c0_i32_0 : i32, i32
  }
  func.func @transform_5(%arg0: i32) -> (i32, i32) {
    %c0_i32 = arith.constant 0 : i32
    %c0_i32_0 = arith.constant 0 : i32
    %c0_i32_1 = arith.constant 0 : i32
    return %c0_i32, %c0_i32_0 : i32, i32
  }
  func.func @transform_6(%arg0: i32) -> (i32, i32, i32) {
    %c0_i32 = arith.constant 0 : i32
    %c0_i32_0 = arith.constant 0 : i32
    %c0_i32_1 = arith.constant 0 : i32
    return %arg0, %c0_i32, %c0_i32_0 : i32, i32, i32
  }
  func.func @transform_7(%arg0: i32) -> (i32, i32, i32) {
    %c0_i32 = arith.constant 0 : i32
    %c0_i32_0 = arith.constant 0 : i32
    %c0_i32_1 = arith.constant 0 : i32
    return %arg0, %c0_i32, %c0_i32_0 : i32, i32, i32
  }
}

module attributes {stable_mosaic.version = 11 : i64} {
  func.func @_dense_k1_bias_kernel(%arg0: i32, %arg1: i32, %arg2: memref<16x64xbf16, #tpu.memory_space<vmem>>, %arg3: memref<64x192xbf16, #tpu.memory_space<vmem>>, %arg4: memref<1x192xf32, #tpu.memory_space<vmem>>, %arg5: memref<16x192xf32, #tpu.memory_space<vmem>>) attributes {dimension_semantics = [#tpu.dimension_semantics<parallel>, #tpu.dimension_semantics<parallel>], iteration_bounds = array<i64: 2, 1>, scalar_prefetch = 0 : i64, scratch_operands = 0 : i64, tpu.core_type = #tpu.core_type<tc>, window_params = [{transform_indices = @transform_0, window_bounds = array<i64: 16, 64>}, {transform_indices = @transform_1, window_bounds = array<i64: 64, 192>}, {transform_indices = @transform_2, window_bounds = array<i64: 1, 192>}, {transform_indices = @transform_3, window_bounds = array<i64: 16, 192>}]} {
    %c0 = arith.constant 0 : index
    %c0_0 = arith.constant 0 : index
    %0 = vector.load %arg2[%c0, %c0_0] : memref<16x64xbf16, #tpu.memory_space<vmem>>, vector<16x64xbf16>
    %c0_1 = arith.constant 0 : index
    %c0_2 = arith.constant 0 : index
    %1 = vector.load %arg3[%c0_1, %c0_2] : memref<64x192xbf16, #tpu.memory_space<vmem>>, vector<64x192xbf16>
    %cst = arith.constant dense<0.000000e+00> : vector<16x192xf32>
    %2 = tpu.matmul %0, %1, %cst {dimension_numbers = #tpu.dot_dimension_numbers<[1], [0], [0], [1], [0, 0, 1, 1], [], []>} : vector<16x64xbf16>, vector<64x192xbf16>, vector<16x192xf32> -> vector<16x192xf32>
    %c0_3 = arith.constant 0 : index
    %c0_4 = arith.constant 0 : index
    %3 = vector.load %arg4[%c0_3, %c0_4] : memref<1x192xf32, #tpu.memory_space<vmem>>, vector<1x192xf32>
    %4 = vector.broadcast %3 : vector<1x192xf32> to vector<16x192xf32>
    %5 = arith.addf %2, %4 : vector<16x192xf32>
    %c0_5 = arith.constant 0 : index
    %c0_6 = arith.constant 0 : index
    %6 = vector.load %arg5[%c0_5, %c0_6] : memref<16x192xf32, #tpu.memory_space<vmem>>, vector<16x192xf32>
    tpu.vector_store %arg5[%c0_5, %c0_6], %5 {strides = array<i32>} : memref<16x192xf32, #tpu.memory_space<vmem>>, vector<16x192xf32>,
    return
  }
  func.func @transform_0(%arg0: i32, %arg1: i32) -> (i32, i32) {
    %c0_i32 = arith.constant 0 : i32
    %c0_i32_0 = arith.constant 0 : i32
    return %arg0, %c0_i32 : i32, i32
  }
  func.func @transform_1(%arg0: i32, %arg1: i32) -> (i32, i32) {
    %c0_i32 = arith.constant 0 : i32
    %c0_i32_0 = arith.constant 0 : i32
    return %c0_i32, %arg1 : i32, i32
  }
  func.func @transform_2(%arg0: i32, %arg1: i32) -> (i32, i32) {
    %c0_i32 = arith.constant 0 : i32
    %c0_i32_0 = arith.constant 0 : i32
    return %c0_i32, %arg1 : i32, i32
  }
  func.func @transform_3(%arg0: i32, %arg1: i32) -> (i32, i32) {
    %c0_i32 = arith.constant 0 : i32
    return %arg0, %arg1 : i32, i32
  }
}

module attributes {stable_mosaic.version = 11 : i64} {
  func.func @_proj_add_decomp_kernel(%arg0: i32, %arg1: memref<24x24xf32, #tpu.memory_space<vmem>>, %arg2: memref<1x24x64xbf16, #tpu.memory_space<vmem>>, %arg3: memref<64x64xbf16, #tpu.memory_space<vmem>>, %arg4: memref<1x64xf32, #tpu.memory_space<vmem>>, %arg5: memref<1x24x64xf32, #tpu.memory_space<vmem>>, %arg6: memref<1x24x64xf32, #tpu.memory_space<vmem>>, %arg7: memref<1x24x64xf32, #tpu.memory_space<vmem>>) attributes {dimension_semantics = [#tpu.dimension_semantics<parallel>], iteration_bounds = array<i64: 2>, scalar_prefetch = 0 : i64, scratch_operands = 0 : i64, tpu.core_type = #tpu.core_type<tc>, window_params = [{pipeline_mode = #tpu.pipeline_mode<synchronous>, transform_indices = @transform_0, window_bounds = array<i64: 24, 24>}, {transform_indices = @transform_1, window_bounds = array<i64: 1, 24, 64>}, {pipeline_mode = #tpu.pipeline_mode<synchronous>, transform_indices = @transform_2, window_bounds = array<i64: 64, 64>}, {pipeline_mode = #tpu.pipeline_mode<synchronous>, transform_indices = @transform_3, window_bounds = array<i64: 1, 64>}, {transform_indices = @transform_4, window_bounds = array<i64: 1, 24, 64>}, {transform_indices = @transform_5, window_bounds = array<i64: 1, 24, 64>}, {transform_indices = @transform_6, window_bounds = array<i64: 1, 24, 64>}]} {
    %c0 = arith.constant 0 : index
    %c0_0 = arith.constant 0 : index
    %c0_1 = arith.constant 0 : index
    %0 = vector.load %arg2[%c0, %c0_0, %c0_1] : memref<1x24x64xbf16, #tpu.memory_space<vmem>>, vector<1x24x64xbf16>
    %1 = vector.shape_cast %0 : vector<1x24x64xbf16> to vector<24x64xbf16>
    %c0_2 = arith.constant 0 : index
    %c0_3 = arith.constant 0 : index
    %2 = vector.load %arg3[%c0_2, %c0_3] : memref<64x64xbf16, #tpu.memory_space<vmem>>, vector<64x64xbf16>
    %cst = arith.constant dense<0.000000e+00> : vector<24x64xf32>
    %3 = tpu.matmul %1, %2, %cst {dimension_numbers = #tpu.dot_dimension_numbers<[1], [0], [0], [1], [0, 0, 1, 1], [], []>} : vector<24x64xbf16>, vector<64x64xbf16>, vector<24x64xf32> -> vector<24x64xf32>
    %c0_4 = arith.constant 0 : index
    %c0_5 = arith.constant 0 : index
    %4 = vector.load %arg4[%c0_4, %c0_5] : memref<1x64xf32, #tpu.memory_space<vmem>>, vector<1x64xf32>
    %5 = vector.broadcast %4 : vector<1x64xf32> to vector<24x64xf32>
    %6 = arith.addf %3, %5 : vector<24x64xf32>
    %c0_6 = arith.constant 0 : index
    %c0_7 = arith.constant 0 : index
    %c0_8 = arith.constant 0 : index
    %7 = vector.load %arg5[%c0_6, %c0_7, %c0_8] : memref<1x24x64xf32, #tpu.memory_space<vmem>>, vector<1x24x64xf32>
    %8 = vector.shape_cast %7 : vector<1x24x64xf32> to vector<24x64xf32>
    %9 = arith.addf %8, %6 : vector<24x64xf32>
    %c0_9 = arith.constant 0 : index
    %c0_10 = arith.constant 0 : index
    %10 = vector.load %arg1[%c0_9, %c0_10] : memref<24x24xf32, #tpu.memory_space<vmem>>, vector<24x24xf32>
    %cst_11 = arith.constant dense<0.000000e+00> : vector<24x64xf32>
    %11 = tpu.matmul %10, %9, %cst_11 {dimension_numbers = #tpu.dot_dimension_numbers<[1], [0], [0], [1], [0, 0, 1, 1], [], []>} : vector<24x24xf32>, vector<24x64xf32>, vector<24x64xf32> -> vector<24x64xf32>
    %c0_12 = arith.constant 0 : index
    %c0_13 = arith.constant 0 : index
    %c0_14 = arith.constant 0 : index
    %12 = vector.load %arg7[%c0_12, %c0_13, %c0_14] : memref<1x24x64xf32, #tpu.memory_space<vmem>>, vector<1x24x64xf32>
    %13 = vector.shape_cast %12 : vector<1x24x64xf32> to vector<24x64xf32>
    %14 = vector.shape_cast %11 : vector<24x64xf32> to vector<1x24x64xf32>
    tpu.vector_store %arg7[%c0_12, %c0_13, %c0_14], %14 {strides = array<i32>} : memref<1x24x64xf32, #tpu.memory_space<vmem>>, vector<1x24x64xf32>,
    %15 = arith.subf %9, %11 : vector<24x64xf32>
    %c0_15 = arith.constant 0 : index
    %c0_16 = arith.constant 0 : index
    %c0_17 = arith.constant 0 : index
    %16 = vector.load %arg6[%c0_15, %c0_16, %c0_17] : memref<1x24x64xf32, #tpu.memory_space<vmem>>, vector<1x24x64xf32>
    %17 = vector.shape_cast %16 : vector<1x24x64xf32> to vector<24x64xf32>
    %18 = vector.shape_cast %15 : vector<24x64xf32> to vector<1x24x64xf32>
    tpu.vector_store %arg6[%c0_15, %c0_16, %c0_17], %18 {strides = array<i32>} : memref<1x24x64xf32, #tpu.memory_space<vmem>>, vector<1x24x64xf32>,
    return
  }
  func.func @transform_0(%arg0: i32) -> (i32, i32) {
    %c0_i32 = arith.constant 0 : i32
    %c0_i32_0 = arith.constant 0 : i32
    %c0_i32_1 = arith.constant 0 : i32
    return %c0_i32, %c0_i32_0 : i32, i32
  }
  func.func @transform_1(%arg0: i32) -> (i32, i32, i32) {
    %c0_i32 = arith.constant 0 : i32
    %c0_i32_0 = arith.constant 0 : i32
    %c0_i32_1 = arith.constant 0 : i32
    return %arg0, %c0_i32, %c0_i32_0 : i32, i32, i32
  }
  func.func @transform_2(%arg0: i32) -> (i32, i32) {
    %c0_i32 = arith.constant 0 : i32
    %c0_i32_0 = arith.constant 0 : i32
    %c0_i32_1 = arith.constant 0 : i32
    return %c0_i32, %c0_i32_0 : i32, i32
  }
  func.func @transform_3(%arg0: i32) -> (i32, i32) {
    %c0_i32 = arith.constant 0 : i32
    %c0_i32_0 = arith.constant 0 : i32
    %c0_i32_1 = arith.constant 0 : i32
    return %c0_i32, %c0_i32_0 : i32, i32
  }
  func.func @transform_4(%arg0: i32) -> (i32, i32, i32) {
    %c0_i32 = arith.constant 0 : i32
    %c0_i32_0 = arith.constant 0 : i32
    %c0_i32_1 = arith.constant 0 : i32
    return %arg0, %c0_i32, %c0_i32_0 : i32, i32, i32
  }
  func.func @transform_5(%arg0: i32) -> (i32, i32, i32) {
    %c0_i32 = arith.constant 0 : i32
    %c0_i32_0 = arith.constant 0 : i32
    %c0_i32_1 = arith.constant 0 : i32
    return %arg0, %c0_i32, %c0_i32_0 : i32, i32, i32
  }
  func.func @transform_6(%arg0: i32) -> (i32, i32, i32) {
    %c0_i32 = arith.constant 0 : i32
    %c0_i32_0 = arith.constant 0 : i32
    %c0_i32_1 = arith.constant 0 : i32
    return %arg0, %c0_i32, %c0_i32_0 : i32, i32, i32
  }
}

module attributes {stable_mosaic.version = 11 : i64} {
  func.func @_dense_k1_bias_kernel(%arg0: i32, %arg1: i32, %arg2: memref<24x64xbf16, #tpu.memory_space<vmem>>, %arg3: memref<64x64xbf16, #tpu.memory_space<vmem>>, %arg4: memref<1x64xf32, #tpu.memory_space<vmem>>, %arg5: memref<24x64xf32, #tpu.memory_space<vmem>>) attributes {dimension_semantics = [#tpu.dimension_semantics<parallel>, #tpu.dimension_semantics<parallel>], iteration_bounds = array<i64: 2, 1>, scalar_prefetch = 0 : i64, scratch_operands = 0 : i64, tpu.core_type = #tpu.core_type<tc>, window_params = [{transform_indices = @transform_0, window_bounds = array<i64: 24, 64>}, {transform_indices = @transform_1, window_bounds = array<i64: 64, 64>}, {transform_indices = @transform_2, window_bounds = array<i64: 1, 64>}, {transform_indices = @transform_3, window_bounds = array<i64: 24, 64>}]} {
    %c0 = arith.constant 0 : index
    %c0_0 = arith.constant 0 : index
    %0 = vector.load %arg2[%c0, %c0_0] : memref<24x64xbf16, #tpu.memory_space<vmem>>, vector<24x64xbf16>
    %c0_1 = arith.constant 0 : index
    %c0_2 = arith.constant 0 : index
    %1 = vector.load %arg3[%c0_1, %c0_2] : memref<64x64xbf16, #tpu.memory_space<vmem>>, vector<64x64xbf16>
    %cst = arith.constant dense<0.000000e+00> : vector<24x64xf32>
    %2 = tpu.matmul %0, %1, %cst {dimension_numbers = #tpu.dot_dimension_numbers<[1], [0], [0], [1], [0, 0, 1, 1], [], []>} : vector<24x64xbf16>, vector<64x64xbf16>, vector<24x64xf32> -> vector<24x64xf32>
    %c0_3 = arith.constant 0 : index
    %c0_4 = arith.constant 0 : index
    %3 = vector.load %arg4[%c0_3, %c0_4] : memref<1x64xf32, #tpu.memory_space<vmem>>, vector<1x64xf32>
    %4 = vector.broadcast %3 : vector<1x64xf32> to vector<24x64xf32>
    %5 = arith.addf %2, %4 : vector<24x64xf32>
    %c0_5 = arith.constant 0 : index
    %c0_6 = arith.constant 0 : index
    %6 = vector.load %arg5[%c0_5, %c0_6] : memref<24x64xf32, #tpu.memory_space<vmem>>, vector<24x64xf32>
    tpu.vector_store %arg5[%c0_5, %c0_6], %5 {strides = array<i32>} : memref<24x64xf32, #tpu.memory_space<vmem>>, vector<24x64xf32>,
    return
  }
  func.func @transform_0(%arg0: i32, %arg1: i32) -> (i32, i32) {
    %c0_i32 = arith.constant 0 : i32
    %c0_i32_0 = arith.constant 0 : i32
    return %arg0, %c0_i32 : i32, i32
  }
  func.func @transform_1(%arg0: i32, %arg1: i32) -> (i32, i32) {
    %c0_i32 = arith.constant 0 : i32
    %c0_i32_0 = arith.constant 0 : i32
    return %c0_i32, %arg1 : i32, i32
  }
  func.func @transform_2(%arg0: i32, %arg1: i32) -> (i32, i32) {
    %c0_i32 = arith.constant 0 : i32
    %c0_i32_0 = arith.constant 0 : i32
    return %c0_i32, %arg1 : i32, i32
  }
  func.func @transform_3(%arg0: i32, %arg1: i32) -> (i32, i32) {
    %c0_i32 = arith.constant 0 : i32
    return %arg0, %arg1 : i32, i32
  }
}

module attributes {stable_mosaic.version = 11 : i64} {
  func.func @_proj_add_decomp_kernel(%arg0: i32, %arg1: memref<16x16xf32, #tpu.memory_space<vmem>>, %arg2: memref<1x16x64xbf16, #tpu.memory_space<vmem>>, %arg3: memref<64x64xbf16, #tpu.memory_space<vmem>>, %arg4: memref<1x64xf32, #tpu.memory_space<vmem>>, %arg5: memref<1x16x64xf32, #tpu.memory_space<vmem>>, %arg6: memref<1x16x64xf32, #tpu.memory_space<vmem>>, %arg7: memref<1x16x64xf32, #tpu.memory_space<vmem>>) attributes {dimension_semantics = [#tpu.dimension_semantics<parallel>], iteration_bounds = array<i64: 2>, scalar_prefetch = 0 : i64, scratch_operands = 0 : i64, tpu.core_type = #tpu.core_type<tc>, window_params = [{pipeline_mode = #tpu.pipeline_mode<synchronous>, transform_indices = @transform_0, window_bounds = array<i64: 16, 16>}, {transform_indices = @transform_1, window_bounds = array<i64: 1, 16, 64>}, {pipeline_mode = #tpu.pipeline_mode<synchronous>, transform_indices = @transform_2, window_bounds = array<i64: 64, 64>}, {pipeline_mode = #tpu.pipeline_mode<synchronous>, transform_indices = @transform_3, window_bounds = array<i64: 1, 64>}, {transform_indices = @transform_4, window_bounds = array<i64: 1, 16, 64>}, {transform_indices = @transform_5, window_bounds = array<i64: 1, 16, 64>}, {transform_indices = @transform_6, window_bounds = array<i64: 1, 16, 64>}]} {
    %c0 = arith.constant 0 : index
    %c0_0 = arith.constant 0 : index
    %c0_1 = arith.constant 0 : index
    %0 = vector.load %arg2[%c0, %c0_0, %c0_1] : memref<1x16x64xbf16, #tpu.memory_space<vmem>>, vector<1x16x64xbf16>
    %1 = vector.shape_cast %0 : vector<1x16x64xbf16> to vector<16x64xbf16>
    %c0_2 = arith.constant 0 : index
    %c0_3 = arith.constant 0 : index
    %2 = vector.load %arg3[%c0_2, %c0_3] : memref<64x64xbf16, #tpu.memory_space<vmem>>, vector<64x64xbf16>
    %cst = arith.constant dense<0.000000e+00> : vector<16x64xf32>
    %3 = tpu.matmul %1, %2, %cst {dimension_numbers = #tpu.dot_dimension_numbers<[1], [0], [0], [1], [0, 0, 1, 1], [], []>} : vector<16x64xbf16>, vector<64x64xbf16>, vector<16x64xf32> -> vector<16x64xf32>
    %c0_4 = arith.constant 0 : index
    %c0_5 = arith.constant 0 : index
    %4 = vector.load %arg4[%c0_4, %c0_5] : memref<1x64xf32, #tpu.memory_space<vmem>>, vector<1x64xf32>
    %5 = vector.broadcast %4 : vector<1x64xf32> to vector<16x64xf32>
    %6 = arith.addf %3, %5 : vector<16x64xf32>
    %c0_6 = arith.constant 0 : index
    %c0_7 = arith.constant 0 : index
    %c0_8 = arith.constant 0 : index
    %7 = vector.load %arg5[%c0_6, %c0_7, %c0_8] : memref<1x16x64xf32, #tpu.memory_space<vmem>>, vector<1x16x64xf32>
    %8 = vector.shape_cast %7 : vector<1x16x64xf32> to vector<16x64xf32>
    %9 = arith.addf %8, %6 : vector<16x64xf32>
    %c0_9 = arith.constant 0 : index
    %c0_10 = arith.constant 0 : index
    %10 = vector.load %arg1[%c0_9, %c0_10] : memref<16x16xf32, #tpu.memory_space<vmem>>, vector<16x16xf32>
    %cst_11 = arith.constant dense<0.000000e+00> : vector<16x64xf32>
    %11 = tpu.matmul %10, %9, %cst_11 {dimension_numbers = #tpu.dot_dimension_numbers<[1], [0], [0], [1], [0, 0, 1, 1], [], []>} : vector<16x16xf32>, vector<16x64xf32>, vector<16x64xf32> -> vector<16x64xf32>
    %c0_12 = arith.constant 0 : index
    %c0_13 = arith.constant 0 : index
    %c0_14 = arith.constant 0 : index
    %12 = vector.load %arg7[%c0_12, %c0_13, %c0_14] : memref<1x16x64xf32, #tpu.memory_space<vmem>>, vector<1x16x64xf32>
    %13 = vector.shape_cast %12 : vector<1x16x64xf32> to vector<16x64xf32>
    %14 = vector.shape_cast %11 : vector<16x64xf32> to vector<1x16x64xf32>
    tpu.vector_store %arg7[%c0_12, %c0_13, %c0_14], %14 {strides = array<i32>} : memref<1x16x64xf32, #tpu.memory_space<vmem>>, vector<1x16x64xf32>,
    %15 = arith.subf %9, %11 : vector<16x64xf32>
    %c0_15 = arith.constant 0 : index
    %c0_16 = arith.constant 0 : index
    %c0_17 = arith.constant 0 : index
    %16 = vector.load %arg6[%c0_15, %c0_16, %c0_17] : memref<1x16x64xf32, #tpu.memory_space<vmem>>, vector<1x16x64xf32>
    %17 = vector.shape_cast %16 : vector<1x16x64xf32> to vector<16x64xf32>
    %18 = vector.shape_cast %15 : vector<16x64xf32> to vector<1x16x64xf32>
    tpu.vector_store %arg6[%c0_15, %c0_16, %c0_17], %18 {strides = array<i32>} : memref<1x16x64xf32, #tpu.memory_space<vmem>>, vector<1x16x64xf32>,
    return
  }
  func.func @transform_0(%arg0: i32) -> (i32, i32) {
    %c0_i32 = arith.constant 0 : i32
    %c0_i32_0 = arith.constant 0 : i32
    %c0_i32_1 = arith.constant 0 : i32
    return %c0_i32, %c0_i32_0 : i32, i32
  }
  func.func @transform_1(%arg0: i32) -> (i32, i32, i32) {
    %c0_i32 = arith.constant 0 : i32
    %c0_i32_0 = arith.constant 0 : i32
    %c0_i32_1 = arith.constant 0 : i32
    return %arg0, %c0_i32, %c0_i32_0 : i32, i32, i32
  }
  func.func @transform_2(%arg0: i32) -> (i32, i32) {
    %c0_i32 = arith.constant 0 : i32
    %c0_i32_0 = arith.constant 0 : i32
    %c0_i32_1 = arith.constant 0 : i32
    return %c0_i32, %c0_i32_0 : i32, i32
  }
  func.func @transform_3(%arg0: i32) -> (i32, i32) {
    %c0_i32 = arith.constant 0 : i32
    %c0_i32_0 = arith.constant 0 : i32
    %c0_i32_1 = arith.constant 0 : i32
    return %c0_i32, %c0_i32_0 : i32, i32
  }
  func.func @transform_4(%arg0: i32) -> (i32, i32, i32) {
    %c0_i32 = arith.constant 0 : i32
    %c0_i32_0 = arith.constant 0 : i32
    %c0_i32_1 = arith.constant 0 : i32
    return %arg0, %c0_i32, %c0_i32_0 : i32, i32, i32
  }
  func.func @transform_5(%arg0: i32) -> (i32, i32, i32) {
    %c0_i32 = arith.constant 0 : i32
    %c0_i32_0 = arith.constant 0 : i32
    %c0_i32_1 = arith.constant 0 : i32
    return %arg0, %c0_i32, %c0_i32_0 : i32, i32, i32
  }
  func.func @transform_6(%arg0: i32) -> (i32, i32, i32) {
    %c0_i32 = arith.constant 0 : i32
    %c0_i32_0 = arith.constant 0 : i32
    %c0_i32_1 = arith.constant 0 : i32
    return %arg0, %c0_i32, %c0_i32_0 : i32, i32, i32
  }
}

module attributes {stable_mosaic.version = 11 : i64} {
  func.func @_ffn_add_decomp_kernel(%arg0: i32, %arg1: memref<16x16xf32, #tpu.memory_space<vmem>>, %arg2: memref<1x16x64xf32, #tpu.memory_space<vmem>>, %arg3: memref<64x32xbf16, #tpu.memory_space<vmem>>, %arg4: memref<32x64xbf16, #tpu.memory_space<vmem>>, %arg5: memref<1x16x64xf32, #tpu.memory_space<vmem>>, %arg6: memref<1x16x64xf32, #tpu.memory_space<vmem>>) attributes {dimension_semantics = [#tpu.dimension_semantics<parallel>], iteration_bounds = array<i64: 2>, scalar_prefetch = 0 : i64, scratch_operands = 0 : i64, tpu.core_type = #tpu.core_type<tc>, window_params = [{pipeline_mode = #tpu.pipeline_mode<synchronous>, transform_indices = @transform_0, window_bounds = array<i64: 16, 16>}, {transform_indices = @transform_1, window_bounds = array<i64: 1, 16, 64>}, {pipeline_mode = #tpu.pipeline_mode<synchronous>, transform_indices = @transform_2, window_bounds = array<i64: 64, 32>}, {pipeline_mode = #tpu.pipeline_mode<synchronous>, transform_indices = @transform_3, window_bounds = array<i64: 32, 64>}, {transform_indices = @transform_4, window_bounds = array<i64: 1, 16, 64>}, {transform_indices = @transform_5, window_bounds = array<i64: 1, 16, 64>}]} {
    %c0 = arith.constant 0 : index
    %c0_0 = arith.constant 0 : index
    %c0_1 = arith.constant 0 : index
    %0 = vector.load %arg2[%c0, %c0_0, %c0_1] : memref<1x16x64xf32, #tpu.memory_space<vmem>>, vector<1x16x64xf32>
    %1 = vector.shape_cast %0 : vector<1x16x64xf32> to vector<16x64xf32>
    %2 = arith.truncf %1 : vector<16x64xf32> to vector<16x64xbf16>
    %c0_2 = arith.constant 0 : index
    %c0_3 = arith.constant 0 : index
    %3 = vector.load %arg3[%c0_2, %c0_3] : memref<64x32xbf16, #tpu.memory_space<vmem>>, vector<64x32xbf16>
    %cst = arith.constant dense<0.000000e+00> : vector<16x32xf32>
    %4 = tpu.matmul %2, %3, %cst {dimension_numbers = #tpu.dot_dimension_numbers<[1], [0], [0], [1], [0, 0, 1, 1], [], []>} : vector<16x64xbf16>, vector<64x32xbf16>, vector<16x32xf32> -> vector<16x32xf32>
    %cst_4 = arith.constant 5.000000e-01 : f32
    %5 = vector.broadcast %cst_4 : f32 to vector<16x32xf32>
    %6 = arith.mulf %5, %4 : vector<16x32xf32>
    %cst_5 = arith.constant 4.471500e-02 : f32
    %7 = vector.broadcast %cst_5 : f32 to vector<16x32xf32>
    %8 = arith.mulf %7, %4 : vector<16x32xf32>
    %9 = arith.mulf %8, %4 : vector<16x32xf32>
    %10 = arith.mulf %9, %4 : vector<16x32xf32>
    %11 = arith.addf %4, %10 : vector<16x32xf32>
    %cst_6 = arith.constant 0.797884583 : f32
    %12 = vector.broadcast %cst_6 : f32 to vector<16x32xf32>
    %13 = arith.mulf %12, %11 : vector<16x32xf32>
    %14 = math.tanh %13 : vector<16x32xf32>
    %cst_7 = arith.constant 1.000000e+00 : f32
    %15 = vector.broadcast %cst_7 : f32 to vector<16x32xf32>
    %16 = arith.addf %15, %14 : vector<16x32xf32>
    %17 = arith.mulf %6, %16 : vector<16x32xf32>
    %18 = arith.truncf %17 : vector<16x32xf32> to vector<16x32xbf16>
    %c0_8 = arith.constant 0 : index
    %c0_9 = arith.constant 0 : index
    %19 = vector.load %arg4[%c0_8, %c0_9] : memref<32x64xbf16, #tpu.memory_space<vmem>>, vector<32x64xbf16>
    %cst_10 = arith.constant dense<0.000000e+00> : vector<16x64xf32>
    %20 = tpu.matmul %18, %19, %cst_10 {dimension_numbers = #tpu.dot_dimension_numbers<[1], [0], [0], [1], [0, 0, 1, 1], [], []>} : vector<16x32xbf16>, vector<32x64xbf16>, vector<16x64xf32> -> vector<16x64xf32>
    %21 = arith.addf %1, %20 : vector<16x64xf32>
    %c0_11 = arith.constant 0 : index
    %c0_12 = arith.constant 0 : index
    %22 = vector.load %arg1[%c0_11, %c0_12] : memref<16x16xf32, #tpu.memory_space<vmem>>, vector<16x16xf32>
    %cst_13 = arith.constant dense<0.000000e+00> : vector<16x64xf32>
    %23 = tpu.matmul %22, %21, %cst_13 {dimension_numbers = #tpu.dot_dimension_numbers<[1], [0], [0], [1], [0, 0, 1, 1], [], []>} : vector<16x16xf32>, vector<16x64xf32>, vector<16x64xf32> -> vector<16x64xf32>
    %c0_14 = arith.constant 0 : index
    %c0_15 = arith.constant 0 : index
    %c0_16 = arith.constant 0 : index
    %24 = vector.load %arg6[%c0_14, %c0_15, %c0_16] : memref<1x16x64xf32, #tpu.memory_space<vmem>>, vector<1x16x64xf32>
    %25 = vector.shape_cast %24 : vector<1x16x64xf32> to vector<16x64xf32>
    %26 = vector.shape_cast %23 : vector<16x64xf32> to vector<1x16x64xf32>
    tpu.vector_store %arg6[%c0_14, %c0_15, %c0_16], %26 {strides = array<i32>} : memref<1x16x64xf32, #tpu.memory_space<vmem>>, vector<1x16x64xf32>,
    %27 = arith.subf %21, %23 : vector<16x64xf32>
    %c0_17 = arith.constant 0 : index
    %c0_18 = arith.constant 0 : index
    %c0_19 = arith.constant 0 : index
    %28 = vector.load %arg5[%c0_17, %c0_18, %c0_19] : memref<1x16x64xf32, #tpu.memory_space<vmem>>, vector<1x16x64xf32>
    %29 = vector.shape_cast %28 : vector<1x16x64xf32> to vector<16x64xf32>
    %30 = vector.shape_cast %27 : vector<16x64xf32> to vector<1x16x64xf32>
    tpu.vector_store %arg5[%c0_17, %c0_18, %c0_19], %30 {strides = array<i32>} : memref<1x16x64xf32, #tpu.memory_space<vmem>>, vector<1x16x64xf32>,
    return
  }
  func.func @transform_0(%arg0: i32) -> (i32, i32) {
    %c0_i32 = arith.constant 0 : i32
    %c0_i32_0 = arith.constant 0 : i32
    %c0_i32_1 = arith.constant 0 : i32
    return %c0_i32, %c0_i32_0 : i32, i32
  }
  func.func @transform_1(%arg0: i32) -> (i32, i32, i32) {
    %c0_i32 = arith.constant 0 : i32
    %c0_i32_0 = arith.constant 0 : i32
    %c0_i32_1 = arith.constant 0 : i32
    return %arg0, %c0_i32, %c0_i32_0 : i32, i32, i32
  }
  func.func @transform_2(%arg0: i32) -> (i32, i32) {
    %c0_i32 = arith.constant 0 : i32
    %c0_i32_0 = arith.constant 0 : i32
    %c0_i32_1 = arith.constant 0 : i32
    return %c0_i32, %c0_i32_0 : i32, i32
  }
  func.func @transform_3(%arg0: i32) -> (i32, i32) {
    %c0_i32 = arith.constant 0 : i32
    %c0_i32_0 = arith.constant 0 : i32
    %c0_i32_1 = arith.constant 0 : i32
    return %c0_i32, %c0_i32_0 : i32, i32
  }
  func.func @transform_4(%arg0: i32) -> (i32, i32, i32) {
    %c0_i32 = arith.constant 0 : i32
    %c0_i32_0 = arith.constant 0 : i32
    %c0_i32_1 = arith.constant 0 : i32
    return %arg0, %c0_i32, %c0_i32_0 : i32, i32, i32
  }
  func.func @transform_5(%arg0: i32) -> (i32, i32, i32) {
    %c0_i32 = arith.constant 0 : i32
    %c0_i32_0 = arith.constant 0 : i32
    %c0_i32_1 = arith.constant 0 : i32
    return %arg0, %c0_i32, %c0_i32_0 : i32, i32, i32
  }
}

module attributes {stable_mosaic.version = 11 : i64} {
  func.func @_my_layernorm_kernel(%arg0: i32, %arg1: memref<1x16x64xf32, #tpu.memory_space<vmem>>, %arg2: memref<1x64xf32, #tpu.memory_space<vmem>>, %arg3: memref<1x64xf32, #tpu.memory_space<vmem>>, %arg4: memref<1x16x64xf32, #tpu.memory_space<vmem>>) attributes {dimension_semantics = [#tpu.dimension_semantics<parallel>], iteration_bounds = array<i64: 2>, scalar_prefetch = 0 : i64, scratch_operands = 0 : i64, tpu.core_type = #tpu.core_type<tc>, window_params = [{transform_indices = @transform_0, window_bounds = array<i64: 1, 16, 64>}, {pipeline_mode = #tpu.pipeline_mode<synchronous>, transform_indices = @transform_1, window_bounds = array<i64: 1, 64>}, {pipeline_mode = #tpu.pipeline_mode<synchronous>, transform_indices = @transform_2, window_bounds = array<i64: 1, 64>}, {transform_indices = @transform_3, window_bounds = array<i64: 1, 16, 64>}]} {
    %c0 = arith.constant 0 : index
    %c0_0 = arith.constant 0 : index
    %c0_1 = arith.constant 0 : index
    %0 = vector.load %arg1[%c0, %c0_0, %c0_1] : memref<1x16x64xf32, #tpu.memory_space<vmem>>, vector<1x16x64xf32>
    %1 = vector.shape_cast %0 : vector<1x16x64xf32> to vector<16x64xf32>
    %cst = arith.constant dense<0.000000e+00> : vector<16xf32>
    %2 = vector.multi_reduction <add>, %1, %cst [1] : vector<16x64xf32> to vector<16xf32>
    %3 = vector.shape_cast %2 : vector<16xf32> to vector<16x1xf32>
    %cst_2 = arith.constant 6.400000e+01 : f32
    %4 = vector.broadcast %cst_2 : f32 to vector<16x1xf32>
    %5 = arith.divf %3, %4 : vector<16x1xf32>
    %6 = vector.broadcast %5 : vector<16x1xf32> to vector<16x64xf32>
    %7 = arith.subf %1, %6 : vector<16x64xf32>
    %8 = vector.broadcast %5 : vector<16x1xf32> to vector<16x64xf32>
    %9 = arith.subf %1, %8 : vector<16x64xf32>
    %10 = arith.mulf %7, %9 : vector<16x64xf32>
    %cst_3 = arith.constant dense<0.000000e+00> : vector<16xf32>
    %11 = vector.multi_reduction <add>, %10, %cst_3 [1] : vector<16x64xf32> to vector<16xf32>
    %12 = vector.shape_cast %11 : vector<16xf32> to vector<16x1xf32>
    %cst_4 = arith.constant 6.400000e+01 : f32
    %13 = vector.broadcast %cst_4 : f32 to vector<16x1xf32>
    %14 = arith.divf %12, %13 : vector<16x1xf32>
    %15 = vector.broadcast %5 : vector<16x1xf32> to vector<16x64xf32>
    %16 = arith.subf %1, %15 : vector<16x64xf32>
    %cst_5 = arith.constant 9.99999974E-6 : f32
    %17 = vector.broadcast %cst_5 : f32 to vector<16x1xf32>
    %18 = arith.addf %14, %17 : vector<16x1xf32>
    %19 = math.rsqrt %18 : vector<16x1xf32>
    %20 = vector.broadcast %19 : vector<16x1xf32> to vector<16x64xf32>
    %21 = arith.mulf %16, %20 : vector<16x64xf32>
    %c0_6 = arith.constant 0 : index
    %c0_7 = arith.constant 0 : index
    %22 = vector.load %arg2[%c0_6, %c0_7] : memref<1x64xf32, #tpu.memory_space<vmem>>, vector<1x64xf32>
    %23 = vector.broadcast %22 : vector<1x64xf32> to vector<16x64xf32>
    %24 = arith.mulf %21, %23 : vector<16x64xf32>
    %c0_8 = arith.constant 0 : index
    %c0_9 = arith.constant 0 : index
    %25 = vector.load %arg3[%c0_8, %c0_9] : memref<1x64xf32, #tpu.memory_space<vmem>>, vector<1x64xf32>
    %26 = vector.broadcast %25 : vector<1x64xf32> to vector<16x64xf32>
    %27 = arith.addf %24, %26 : vector<16x64xf32>
    %cst_10 = arith.constant dense<0.000000e+00> : vector<64xf32>
    %28 = vector.multi_reduction <add>, %27, %cst_10 [0] : vector<16x64xf32> to vector<64xf32>
    %29 = vector.shape_cast %28 : vector<64xf32> to vector<1x64xf32>
    %cst_11 = arith.constant 1.600000e+01 : f32
    %30 = vector.broadcast %cst_11 : f32 to vector<1x64xf32>
    %31 = arith.divf %29, %30 : vector<1x64xf32>
    %32 = vector.broadcast %31 : vector<1x64xf32> to vector<16x64xf32>
    %33 = arith.subf %27, %32 : vector<16x64xf32>
    %c0_12 = arith.constant 0 : index
    %c0_13 = arith.constant 0 : index
    %c0_14 = arith.constant 0 : index
    %34 = vector.load %arg4[%c0_12, %c0_13, %c0_14] : memref<1x16x64xf32, #tpu.memory_space<vmem>>, vector<1x16x64xf32>
    %35 = vector.shape_cast %34 : vector<1x16x64xf32> to vector<16x64xf32>
    %36 = vector.shape_cast %33 : vector<16x64xf32> to vector<1x16x64xf32>
    tpu.vector_store %arg4[%c0_12, %c0_13, %c0_14], %36 {strides = array<i32>} : memref<1x16x64xf32, #tpu.memory_space<vmem>>, vector<1x16x64xf32>,
    return
  }
  func.func @transform_0(%arg0: i32) -> (i32, i32, i32) {
    %c0_i32 = arith.constant 0 : i32
    %c0_i32_0 = arith.constant 0 : i32
    %c0_i32_1 = arith.constant 0 : i32
    return %arg0, %c0_i32, %c0_i32_0 : i32, i32, i32
  }
  func.func @transform_1(%arg0: i32) -> (i32, i32) {
    %c0_i32 = arith.constant 0 : i32
    %c0_i32_0 = arith.constant 0 : i32
    %c0_i32_1 = arith.constant 0 : i32
    return %c0_i32, %c0_i32_0 : i32, i32
  }
  func.func @transform_2(%arg0: i32) -> (i32, i32) {
    %c0_i32 = arith.constant 0 : i32
    %c0_i32_0 = arith.constant 0 : i32
    %c0_i32_1 = arith.constant 0 : i32
    return %c0_i32, %c0_i32_0 : i32, i32
  }
  func.func @transform_3(%arg0: i32) -> (i32, i32, i32) {
    %c0_i32 = arith.constant 0 : i32
    %c0_i32_0 = arith.constant 0 : i32
    %c0_i32_1 = arith.constant 0 : i32
    return %arg0, %c0_i32, %c0_i32_0 : i32, i32, i32
  }
}

module attributes {stable_mosaic.version = 11 : i64} {
  func.func @_dense_k1_bias_kernel(%arg0: i32, %arg1: i32, %arg2: memref<16x64xbf16, #tpu.memory_space<vmem>>, %arg3: memref<64x128xbf16, #tpu.memory_space<vmem>>, %arg4: memref<1x128xf32, #tpu.memory_space<vmem>>, %arg5: memref<16x128xf32, #tpu.memory_space<vmem>>) attributes {dimension_semantics = [#tpu.dimension_semantics<parallel>, #tpu.dimension_semantics<parallel>], iteration_bounds = array<i64: 2, 1>, scalar_prefetch = 0 : i64, scratch_operands = 0 : i64, tpu.core_type = #tpu.core_type<tc>, window_params = [{transform_indices = @transform_0, window_bounds = array<i64: 16, 64>}, {transform_indices = @transform_1, window_bounds = array<i64: 64, 128>}, {transform_indices = @transform_2, window_bounds = array<i64: 1, 128>}, {transform_indices = @transform_3, window_bounds = array<i64: 16, 128>}]} {
    %c0 = arith.constant 0 : index
    %c0_0 = arith.constant 0 : index
    %0 = vector.load %arg2[%c0, %c0_0] : memref<16x64xbf16, #tpu.memory_space<vmem>>, vector<16x64xbf16>
    %c0_1 = arith.constant 0 : index
    %c0_2 = arith.constant 0 : index
    %1 = vector.load %arg3[%c0_1, %c0_2] : memref<64x128xbf16, #tpu.memory_space<vmem>>, vector<64x128xbf16>
    %cst = arith.constant dense<0.000000e+00> : vector<16x128xf32>
    %2 = tpu.matmul %0, %1, %cst {dimension_numbers = #tpu.dot_dimension_numbers<[1], [0], [0], [1], [0, 0, 1, 1], [], []>} : vector<16x64xbf16>, vector<64x128xbf16>, vector<16x128xf32> -> vector<16x128xf32>
    %c0_3 = arith.constant 0 : index
    %c0_4 = arith.constant 0 : index
    %3 = vector.load %arg4[%c0_3, %c0_4] : memref<1x128xf32, #tpu.memory_space<vmem>>, vector<1x128xf32>
    %4 = vector.broadcast %3 : vector<1x128xf32> to vector<16x128xf32>
    %5 = arith.addf %2, %4 : vector<16x128xf32>
    %c0_5 = arith.constant 0 : index
    %c0_6 = arith.constant 0 : index
    %6 = vector.load %arg5[%c0_5, %c0_6] : memref<16x128xf32, #tpu.memory_space<vmem>>, vector<16x128xf32>
    tpu.vector_store %arg5[%c0_5, %c0_6], %5 {strides = array<i32>} : memref<16x128xf32, #tpu.memory_space<vmem>>, vector<16x128xf32>,
    return
  }
  func.func @transform_0(%arg0: i32, %arg1: i32) -> (i32, i32) {
    %c0_i32 = arith.constant 0 : i32
    %c0_i32_0 = arith.constant 0 : i32
    return %arg0, %c0_i32 : i32, i32
  }
  func.func @transform_1(%arg0: i32, %arg1: i32) -> (i32, i32) {
    %c0_i32 = arith.constant 0 : i32
    %c0_i32_0 = arith.constant 0 : i32
    return %c0_i32, %arg1 : i32, i32
  }
  func.func @transform_2(%arg0: i32, %arg1: i32) -> (i32, i32) {
    %c0_i32 = arith.constant 0 : i32
    %c0_i32_0 = arith.constant 0 : i32
    return %c0_i32, %arg1 : i32, i32
  }
  func.func @transform_3(%arg0: i32, %arg1: i32) -> (i32, i32) {
    %c0_i32 = arith.constant 0 : i32
    return %arg0, %arg1 : i32, i32
  }
}

module attributes {stable_mosaic.version = 11 : i64} {
  func.func @_proj_add_decomp_kernel(%arg0: i32, %arg1: memref<24x24xf32, #tpu.memory_space<vmem>>, %arg2: memref<1x24x64xbf16, #tpu.memory_space<vmem>>, %arg3: memref<64x64xbf16, #tpu.memory_space<vmem>>, %arg4: memref<1x64xf32, #tpu.memory_space<vmem>>, %arg5: memref<1x24x64xf32, #tpu.memory_space<vmem>>, %arg6: memref<1x24x64xf32, #tpu.memory_space<vmem>>, %arg7: memref<1x24x64xf32, #tpu.memory_space<vmem>>) attributes {dimension_semantics = [#tpu.dimension_semantics<parallel>], iteration_bounds = array<i64: 2>, scalar_prefetch = 0 : i64, scratch_operands = 0 : i64, tpu.core_type = #tpu.core_type<tc>, window_params = [{pipeline_mode = #tpu.pipeline_mode<synchronous>, transform_indices = @transform_0, window_bounds = array<i64: 24, 24>}, {transform_indices = @transform_1, window_bounds = array<i64: 1, 24, 64>}, {pipeline_mode = #tpu.pipeline_mode<synchronous>, transform_indices = @transform_2, window_bounds = array<i64: 64, 64>}, {pipeline_mode = #tpu.pipeline_mode<synchronous>, transform_indices = @transform_3, window_bounds = array<i64: 1, 64>}, {transform_indices = @transform_4, window_bounds = array<i64: 1, 24, 64>}, {transform_indices = @transform_5, window_bounds = array<i64: 1, 24, 64>}, {transform_indices = @transform_6, window_bounds = array<i64: 1, 24, 64>}]} {
    %c0 = arith.constant 0 : index
    %c0_0 = arith.constant 0 : index
    %c0_1 = arith.constant 0 : index
    %0 = vector.load %arg2[%c0, %c0_0, %c0_1] : memref<1x24x64xbf16, #tpu.memory_space<vmem>>, vector<1x24x64xbf16>
    %1 = vector.shape_cast %0 : vector<1x24x64xbf16> to vector<24x64xbf16>
    %c0_2 = arith.constant 0 : index
    %c0_3 = arith.constant 0 : index
    %2 = vector.load %arg3[%c0_2, %c0_3] : memref<64x64xbf16, #tpu.memory_space<vmem>>, vector<64x64xbf16>
    %cst = arith.constant dense<0.000000e+00> : vector<24x64xf32>
    %3 = tpu.matmul %1, %2, %cst {dimension_numbers = #tpu.dot_dimension_numbers<[1], [0], [0], [1], [0, 0, 1, 1], [], []>} : vector<24x64xbf16>, vector<64x64xbf16>, vector<24x64xf32> -> vector<24x64xf32>
    %c0_4 = arith.constant 0 : index
    %c0_5 = arith.constant 0 : index
    %4 = vector.load %arg4[%c0_4, %c0_5] : memref<1x64xf32, #tpu.memory_space<vmem>>, vector<1x64xf32>
    %5 = vector.broadcast %4 : vector<1x64xf32> to vector<24x64xf32>
    %6 = arith.addf %3, %5 : vector<24x64xf32>
    %c0_6 = arith.constant 0 : index
    %c0_7 = arith.constant 0 : index
    %c0_8 = arith.constant 0 : index
    %7 = vector.load %arg5[%c0_6, %c0_7, %c0_8] : memref<1x24x64xf32, #tpu.memory_space<vmem>>, vector<1x24x64xf32>
    %8 = vector.shape_cast %7 : vector<1x24x64xf32> to vector<24x64xf32>
    %9 = arith.addf %8, %6 : vector<24x64xf32>
    %c0_9 = arith.constant 0 : index
    %c0_10 = arith.constant 0 : index
    %10 = vector.load %arg1[%c0_9, %c0_10] : memref<24x24xf32, #tpu.memory_space<vmem>>, vector<24x24xf32>
    %cst_11 = arith.constant dense<0.000000e+00> : vector<24x64xf32>
    %11 = tpu.matmul %10, %9, %cst_11 {dimension_numbers = #tpu.dot_dimension_numbers<[1], [0], [0], [1], [0, 0, 1, 1], [], []>} : vector<24x24xf32>, vector<24x64xf32>, vector<24x64xf32> -> vector<24x64xf32>
    %c0_12 = arith.constant 0 : index
    %c0_13 = arith.constant 0 : index
    %c0_14 = arith.constant 0 : index
    %12 = vector.load %arg7[%c0_12, %c0_13, %c0_14] : memref<1x24x64xf32, #tpu.memory_space<vmem>>, vector<1x24x64xf32>
    %13 = vector.shape_cast %12 : vector<1x24x64xf32> to vector<24x64xf32>
    %14 = vector.shape_cast %11 : vector<24x64xf32> to vector<1x24x64xf32>
    tpu.vector_store %arg7[%c0_12, %c0_13, %c0_14], %14 {strides = array<i32>} : memref<1x24x64xf32, #tpu.memory_space<vmem>>, vector<1x24x64xf32>,
    %15 = arith.subf %9, %11 : vector<24x64xf32>
    %c0_15 = arith.constant 0 : index
    %c0_16 = arith.constant 0 : index
    %c0_17 = arith.constant 0 : index
    %16 = vector.load %arg6[%c0_15, %c0_16, %c0_17] : memref<1x24x64xf32, #tpu.memory_space<vmem>>, vector<1x24x64xf32>
    %17 = vector.shape_cast %16 : vector<1x24x64xf32> to vector<24x64xf32>
    %18 = vector.shape_cast %15 : vector<24x64xf32> to vector<1x24x64xf32>
    tpu.vector_store %arg6[%c0_15, %c0_16, %c0_17], %18 {strides = array<i32>} : memref<1x24x64xf32, #tpu.memory_space<vmem>>, vector<1x24x64xf32>,
    return
  }
  func.func @transform_0(%arg0: i32) -> (i32, i32) {
    %c0_i32 = arith.constant 0 : i32
    %c0_i32_0 = arith.constant 0 : i32
    %c0_i32_1 = arith.constant 0 : i32
    return %c0_i32, %c0_i32_0 : i32, i32
  }
  func.func @transform_1(%arg0: i32) -> (i32, i32, i32) {
    %c0_i32 = arith.constant 0 : i32
    %c0_i32_0 = arith.constant 0 : i32
    %c0_i32_1 = arith.constant 0 : i32
    return %arg0, %c0_i32, %c0_i32_0 : i32, i32, i32
  }
  func.func @transform_2(%arg0: i32) -> (i32, i32) {
    %c0_i32 = arith.constant 0 : i32
    %c0_i32_0 = arith.constant 0 : i32
    %c0_i32_1 = arith.constant 0 : i32
    return %c0_i32, %c0_i32_0 : i32, i32
  }
  func.func @transform_3(%arg0: i32) -> (i32, i32) {
    %c0_i32 = arith.constant 0 : i32
    %c0_i32_0 = arith.constant 0 : i32
    %c0_i32_1 = arith.constant 0 : i32
    return %c0_i32, %c0_i32_0 : i32, i32
  }
  func.func @transform_4(%arg0: i32) -> (i32, i32, i32) {
    %c0_i32 = arith.constant 0 : i32
    %c0_i32_0 = arith.constant 0 : i32
    %c0_i32_1 = arith.constant 0 : i32
    return %arg0, %c0_i32, %c0_i32_0 : i32, i32, i32
  }
  func.func @transform_5(%arg0: i32) -> (i32, i32, i32) {
    %c0_i32 = arith.constant 0 : i32
    %c0_i32_0 = arith.constant 0 : i32
    %c0_i32_1 = arith.constant 0 : i32
    return %arg0, %c0_i32, %c0_i32_0 : i32, i32, i32
  }
  func.func @transform_6(%arg0: i32) -> (i32, i32, i32) {
    %c0_i32 = arith.constant 0 : i32
    %c0_i32_0 = arith.constant 0 : i32
    %c0_i32_1 = arith.constant 0 : i32
    return %arg0, %c0_i32, %c0_i32_0 : i32, i32, i32
  }
}

module attributes {stable_mosaic.version = 11 : i64} {
  func.func @_ffn_add_decomp_kernel(%arg0: i32, %arg1: memref<24x24xf32, #tpu.memory_space<vmem>>, %arg2: memref<1x24x64xf32, #tpu.memory_space<vmem>>, %arg3: memref<64x32xbf16, #tpu.memory_space<vmem>>, %arg4: memref<32x64xbf16, #tpu.memory_space<vmem>>, %arg5: memref<1x24x64xf32, #tpu.memory_space<vmem>>, %arg6: memref<1x24x64xf32, #tpu.memory_space<vmem>>) attributes {dimension_semantics = [#tpu.dimension_semantics<parallel>], iteration_bounds = array<i64: 2>, scalar_prefetch = 0 : i64, scratch_operands = 0 : i64, tpu.core_type = #tpu.core_type<tc>, window_params = [{pipeline_mode = #tpu.pipeline_mode<synchronous>, transform_indices = @transform_0, window_bounds = array<i64: 24, 24>}, {transform_indices = @transform_1, window_bounds = array<i64: 1, 24, 64>}, {pipeline_mode = #tpu.pipeline_mode<synchronous>, transform_indices = @transform_2, window_bounds = array<i64: 64, 32>}, {pipeline_mode = #tpu.pipeline_mode<synchronous>, transform_indices = @transform_3, window_bounds = array<i64: 32, 64>}, {transform_indices = @transform_4, window_bounds = array<i64: 1, 24, 64>}, {transform_indices = @transform_5, window_bounds = array<i64: 1, 24, 64>}]} {
    %c0 = arith.constant 0 : index
    %c0_0 = arith.constant 0 : index
    %c0_1 = arith.constant 0 : index
    %0 = vector.load %arg2[%c0, %c0_0, %c0_1] : memref<1x24x64xf32, #tpu.memory_space<vmem>>, vector<1x24x64xf32>
    %1 = vector.shape_cast %0 : vector<1x24x64xf32> to vector<24x64xf32>
    %2 = arith.truncf %1 : vector<24x64xf32> to vector<24x64xbf16>
    %c0_2 = arith.constant 0 : index
    %c0_3 = arith.constant 0 : index
    %3 = vector.load %arg3[%c0_2, %c0_3] : memref<64x32xbf16, #tpu.memory_space<vmem>>, vector<64x32xbf16>
    %cst = arith.constant dense<0.000000e+00> : vector<24x32xf32>
    %4 = tpu.matmul %2, %3, %cst {dimension_numbers = #tpu.dot_dimension_numbers<[1], [0], [0], [1], [0, 0, 1, 1], [], []>} : vector<24x64xbf16>, vector<64x32xbf16>, vector<24x32xf32> -> vector<24x32xf32>
    %cst_4 = arith.constant 5.000000e-01 : f32
    %5 = vector.broadcast %cst_4 : f32 to vector<24x32xf32>
    %6 = arith.mulf %5, %4 : vector<24x32xf32>
    %cst_5 = arith.constant 4.471500e-02 : f32
    %7 = vector.broadcast %cst_5 : f32 to vector<24x32xf32>
    %8 = arith.mulf %7, %4 : vector<24x32xf32>
    %9 = arith.mulf %8, %4 : vector<24x32xf32>
    %10 = arith.mulf %9, %4 : vector<24x32xf32>
    %11 = arith.addf %4, %10 : vector<24x32xf32>
    %cst_6 = arith.constant 0.797884583 : f32
    %12 = vector.broadcast %cst_6 : f32 to vector<24x32xf32>
    %13 = arith.mulf %12, %11 : vector<24x32xf32>
    %14 = math.tanh %13 : vector<24x32xf32>
    %cst_7 = arith.constant 1.000000e+00 : f32
    %15 = vector.broadcast %cst_7 : f32 to vector<24x32xf32>
    %16 = arith.addf %15, %14 : vector<24x32xf32>
    %17 = arith.mulf %6, %16 : vector<24x32xf32>
    %18 = arith.truncf %17 : vector<24x32xf32> to vector<24x32xbf16>
    %c0_8 = arith.constant 0 : index
    %c0_9 = arith.constant 0 : index
    %19 = vector.load %arg4[%c0_8, %c0_9] : memref<32x64xbf16, #tpu.memory_space<vmem>>, vector<32x64xbf16>
    %cst_10 = arith.constant dense<0.000000e+00> : vector<24x64xf32>
    %20 = tpu.matmul %18, %19, %cst_10 {dimension_numbers = #tpu.dot_dimension_numbers<[1], [0], [0], [1], [0, 0, 1, 1], [], []>} : vector<24x32xbf16>, vector<32x64xbf16>, vector<24x64xf32> -> vector<24x64xf32>
    %21 = arith.addf %1, %20 : vector<24x64xf32>
    %c0_11 = arith.constant 0 : index
    %c0_12 = arith.constant 0 : index
    %22 = vector.load %arg1[%c0_11, %c0_12] : memref<24x24xf32, #tpu.memory_space<vmem>>, vector<24x24xf32>
    %cst_13 = arith.constant dense<0.000000e+00> : vector<24x64xf32>
    %23 = tpu.matmul %22, %21, %cst_13 {dimension_numbers = #tpu.dot_dimension_numbers<[1], [0], [0], [1], [0, 0, 1, 1], [], []>} : vector<24x24xf32>, vector<24x64xf32>, vector<24x64xf32> -> vector<24x64xf32>
    %c0_14 = arith.constant 0 : index
    %c0_15 = arith.constant 0 : index
    %c0_16 = arith.constant 0 : index
    %24 = vector.load %arg6[%c0_14, %c0_15, %c0_16] : memref<1x24x64xf32, #tpu.memory_space<vmem>>, vector<1x24x64xf32>
    %25 = vector.shape_cast %24 : vector<1x24x64xf32> to vector<24x64xf32>
    %26 = vector.shape_cast %23 : vector<24x64xf32> to vector<1x24x64xf32>
    tpu.vector_store %arg6[%c0_14, %c0_15, %c0_16], %26 {strides = array<i32>} : memref<1x24x64xf32, #tpu.memory_space<vmem>>, vector<1x24x64xf32>,
    %27 = arith.subf %21, %23 : vector<24x64xf32>
    %c0_17 = arith.constant 0 : index
    %c0_18 = arith.constant 0 : index
    %c0_19 = arith.constant 0 : index
    %28 = vector.load %arg5[%c0_17, %c0_18, %c0_19] : memref<1x24x64xf32, #tpu.memory_space<vmem>>, vector<1x24x64xf32>
    %29 = vector.shape_cast %28 : vector<1x24x64xf32> to vector<24x64xf32>
    %30 = vector.shape_cast %27 : vector<24x64xf32> to vector<1x24x64xf32>
    tpu.vector_store %arg5[%c0_17, %c0_18, %c0_19], %30 {strides = array<i32>} : memref<1x24x64xf32, #tpu.memory_space<vmem>>, vector<1x24x64xf32>,
    return
  }
  func.func @transform_0(%arg0: i32) -> (i32, i32) {
    %c0_i32 = arith.constant 0 : i32
    %c0_i32_0 = arith.constant 0 : i32
    %c0_i32_1 = arith.constant 0 : i32
    return %c0_i32, %c0_i32_0 : i32, i32
  }
  func.func @transform_1(%arg0: i32) -> (i32, i32, i32) {
    %c0_i32 = arith.constant 0 : i32
    %c0_i32_0 = arith.constant 0 : i32
    %c0_i32_1 = arith.constant 0 : i32
    return %arg0, %c0_i32, %c0_i32_0 : i32, i32, i32
  }
  func.func @transform_2(%arg0: i32) -> (i32, i32) {
    %c0_i32 = arith.constant 0 : i32
    %c0_i32_0 = arith.constant 0 : i32
    %c0_i32_1 = arith.constant 0 : i32
    return %c0_i32, %c0_i32_0 : i32, i32
  }
  func.func @transform_3(%arg0: i32) -> (i32, i32) {
    %c0_i32 = arith.constant 0 : i32
    %c0_i32_0 = arith.constant 0 : i32
    %c0_i32_1 = arith.constant 0 : i32
    return %c0_i32, %c0_i32_0 : i32, i32
  }
  func.func @transform_4(%arg0: i32) -> (i32, i32, i32) {
    %c0_i32 = arith.constant 0 : i32
    %c0_i32_0 = arith.constant 0 : i32
    %c0_i32_1 = arith.constant 0 : i32
    return %arg0, %c0_i32, %c0_i32_0 : i32, i32, i32
  }
  func.func @transform_5(%arg0: i32) -> (i32, i32, i32) {
    %c0_i32 = arith.constant 0 : i32
    %c0_i32_0 = arith.constant 0 : i32
    %c0_i32_1 = arith.constant 0 : i32
    return %arg0, %c0_i32, %c0_i32_0 : i32, i32, i32
  }
}

module attributes {stable_mosaic.version = 11 : i64} {
  func.func @_trend_proj_kernel(%arg0: i32, %arg1: memref<1x24x64xf32, #tpu.memory_space<vmem>>, %arg2: memref<1x24x64xf32, #tpu.memory_space<vmem>>, %arg3: memref<1x24x64xf32, #tpu.memory_space<vmem>>, %arg4: memref<1x64xf32, #tpu.memory_space<vmem>>, %arg5: memref<1x64xf32, #tpu.memory_space<vmem>>, %arg6: memref<1x64xf32, #tpu.memory_space<vmem>>, %arg7: memref<1x24x1xf32, #tpu.memory_space<vmem>>) attributes {dimension_semantics = [#tpu.dimension_semantics<parallel>], iteration_bounds = array<i64: 2>, scalar_prefetch = 0 : i64, scratch_operands = 0 : i64, tpu.core_type = #tpu.core_type<tc>, window_params = [{transform_indices = @transform_0, window_bounds = array<i64: 1, 24, 64>}, {transform_indices = @transform_1, window_bounds = array<i64: 1, 24, 64>}, {transform_indices = @transform_2, window_bounds = array<i64: 1, 24, 64>}, {pipeline_mode = #tpu.pipeline_mode<synchronous>, transform_indices = @transform_3, window_bounds = array<i64: 1, 64>}, {pipeline_mode = #tpu.pipeline_mode<synchronous>, transform_indices = @transform_4, window_bounds = array<i64: 1, 64>}, {pipeline_mode = #tpu.pipeline_mode<synchronous>, transform_indices = @transform_5, window_bounds = array<i64: 1, 64>}, {transform_indices = @transform_6, window_bounds = array<i64: 1, 24, 1>}]} {
    %c0 = arith.constant 0 : index
    %c0_0 = arith.constant 0 : index
    %c0_1 = arith.constant 0 : index
    %0 = vector.load %arg1[%c0, %c0_0, %c0_1] : memref<1x24x64xf32, #tpu.memory_space<vmem>>, vector<1x24x64xf32>
    %1 = vector.shape_cast %0 : vector<1x24x64xf32> to vector<24x64xf32>
    %c0_2 = arith.constant 0 : index
    %c0_3 = arith.constant 0 : index
    %2 = vector.load %arg4[%c0_2, %c0_3] : memref<1x64xf32, #tpu.memory_space<vmem>>, vector<1x64xf32>
    %3 = vector.broadcast %2 : vector<1x64xf32> to vector<24x64xf32>
    %4 = arith.mulf %1, %3 : vector<24x64xf32>
    %c0_4 = arith.constant 0 : index
    %c0_5 = arith.constant 0 : index
    %c0_6 = arith.constant 0 : index
    %5 = vector.load %arg2[%c0_4, %c0_5, %c0_6] : memref<1x24x64xf32, #tpu.memory_space<vmem>>, vector<1x24x64xf32>
    %6 = vector.shape_cast %5 : vector<1x24x64xf32> to vector<24x64xf32>
    %c0_7 = arith.constant 0 : index
    %c0_8 = arith.constant 0 : index
    %7 = vector.load %arg5[%c0_7, %c0_8] : memref<1x64xf32, #tpu.memory_space<vmem>>, vector<1x64xf32>
    %8 = vector.broadcast %7 : vector<1x64xf32> to vector<24x64xf32>
    %9 = arith.mulf %6, %8 : vector<24x64xf32>
    %10 = arith.addf %4, %9 : vector<24x64xf32>
    %c0_9 = arith.constant 0 : index
    %c0_10 = arith.constant 0 : index
    %c0_11 = arith.constant 0 : index
    %11 = vector.load %arg3[%c0_9, %c0_10, %c0_11] : memref<1x24x64xf32, #tpu.memory_space<vmem>>, vector<1x24x64xf32>
    %12 = vector.shape_cast %11 : vector<1x24x64xf32> to vector<24x64xf32>
    %c0_12 = arith.constant 0 : index
    %c0_13 = arith.constant 0 : index
    %13 = vector.load %arg6[%c0_12, %c0_13] : memref<1x64xf32, #tpu.memory_space<vmem>>, vector<1x64xf32>
    %14 = vector.broadcast %13 : vector<1x64xf32> to vector<24x64xf32>
    %15 = arith.mulf %12, %14 : vector<24x64xf32>
    %16 = arith.addf %10, %15 : vector<24x64xf32>
    %cst = arith.constant dense<0.000000e+00> : vector<24xf32>
    %17 = vector.multi_reduction <add>, %16, %cst [1] : vector<24x64xf32> to vector<24xf32>
    %18 = vector.shape_cast %17 : vector<24xf32> to vector<24x1xf32>
    %c0_14 = arith.constant 0 : index
    %c0_15 = arith.constant 0 : index
    %c0_16 = arith.constant 0 : index
    %19 = vector.load %arg7[%c0_14, %c0_15, %c0_16] : memref<1x24x1xf32, #tpu.memory_space<vmem>>, vector<1x24x1xf32>
    %20 = vector.shape_cast %19 : vector<1x24x1xf32> to vector<24x1xf32>
    %21 = vector.shape_cast %18 : vector<24x1xf32> to vector<1x24x1xf32>
    tpu.vector_store %arg7[%c0_14, %c0_15, %c0_16], %21 {strides = array<i32>} : memref<1x24x1xf32, #tpu.memory_space<vmem>>, vector<1x24x1xf32>,
    return
  }
  func.func @transform_0(%arg0: i32) -> (i32, i32, i32) {
    %c0_i32 = arith.constant 0 : i32
    %c0_i32_0 = arith.constant 0 : i32
    %c0_i32_1 = arith.constant 0 : i32
    return %arg0, %c0_i32, %c0_i32_0 : i32, i32, i32
  }
  func.func @transform_1(%arg0: i32) -> (i32, i32, i32) {
    %c0_i32 = arith.constant 0 : i32
    %c0_i32_0 = arith.constant 0 : i32
    %c0_i32_1 = arith.constant 0 : i32
    return %arg0, %c0_i32, %c0_i32_0 : i32, i32, i32
  }
  func.func @transform_2(%arg0: i32) -> (i32, i32, i32) {
    %c0_i32 = arith.constant 0 : i32
    %c0_i32_0 = arith.constant 0 : i32
    %c0_i32_1 = arith.constant 0 : i32
    return %arg0, %c0_i32, %c0_i32_0 : i32, i32, i32
  }
  func.func @transform_3(%arg0: i32) -> (i32, i32) {
    %c0_i32 = arith.constant 0 : i32
    %c0_i32_0 = arith.constant 0 : i32
    %c0_i32_1 = arith.constant 0 : i32
    return %c0_i32, %c0_i32_0 : i32, i32
  }
  func.func @transform_4(%arg0: i32) -> (i32, i32) {
    %c0_i32 = arith.constant 0 : i32
    %c0_i32_0 = arith.constant 0 : i32
    %c0_i32_1 = arith.constant 0 : i32
    return %c0_i32, %c0_i32_0 : i32, i32
  }
  func.func @transform_5(%arg0: i32) -> (i32, i32) {
    %c0_i32 = arith.constant 0 : i32
    %c0_i32_0 = arith.constant 0 : i32
    %c0_i32_1 = arith.constant 0 : i32
    return %c0_i32, %c0_i32_0 : i32, i32
  }
  func.func @transform_6(%arg0: i32) -> (i32, i32, i32) {
    %c0_i32 = arith.constant 0 : i32
    %c0_i32_0 = arith.constant 0 : i32
    %c0_i32_1 = arith.constant 0 : i32
    return %arg0, %c0_i32, %c0_i32_0 : i32, i32, i32
  }
}

module attributes {stable_mosaic.version = 11 : i64} {
  func.func @_my_layernorm_proj_kernel(%arg0: i32, %arg1: memref<1x24x64xf32, #tpu.memory_space<vmem>>, %arg2: memref<1x64xf32, #tpu.memory_space<vmem>>, %arg3: memref<1x64xf32, #tpu.memory_space<vmem>>, %arg4: memref<1x64xf32, #tpu.memory_space<vmem>>, %arg5: memref<1x1xf32, #tpu.memory_space<vmem>>, %arg6: memref<1x24x1xf32, #tpu.memory_space<vmem>>) attributes {dimension_semantics = [#tpu.dimension_semantics<parallel>], iteration_bounds = array<i64: 2>, scalar_prefetch = 0 : i64, scratch_operands = 0 : i64, tpu.core_type = #tpu.core_type<tc>, window_params = [{transform_indices = @transform_0, window_bounds = array<i64: 1, 24, 64>}, {pipeline_mode = #tpu.pipeline_mode<synchronous>, transform_indices = @transform_1, window_bounds = array<i64: 1, 64>}, {pipeline_mode = #tpu.pipeline_mode<synchronous>, transform_indices = @transform_2, window_bounds = array<i64: 1, 64>}, {pipeline_mode = #tpu.pipeline_mode<synchronous>, transform_indices = @transform_3, window_bounds = array<i64: 1, 64>}, {pipeline_mode = #tpu.pipeline_mode<synchronous>, transform_indices = @transform_4, window_bounds = array<i64: 1, 1>}, {transform_indices = @transform_5, window_bounds = array<i64: 1, 24, 1>}]} {
    %c0 = arith.constant 0 : index
    %c0_0 = arith.constant 0 : index
    %c0_1 = arith.constant 0 : index
    %0 = vector.load %arg1[%c0, %c0_0, %c0_1] : memref<1x24x64xf32, #tpu.memory_space<vmem>>, vector<1x24x64xf32>
    %1 = vector.shape_cast %0 : vector<1x24x64xf32> to vector<24x64xf32>
    %cst = arith.constant dense<0.000000e+00> : vector<24xf32>
    %2 = vector.multi_reduction <add>, %1, %cst [1] : vector<24x64xf32> to vector<24xf32>
    %3 = vector.shape_cast %2 : vector<24xf32> to vector<24x1xf32>
    %cst_2 = arith.constant 6.400000e+01 : f32
    %4 = vector.broadcast %cst_2 : f32 to vector<24x1xf32>
    %5 = arith.divf %3, %4 : vector<24x1xf32>
    %6 = vector.broadcast %5 : vector<24x1xf32> to vector<24x64xf32>
    %7 = arith.subf %1, %6 : vector<24x64xf32>
    %8 = vector.broadcast %5 : vector<24x1xf32> to vector<24x64xf32>
    %9 = arith.subf %1, %8 : vector<24x64xf32>
    %10 = arith.mulf %7, %9 : vector<24x64xf32>
    %cst_3 = arith.constant dense<0.000000e+00> : vector<24xf32>
    %11 = vector.multi_reduction <add>, %10, %cst_3 [1] : vector<24x64xf32> to vector<24xf32>
    %12 = vector.shape_cast %11 : vector<24xf32> to vector<24x1xf32>
    %cst_4 = arith.constant 6.400000e+01 : f32
    %13 = vector.broadcast %cst_4 : f32 to vector<24x1xf32>
    %14 = arith.divf %12, %13 : vector<24x1xf32>
    %15 = vector.broadcast %5 : vector<24x1xf32> to vector<24x64xf32>
    %16 = arith.subf %1, %15 : vector<24x64xf32>
    %cst_5 = arith.constant 9.99999974E-6 : f32
    %17 = vector.broadcast %cst_5 : f32 to vector<24x1xf32>
    %18 = arith.addf %14, %17 : vector<24x1xf32>
    %19 = math.rsqrt %18 : vector<24x1xf32>
    %20 = vector.broadcast %19 : vector<24x1xf32> to vector<24x64xf32>
    %21 = arith.mulf %16, %20 : vector<24x64xf32>
    %c0_6 = arith.constant 0 : index
    %c0_7 = arith.constant 0 : index
    %22 = vector.load %arg2[%c0_6, %c0_7] : memref<1x64xf32, #tpu.memory_space<vmem>>, vector<1x64xf32>
    %23 = vector.broadcast %22 : vector<1x64xf32> to vector<24x64xf32>
    %24 = arith.mulf %21, %23 : vector<24x64xf32>
    %c0_8 = arith.constant 0 : index
    %c0_9 = arith.constant 0 : index
    %25 = vector.load %arg3[%c0_8, %c0_9] : memref<1x64xf32, #tpu.memory_space<vmem>>, vector<1x64xf32>
    %26 = vector.broadcast %25 : vector<1x64xf32> to vector<24x64xf32>
    %27 = arith.addf %24, %26 : vector<24x64xf32>
    %cst_10 = arith.constant dense<0.000000e+00> : vector<64xf32>
    %28 = vector.multi_reduction <add>, %27, %cst_10 [0] : vector<24x64xf32> to vector<64xf32>
    %29 = vector.shape_cast %28 : vector<64xf32> to vector<1x64xf32>
    %cst_11 = arith.constant 2.400000e+01 : f32
    %30 = vector.broadcast %cst_11 : f32 to vector<1x64xf32>
    %31 = arith.divf %29, %30 : vector<1x64xf32>
    %32 = vector.broadcast %31 : vector<1x64xf32> to vector<24x64xf32>
    %33 = arith.subf %27, %32 : vector<24x64xf32>
    %c0_12 = arith.constant 0 : index
    %c0_13 = arith.constant 0 : index
    %34 = vector.load %arg4[%c0_12, %c0_13] : memref<1x64xf32, #tpu.memory_space<vmem>>, vector<1x64xf32>
    %35 = vector.broadcast %34 : vector<1x64xf32> to vector<24x64xf32>
    %36 = arith.mulf %33, %35 : vector<24x64xf32>
    %cst_14 = arith.constant dense<0.000000e+00> : vector<24xf32>
    %37 = vector.multi_reduction <add>, %36, %cst_14 [1] : vector<24x64xf32> to vector<24xf32>
    %38 = vector.shape_cast %37 : vector<24xf32> to vector<24x1xf32>
    %c0_15 = arith.constant 0 : index
    %c0_16 = arith.constant 0 : index
    %39 = vector.load %arg5[%c0_15, %c0_16] : memref<1x1xf32, #tpu.memory_space<vmem>>, vector<1x1xf32>
    %40 = vector.broadcast %39 : vector<1x1xf32> to vector<24x1xf32>
    %41 = arith.addf %38, %40 : vector<24x1xf32>
    %c0_17 = arith.constant 0 : index
    %c0_18 = arith.constant 0 : index
    %c0_19 = arith.constant 0 : index
    %42 = vector.load %arg6[%c0_17, %c0_18, %c0_19] : memref<1x24x1xf32, #tpu.memory_space<vmem>>, vector<1x24x1xf32>
    %43 = vector.shape_cast %42 : vector<1x24x1xf32> to vector<24x1xf32>
    %44 = vector.shape_cast %41 : vector<24x1xf32> to vector<1x24x1xf32>
    tpu.vector_store %arg6[%c0_17, %c0_18, %c0_19], %44 {strides = array<i32>} : memref<1x24x1xf32, #tpu.memory_space<vmem>>, vector<1x24x1xf32>,
    return
  }
  func.func @transform_0(%arg0: i32) -> (i32, i32, i32) {
    %c0_i32 = arith.constant 0 : i32
    %c0_i32_0 = arith.constant 0 : i32
    %c0_i32_1 = arith.constant 0 : i32
    return %arg0, %c0_i32, %c0_i32_0 : i32, i32, i32
  }
  func.func @transform_1(%arg0: i32) -> (i32, i32) {
    %c0_i32 = arith.constant 0 : i32
    %c0_i32_0 = arith.constant 0 : i32
    %c0_i32_1 = arith.constant 0 : i32
    return %c0_i32, %c0_i32_0 : i32, i32
  }
  func.func @transform_2(%arg0: i32) -> (i32, i32) {
    %c0_i32 = arith.constant 0 : i32
    %c0_i32_0 = arith.constant 0 : i32
    %c0_i32_1 = arith.constant 0 : i32
    return %c0_i32, %c0_i32_0 : i32, i32
  }
  func.func @transform_3(%arg0: i32) -> (i32, i32) {
    %c0_i32 = arith.constant 0 : i32
    %c0_i32_0 = arith.constant 0 : i32
    %c0_i32_1 = arith.constant 0 : i32
    return %c0_i32, %c0_i32_0 : i32, i32
  }
  func.func @transform_4(%arg0: i32) -> (i32, i32) {
    %c0_i32 = arith.constant 0 : i32
    %c0_i32_0 = arith.constant 0 : i32
    %c0_i32_1 = arith.constant 0 : i32
    return %c0_i32, %c0_i32_0 : i32, i32
  }
  func.func @transform_5(%arg0: i32) -> (i32, i32, i32) {
    %c0_i32 = arith.constant 0 : i32
    %c0_i32_0 = arith.constant 0 : i32
    %c0_i32_1 = arith.constant 0 : i32
    return %arg0, %c0_i32, %c0_i32_0 : i32, i32, i32
  }
}

</mosaic_0001>

<bundles_post_ra>
// kernel: autoformer_forward.15
= control target key start
LH: loop header
LB: loop body
LE: loop exit
PB: predicated region body
PF: predicated region fallthrough
CT: control target
= control target key end

     0   :  { %9 = vsyncpa [#allocation3], 0  ;;  %s772_s0 = inlined_call_operand.hbm [shape: f32[16,16], index: 0, kind: input, shape index: {}]   ;;  %s773_s1 = inlined_call_operand.vmem [shape: f32[2,16,1], index: 1, kind: input, shape index: {}]   ;;  %s774_s2 = inlined_call_operand.vmem [shape: f32[2,16,1], index: 2, kind: output, shape index: {0}]   ;;  %s775_s3 = inlined_call_operand.hbm [shape: f32[2,16,1], index: 3, kind: output, shape index: {1}]  }
   0x1   :  { %10 = vsyncpa [#allocation4], 0 }
   0x2   :  { %12 = vsyncpa [#allocation4 + $0x1], 0  ;;  %s623_s12 = smov 0   ;;  %s625_s13 = smov 0  }
   0x3   :  { %s627_s14 = smov 0   ;;  %s629_s15 = smov 0  }
   0x4 LB: > { %s644_s16 = sadd.s32 4294967295, %s595_s15   ;;  %s411_s17 = sadd.s32 4294967294, %s595_s15   ;;  %s595_s15 = sphi %s629_s15, %s791_s15   ;;  %s591_s14 = sphi %s627_s14, %s790_s14   ;;  %s587_s13 = sphi %s625_s13, %s789_s13   ;;  %s583_s12 = sphi %s623_s12, %s788_s12  }
   0x5   : > { %s648_s18 = sadd.s32 1, %s595_s15   ;;  %s98_s19 = sadd.s32 1, %s591_s14 }
   0x6   : > { %s95_s20 = ssub.s32 %s595_s15, %s648_s18  ;;  %p108_p0 = scmp.ne.s32.totalorder %s591_s14, %s587_s13 }
   0x7   : > { %p96_p1 = scmp.eq.s32.totalorder %s95_s20, 0  ;;  %p109_p2 = scmp.eq.s32.totalorder %s644_s16, 1 }
   0x8   : > { %p114_p3 = scmp.ne.s32.totalorder %s587_s13, %s583_s12  ;;  %p115_p4 = scmp.eq.s32.totalorder %s411_s17, 1 }
   0x9   : > { %s659_s21 = scalar_select %p96_p1, %s591_s14, %s98_s19  }
   0xa   : > { %p661_p5 = por %p109_p2, %p108_p0  ;;  %p665_p6 = por %p115_p4, %p114_p3 }
   0xb   : > { %p412_p7 = scmp.ge.s32.totalorder %s595_s15, 1  ;;  %p122_p8 = scmp.lt.s32.totalorder %s595_s15, 3 }
   0xc   : > { %s779_s22 = scalar_select %p661_p5, 1, 0 }
   0xd   : > { %s780_s23 = scalar_select %p665_p6, 1, 0 }
   0xe   : > { %p776_p9 = scmp.eq.s32.totalorder %s644_s16, 0  ;;  %p672_p10 = pnand %p412_p7, %p122_p8 }
   0xf   : > { %s597_s25 = smov [#allocation2]   ;;  %s501_s30 = scalar_lea.hbm %s772_s0, 256 }
  0x10   : > { %s781_s24 = scalar_select %p672_p10, 1, 0 }
  0x11   : > { %s134_s26 = sshll.u32 %s597_s25, 4  ;;  %p453_p11 = pneg %p672_p10  ;;  %s135_s26 = int_to_ptr.vmem [resolvable:$true] %s134_s26 }
  0x12   : > { %p502_p13 = scmp.ne.s32.totalorder %s772_s0, %s501_s30  ;;  %p508_p3 = scmp.lt.u32.totalorder %s501_s30, %s772_s0 }
  0x13   : > { %p680_p12 = pnand %p776_p9, %p453_p11 }
  0x15   : > { %p503_p0 = pneg %p680_p12 }
  0x17   : > { %p504_p1 = pnand %p503_p0, %p502_p13 }
  0x19   : > { %p505_p2 = pneg %p504_p1 }
  0x1b   : > { %p510_p4 = pnand %p508_p3, %p505_p2 }
  0x1d   : > { %513 = shalt.err (!%p510_p4)
}
  0x1e   : > { %s514_s8 = scalar_lea.vmem %s135_s26, 256  ;;  %p522_p9 = scmp.lt.s32.totalorder %s135_s26, %s135_s26 }
  0x1f   : > { %p515_p7 = scmp.ne.s32.totalorder %s135_s26, %s514_s8  ;;  %p523_p6 = scmp.lt.s32.totalorder %s514_s8, %s514_s8 }
  0x21   : > { %p517_p8 = pnand %p515_p7, %p503_p0  ;;  %p524_p5 = por %p523_p6, %p522_p9 }
  0x23   : > { %p518_p11 = pneg %p517_p8 }
  0x25   : > { %p525_p10 = pnand %p524_p5, %p518_p11 }
  0x27   : > { %528 = shalt.err (!%p525_p10)
}
  0x28   : > { %s598_s9 = smov 128   ;;  %s599_s10 = smov 8  }
  0x29   : > { %456 = dma.hbm_to_vmem [thread:$0]  (!%p680_p12), %s772_s0, 256, %s135_s26, [#allocation3], %s598_s9, %s598_s9, %s599_s10  }
  0x2a   : > { %p783_p13 = scmp.ne.s32.totalorder %s781_s24, 0 }
  0x2b   : > { %p784_p1 = scmp.eq.s32.totalorder (!%p783_p13), %s644_s16, 0 }
  0x2c   : > { %158 = sbr.rel (%p783_p13) target bundleno = 294 (0x126), region = 28 }
  0x33   : > { %574 = dma.done.wait (%p784_p1), [#allocation3], 256   ;;  %p785_p0 = pmov %p784_p1 }
  0x34   : > { %p187_p5 = scmp.lt.s32.totalorder %s644_s16, 1  ;;  %vm201_vm0 = vcmask 130048   ;;  %v199_v2 = vld [vmem:[#allocation2] sm:$0xff]  ;;  %v200_v4 = vld [vmem:[#allocation2 + $0x8] sm:$0xff]  ;;  %s184_s24 = sand.u32 1, %s587_s13   ;;  %vm283_vm1 = vcmask 7168  }
  0x35   : > { %576 = vsyncadd (%p785_p0), [#allocation3], 4294967040  ;;  %440 = vmatprep.mubr.msk.f32.mxu0 %vm201_vm0, %v199_v2  ;;  %s417_s28 = sshll.u32 %s184_s24, 4  ;;  %s431_s4 = sshll.u32 %s644_s16, 8 }
  0x36   : > { %s188_s19 = scalar_select %p187_p5, %s644_s16, 1 }
  0x37   : > { %s186_s29 = scalar_lea.vmem [#allocation5], %s417_s28  ;;  %s723_s10 = scalar_lea.hbm %s775_s3, %s431_s4 }
  0x38   : > { %s429_s20 = sshll.u32 %s188_s19, 4  ;;  %s312_s30 = sshll.u32 %s186_s29, 4  ;;  %s718_s30 = int_to_ptr.vmem [resolvable:$true] %s312_s30 }
  0x39   : > { %s191_s26 = scalar_lea.vmem %s773_s1, %s429_s20  ;;  %s716_s7 = scalar_lea.vmem %s774_s2, %s429_s20 }
  0x3a   : > { %v197_v0 = vld [vmem:[%s191_s26] sm:$0xff]  ;;  %v198_v1 = vld [vmem:[%s191_s26 + $0x8] sm:$0xff]  ;;  %s729_s16 = scalar_lea.sflag [#allocation4], %s184_s24  ;;  %s529_s11 = scalar_lea.vmem %s718_s30, 256 }
  0x3b   : > { %v443_v3 = vpack.c.bf16 %v198_v1, %v197_v0  ;;  %p530_p6 = scmp.ne.s32.totalorder %s718_s30, %s529_s11  ;;  %p786_p9 = scmp.ne.s32.totalorder %s779_s22, 0 }
  0x3c   : > { %s600_s17 = smov [#allocation5]  }
  0x3d   : > { %444 = vmatprep.subr.bf16.mxu0 %v443_v3  ;;  %p531_p10 = pnand %p530_p6, %p786_p9  ;;  %s533_s19 = sshll.u32 %s600_s17, 4  ;;  %s534_s19 = int_to_ptr.vmem [resolvable:$false] %s533_s19 }
  0x3e   : > { %446 = vmatpush3.bf16.msra.mxu0 %v443_v3  ;;  %s535_s20 = scalar_lea.vmem %s534_s19, 512  ;;  %p536_p2 = scmp.lt.s32.totalorder %s718_s30, %s534_s19 }
  0x3f   : > { %p532_p12 = pneg %p531_p10  ;;  %p537_p3 = scmp.lt.s32.totalorder %s535_s20, %s529_s11 }
  0x41   : > { %441 = vmatmul.mubr.msk.f32.vlgmr.msra.gmra.mrb[0].mxu0 %vm201_vm0, %v200_v4  ;;  %p538_p4 = por %p537_p3, %p536_p2 }
  0x43   : > { %p539_p7 = pnand %p538_p4, %p532_p12 }
 0x114   : > { %v442_v5 = vpop.f32.mrb[0].mxu0 }
 0x115   : > { %285 = vst.msk [vmem:[%s186_s29 + $0x8] sm:$0xff] %vm283_vm1, %v442_v5  ;;  %v287_v6 = vsub.f32 %v198_v1, %v442_v5  ;;  %v274_v7 = vpop.f32.mrb[1].mxu0 }
 0x116   : > { %284 = vst.msk [vmem:[%s186_s29] sm:$0xff] %vm283_vm1, %v274_v7  ;;  %v286_v8 = vsub.f32 %v197_v0, %v274_v7 }
 0x117   : > { %289 = vst.msk [vmem:[%s716_s7 + $0x8] sm:$0xff] %vm283_vm1, %v287_v6 }
 0x118   : > { %542 = shalt.err (!%p539_p7)
}
 0x119   : > { %s543_s25 = scalar_lea.hbm %s723_s10, 256  ;;  %s547_s24 = scalar_lea.hbm %s775_s3, 512 }
 0x11a   : > { %p544_p8 = scmp.ne.s32.totalorder %s723_s10, %s543_s25  ;;  %p548_p1 = scmp.lt.u32.totalorder %s723_s10, %s775_s3 }
 0x11b   : > { %p549_p0 = scmp.lt.u32.totalorder %s547_s24, %s543_s25  ;;  %p551_p6 = scmp.lt.u32.totalorder %s543_s25, %s723_s10 }
 0x11c   : > { %p545_p11 = pnand %p544_p8, %p786_p9 }
 0x11d   : > { %p550_p5 = por %p549_p0, %p548_p1 }
 0x11e   : > { %p546_p13 = pneg %p545_p11 }
 0x11f   : > { %p552_p10 = por %p551_p6, %p550_p5 }
 0x121   : > { %p553_p12 = pnand %p552_p10, %p546_p13 }
 0x123   : > { %556 = shalt.err (!%p553_p12)
}
 0x124   : > { %s601_s4 = smov 128   ;;  %s602_s5 = smov 8   ;;  %288 = vst.msk [vmem:[%s716_s7] sm:$0xff] %vm283_vm1, %v286_v8 }
 0x125   : > { %451 = dma.vmem_to_hbm [thread:$0]  (%p786_p9), %s718_s30, 256, %s723_s10, %s729_s16, %s601_s4, %s601_s4, %s602_s5  }
 0x126 PF: > { %p463_p2 = scmp.ge.s32.totalorder %s595_s15, 2  ;;  %s335_s6 = sand.u32 1, %s583_s12  }
 0x127   : > { %p787_p3 = scmp.ne.s32.totalorder %s780_s23, 0  ;;  %s336_s8 = scalar_lea.sflag [#allocation4], %s335_s6 }
 0x129   : > { %p458_p4 = pnand %p463_p2, %p787_p3 }
 0x12b   : > { %578 = dma.done.wait (!%p458_p4), %s336_s8, 256  }
 0x12c   : > { %580 = vsyncadd (!%p458_p4), %s336_s8, 4294967040  ;;  %p15_p7 = scmp.ge.s32.totalorder %s648_s18, 4   ;;  %s788_s12 = smov %s587_s13 }
 0x12d   : > { %s789_s13 = smov %s591_s14  ;;  %s790_s14 = smov %s659_s21 }
 0x12e   : > { %s791_s15 = smov %s648_s18  ;;  %17 = sbr.rel (!%p15_p7) target bundleno = 4 (0x4), region = 80 }
 0x135   :  { %341 = vsyncpa [#allocation3], 1 }
 0x136   :  { %343 = vsyncpa [#allocation3 + $0x1], 1 }
 0x137   :  { %344 = vsyncpa [#allocation4], 1 }
 0x138   :  { %346 = vsyncpa [#allocation4 + $0x1], 1 }

// kernel: autoformer_forward.17
= control target key start
LH: loop header
LB: loop body
LE: loop exit
PB: predicated region body
PF: predicated region fallthrough
CT: control target
= control target key end

     0   :  { %s604_s12 = smov 0   ;;  %s606_s13 = smov 0   ;;  %s673_s0 = inlined_call_operand.vmem [shape: bf16[48,64], index: 0, kind: input, shape index: {}]   ;;  %s674_s1 = inlined_call_operand.vmem [shape: bf16[64,192], index: 1, kind: input, shape index: {}]   ;;  %s675_s2 = inlined_call_operand.vmem [shape: f32[1,192], index: 2, kind: input, shape index: {}]   ;;  %s676_s3 = inlined_call_operand.vmem [shape: f32[48,192], index: 3, kind: output, shape index: {}]  }
   0x1   :  { %s608_s14 = smov 0  }
   0x2 LB: > { %s25_s15 = sadd.s32 1, %s577_s13  ;;  %p493_p0 = scmp.ge.s32.totalorder %s581_s14, 1  ;;  %s581_s14 = sphi %s608_s14, %s13_s14   ;;  %s577_s13 = sphi %s606_s13, %s678_s13   ;;  %s573_s12 = sphi %s604_s12, %s677_s12  }
   0x3   : > { %p27_p1 = scmp.ge.s32.totalorder %s25_s15, 2  ;;  %p173_p2 = scmp.lt.s32.totalorder %s581_s14, 3 }
   0x5   : > { %s680_s15 = smov (%p27_p1, %s25_s15), 0  ;;  %p174_p3 = pnand %p493_p0, %p173_p2 }
   0x6   : > { %v545_v0 = vld [vmem:[%s674_s1 + $0x4] ss:$8 sps:$4 sm:$0xff] (!%p174_p3)   ;;  %s211_s18 = smul.u32 (!%p174_p3), 3, %s573_s12  ;;  %v547_v1 = vld [vmem:[%s674_s1] ss:$8 sps:$4 sm:$0xff] (!%p174_p3)   ;;  %v583_v2 = vmov (!%p174_p3), 0   ;;  %v254_v11 = vlaneseq (!%p174_p3) }
   0x7   : > { %177 = sbr.rel (%p174_p3) target bundleno = 242 (0xf2), region = 32  ;;  %351 = vmatprep.mubr.bf16.mxu0 (!%p174_p3), %v583_v2  ;;  %361 = vmatprep.mubr.bf16.mxu1 (!%p174_p3), %v583_v2  ;;  %v548_v3 = vld [vmem:[%s674_s1 + $0x14] ss:$8 sps:$4 sm:$0xff] (!%p174_p3)   ;;  %v550_v4 = vld [vmem:[%s674_s1 + $0x10] ss:$8 sps:$4 sm:$0xff] (!%p174_p3)   ;;  %vm312_vm0 = vcmask (!%p174_p3), 523264  }
   0x8   : > { %319 = vmatprep.subr.bf16.mxu0 (!%p174_p3), %v545_v0  ;;  %512 = vmatprep.subr.bf16.mxu1 (!%p174_p3), %v545_v0  ;;  %p212_p4 = scmp.lt.s32.totalorder (!%p174_p3), %s211_s18, 5  ;;  %v551_v5 = vld [vmem:[%s674_s1 + $0x24] ss:$8 sps:$4 sm:$0xff] (!%p174_p3)   ;;  %v553_v6 = vld [vmem:[%s674_s1 + $0x20] ss:$8 sps:$4 sm:$0xff] (!%p174_p3)   ;;  %v255_v12 = vshrl.u32 (!%p174_p3), %v254_v11, 7 }
   0x9   : > { %320 = vmatpush1.bf16.msra.mxu0 (!%p174_p3), %v547_v1  ;;  %516 = vmatpush1.bf16.msra.mxu1 (!%p174_p3), %v547_v1  ;;  %v554_v7 = vld [vmem:[%s674_s1 + $0x34] ss:$8 sps:$4 sm:$0xff] (!%p174_p3)   ;;  %v556_v8 = vld [vmem:[%s674_s1 + $0x30] ss:$8 sps:$4 sm:$0xff] (!%p174_p3)   ;;  %v252_v14 = vld [vmem:[%s675_s2] sm:$0x3] (!%p174_p3) }
   0xa   : > { %321 = vmatprep.subr.bf16.mxu0 (!%p174_p3), %v548_v3  ;;  %513 = vmatprep.subr.bf16.mxu1 (!%p174_p3), %v548_v3  ;;  %v256_v13 = vsub.s32 (!%p174_p3), 0, %v255_v12  ;;  %v260_v15 = vsub.s32 (!%p174_p3), 1, %v255_v12 }
   0xc   : > { %v257_v16 = vrot.slane (!%p174_p3), %v252_v14, %v256_v13  ;;  %v261_v17 = vrot.slane (!%p174_p3), %v252_v14, %v260_v15 }
   0xd   : > { %322 = vmatpush1.bf16.msra.mxu0 (!%p174_p3), %v550_v4  ;;  %517 = vmatpush1.bf16.msra.mxu1 (!%p174_p3), %v550_v4 }
   0xe   : > { %s682_s18 = smov (!%p212_p4, %s211_s18), 5  ;;  %323 = vmatprep.subr.bf16.mxu0 %v551_v5  ;;  %514 = vmatprep.subr.bf16.mxu1 %v551_v5 }
   0xf   : > { %s494_s27 = sshll.u32 %s682_s18, 2  ;;  %s511_s12 = sshll.u32 %s682_s18, 4 }
  0x10   : > { %s215_s5 = scalar_lea.vmem %s673_s0, %s494_s27  ;;  %s237_s19 = scalar_lea.vmem %s676_s3, %s511_s12 }
  0x11   : > { %324 = vmatpush1.bf16.msra.mxu0 %v553_v6  ;;  %518 = vmatpush1.bf16.msra.mxu1 %v553_v6  ;;  %v557_v9 = vld [vmem:[%s215_s5] sm:$0xff]   ;;  %v558_v10 = vld [vmem:[%s215_s5 + $0x8] ss:$0 sps:$4 sm:$0xff]  }
  0x12   : > { %325 = vmatprep.subr.bf16.mxu0 %v554_v7  ;;  %515 = vmatprep.subr.bf16.mxu1 %v554_v7 }
  0x15   : > { %326 = vmatpush1.bf16.msra.mxu0 %v556_v8  ;;  %519 = vmatpush1.bf16.msra.mxu1 %v556_v8 }
  0x18   : > { %507 = vmatmul.mubr.msk.bf16.vlgmr.msra.gmra.mrb[0].mxu0 %vm312_vm0, %v557_v9  ;;  %508 = vmatmul.mubr.msk.bf16.vlgmr.msra.gmra.mrb[0].mxu1 %vm312_vm0, %v558_v10 }
  0xeb   : > { %v353_v18 = vpop.f32.mrb[0].mxu0  ;;  %v363_v19 = vpop.f32.mrb[0].mxu1 }
  0xec   : > { %v354_v20 = vadd.f32 %v353_v18, %v257_v16  ;;  %v355_v21 = vpop.f32.mrb[1].mxu0  ;;  %v365_v22 = vpop.f32.mrb[1].mxu1  ;;  %v364_v23 = vadd.f32 %v363_v19, %v257_v16 }
  0xed   : > { %v356_v24 = vadd.f32 %v355_v21, %v261_v17  ;;  %v357_v25 = vpop.f32.mrb[2].mxu0  ;;  %v367_v26 = vpop.f32.mrb[2].mxu1  ;;  %v366_v27 = vadd.f32 %v365_v22, %v261_v17 }
  0xee   : > { %370 = vst [vmem:[%s237_s19] sm:$0xff] %v354_v20  ;;  %v358_v28 = vadd.f32 %v357_v25, %v257_v16  ;;  %v359_v29 = vpop.f32.mrb[3].mxu0  ;;  %v368_v30 = vpop.f32.mrb[3].mxu1  ;;  %374 = vst [vmem:[%s237_s19 + $0x20] sm:$0xff] %v364_v23 }
  0xef   : > { %371 = vst.msk [vmem:[%s237_s19 + $0x8] sm:$0xff] %vm312_vm0, %v356_v24  ;;  %v360_v31 = vadd.f32 %v359_v29, %v261_v17  ;;  %375 = vst.msk [vmem:[%s237_s19 + $0x28] sm:$0xff] %vm312_vm0, %v366_v27 }
  0xf0   : > { %372 = vst [vmem:[%s237_s19 + $0x10] sm:$0xff] %v358_v28 }
  0xf1   : > { %373 = vst.msk [vmem:[%s237_s19 + $0x18] sm:$0xff] %vm312_vm0, %v360_v31 }
  0xf2 PF: > { %s13_s14 = sadd.s32 1, %s581_s14   ;;  %s677_s12 = smov %s577_s13 }
  0xf3   : > { %p10_p5 = scmp.ge.s32.totalorder %s13_s14, 4   ;;  %s678_s13 = smov %s680_s15 }
  0xf5   :  { %12 = sbr.rel (!%p10_p5) target bundleno = 2 (0x2), region = 68 }

// kernel: autoformer_forward.16
= control target key start
LH: loop header
LB: loop body
LE: loop exit
PB: predicated region body
PF: predicated region fallthrough
CT: control target
= control target key end

     0   :  { %s606_s24 = smov 0   ;;  %s648_s0 = inlined_call_operand.vmem [shape: f32[2,24,1], index: 0, kind: input, shape index: {}]   ;;  %s649_s1 = inlined_call_operand.vmem [shape: f32[2,24,1], index: 1, kind: input, shape index: {}]   ;;  %s650_s2 = inlined_call_operand.vmem [shape: f32[2,24,1], index: 2, kind: input, shape index: {}]   ;;  %s651_s3 = inlined_call_operand.vmem [shape: f32[1,64], index: 3, kind: input, shape index: {}]   ;;  %s652_s4 = inlined_call_operand.vmem [shape: f32[1,64], index: 4, kind: input, shape index: {}]   ;;  %s653_s5 = inlined_call_operand.vmem [shape: f32[1,64], index: 5, kind: input, shape index: {}]   ;;  %s654_s6 = inlined_call_operand.vmem [shape: f32[2,24,64], index: 6, kind: input, shape index: {}]   ;;  %s655_s7 = inlined_call_operand.vmem [shape: f32[2,24,64], index: 7, kind: output, shape index: {}]  }
   0x1 LB: > { %s530_s25 = sadd.s32 4294967295, %s563_s24   ;;  %p534_p0 = scmp.ge.s32.totalorder %s563_s24, 1  ;;  %s563_s24 = sphi %s606_s24, %s17_s24  }
   0x2   : > { %p267_p1 = scmp.lt.s32.totalorder %s563_s24, 3 }
   0x4   : > { %p268_p2 = pnand %p534_p0, %p267_p1 }
   0x5   : > { %p314_p3 = scmp.lt.s32.totalorder (!%p268_p2), %s530_s25, 1  ;;  %v565_v0 = vmov (!%p268_p2), 0   ;;  %v541_v14 = vld [vmem:[%s652_s4] ss:$0 sm:$0xff] (!%p268_p2)  ;;  %vm435_vm0 = vcmask (!%p268_p2), 523264  }
   0x6   : > { %271 = sbr.rel (%p268_p2) target bundleno = 169 (0xa9), region = 48  ;;  %556 = vset.pattern.permute.xlu1 (!%p268_p2), %v565_v0  ;;  %555 = vset.pattern.permute.xlu0 (!%p268_p2), %v565_v0  ;;  %v540_v15 = vld [vmem:[%s651_s3] ss:$0 sm:$0xff] (!%p268_p2) }
   0x7   : > { %v542_v21 = vld [vmem:[%s653_s5] ss:$0 sm:$0xff] (!%p268_p2) }
   0xd   : > { %s657_s25 = smov (!%p314_p3, %s530_s25), 1 }
   0xe   : > { %s614_s26 = smul.u32 24, %s657_s25 }
  0x10   : > { %s318_s29 = scalar_lea.vmem %s648_s0, %s614_s26  ;;  %s323_s9 = scalar_lea.vmem %s649_s1, %s614_s26 }
  0x11   : > { %v341_v1 = vld [vmem:[%s318_s29 + $0x10] sm:$0xff]  ;;  %v339_v2 = vld [vmem:[%s318_s29] sm:$0xff]  ;;  %v340_v4 = vld [vmem:[%s318_s29 + $0x8] sm:$0xff]  ;;  %s328_s12 = scalar_lea.vmem %s650_s2, %s614_s26  ;;  %s333_s21 = scalar_lea.vmem %s654_s6, %s614_s26 }
  0x12   : > { %355 = vperm.xlu1 %556, %v341_v1   ;;  %345 = vperm.xlu0 %555, %v339_v2   ;;  %v367_v3 = vld [vmem:[%s323_s9] sm:$0xff]  ;;  %v369_v5 = vld [vmem:[%s323_s9 + $0x10] sm:$0xff]  ;;  %v368_v6 = vld [vmem:[%s323_s9 + $0x8] sm:$0xff]  ;;  %s338_s25 = scalar_lea.vmem %s655_s7, %s614_s26 }
  0x13   : > { %v399_v7 = vld [vmem:[%s328_s12 + $0x8] sm:$0xff]  ;;  %v398_v8 = vld [vmem:[%s328_s12] sm:$0xff]  ;;  %v400_v9 = vld [vmem:[%s328_s12 + $0x10] sm:$0xff] }
  0x14   : > { %v430_v30 = vld [vmem:[%s333_s21 + $0x8] sm:$0xff]  ;;  %v429_v31 = vld [vmem:[%s333_s21] sm:$0xff]  ;;  %v431_v40 = vld [vmem:[%s333_s21 + $0x10] sm:$0xff] }
  0x16   : > { %373 = vperm.xlu1 %556, %v367_v3   ;;  %350 = vperm.xlu0 %555, %v340_v4  }
  0x1a   : > { %383 = vperm.xlu1 %556, %v369_v5   ;;  %378 = vperm.xlu0 %555, %v368_v6  }
  0x1e   : > { %409 = vperm.xlu1 %556, %v399_v7   ;;  %404 = vperm.xlu0 %555, %v398_v8  }
  0x22   : > { %414 = vperm.xlu0 %555, %v400_v9  }
  0x91   : > { %v356_v10 = vpop.permute.xlu1 %355  ;;  %v346_v11 = vpop.permute.xlu0 %345 }
  0x92   : > { %v364_v20 = vmul.f32 %v540_v15, %v346_v11  ;;  %v366_v32 = vmul.f32 %v540_v15, %v356_v10 }
  0x95   : > { %v374_v12 = vpop.permute.xlu1 %373  ;;  %v351_v13 = vpop.permute.xlu0 %350 }
  0x96   : > { %v392_v16 = vmul.f32 %v541_v14, %v374_v12  ;;  %v365_v22 = vmul.f32 %v540_v15, %v351_v13 }
  0x98   : > { %v395_v23 = vadd.f32 %v392_v16, %v364_v20 }
  0x99   : > { %v384_v17 = vpop.permute.xlu1 %383  ;;  %v379_v18 = vpop.permute.xlu0 %378 }
  0x9a   : > { %v393_v19 = vmul.f32 %v541_v14, %v379_v18  ;;  %v394_v26 = vmul.f32 %v541_v14, %v384_v17 }
  0x9c   : > { %v396_v27 = vadd.f32 %v393_v19, %v365_v22  ;;  %v397_v36 = vadd.f32 %v394_v26, %v366_v32 }
  0x9d   : > { %v410_v24 = vpop.permute.xlu1 %409  ;;  %v405_v25 = vpop.permute.xlu0 %404 }
  0x9e   : > { %v424_v28 = vmul.f32 %v542_v21, %v410_v24  ;;  %v423_v29 = vmul.f32 %v542_v21, %v405_v25 }
  0xa0   : > { %v427_v33 = vadd.f32 %v424_v28, %v396_v27  ;;  %v426_v34 = vadd.f32 %v423_v29, %v395_v23 }
  0xa1   : > { %v415_v35 = vpop.permute.xlu0 %414 }
  0xa2   : > { %v433_v37 = vadd.f32 %v430_v30, %v427_v33  ;;  %v432_v38 = vadd.f32 %v429_v31, %v426_v34  ;;  %v425_v39 = vmul.f32 %v542_v21, %v415_v35 }
  0xa4   : > { %437 = vst.msk [vmem:[%s338_s25 + $0x8] sm:$0xff] %vm435_vm0, %v433_v37  ;;  %436 = vst.msk [vmem:[%s338_s25] sm:$0xff] %vm435_vm0, %v432_v38  ;;  %v428_v41 = vadd.f32 %v425_v39, %v397_v36 }
  0xa6   : > { %v434_v42 = vadd.f32 %v431_v40, %v428_v41 }
  0xa8   : > { %438 = vst.msk [vmem:[%s338_s25 + $0x10] sm:$0xff] %vm435_vm0, %v434_v42 }
  0xa9 PF: > { %s17_s24 = sadd.s32 1, %s563_s24  }
  0xaa   : > { %p14_p4 = scmp.ge.s32.totalorder %s17_s24, 4  }
  0xac   :  { %16 = sbr.rel (!%p14_p4) target bundleno = 1 (0x1), region = 87 }

// kernel: reverse.7
= control target key start
LH: loop header
LB: loop body
LE: loop exit
PB: predicated region body
PF: predicated region fallthrough
CT: control target
= control target key end

     0   :  { %v2_v0 = vlaneseq  ;;  %s398_s0 = inlined_call_operand.vmem [shape: f32[2,8,8,11], index: 0, kind: input, shape index: {}]   ;;  %s399_s1 = inlined_call_operand.vmem [shape: f32[2,8,8,11], index: 1, kind: output, shape index: {}]  }
   0x1   :  { %v66_v2 = vld [vmem:[%s398_s0 + $0x10] sm:$0xff]  ;;  %v62_v3 = vld [vmem:[%s398_s0] sm:$0xff]  ;;  %v68_v4 = vld [vmem:[%s398_s0 + $0x18] sm:$0xff] }
   0x2   :  { %v3_v1 = vsub.s32 10, %v2_v0  ;;  %v64_v5 = vld [vmem:[%s398_s0 + $0x8] sm:$0xff]  ;;  %v70_v7 = vld [vmem:[%s398_s0 + $0x20] sm:$0xff]  ;;  %v76_v8 = vld [vmem:[%s398_s0 + $0x38] sm:$0xff] }
   0x3   :  { %v72_v6 = vld [vmem:[%s398_s0 + $0x28] sm:$0xff]  ;;  %v74_v9 = vld [vmem:[%s398_s0 + $0x30] sm:$0xff]  ;;  %v78_v11 = vld [vmem:[%s398_s0 + $0x40] sm:$0xff] }
   0x4   :  { %4 = vset.pattern.permute.xlu0 %v3_v1  ;;  %291 = vset.pattern.permute.xlu1 %v3_v1  ;;  %v80_v10 = vld [vmem:[%s398_s0 + $0x48] sm:$0xff]  ;;  %v84_v12 = vld [vmem:[%s398_s0 + $0x58] sm:$0xff]  ;;  %v82_v13 = vld [vmem:[%s398_s0 + $0x50] sm:$0xff] }
   0x5   :  { %110 = vperm.xlu1 %291, %v66_v2   ;;  %98 = vperm.xlu0 %4, %v62_v3   ;;  %v88_v14 = vld [vmem:[%s398_s0 + $0x68] sm:$0xff]  ;;  %v86_v15 = vld [vmem:[%s398_s0 + $0x60] sm:$0xff]  ;;  %v92_v16 = vld [vmem:[%s398_s0 + $0x78] sm:$0xff] }
   0x6   :  { %v90_v17 = vld [vmem:[%s398_s0 + $0x70] sm:$0xff] }
   0x9   :  { %116 = vperm.xlu1 %291, %v68_v4   ;;  %104 = vperm.xlu0 %4, %v64_v5  }
   0xd   :  { %128 = vperm.xlu1 %291, %v72_v6   ;;  %122 = vperm.xlu0 %4, %v70_v7  }
  0x11   :  { %140 = vperm.xlu1 %291, %v76_v8   ;;  %134 = vperm.xlu0 %4, %v74_v9  }
  0x15   :  { %152 = vperm.xlu1 %291, %v80_v10   ;;  %146 = vperm.xlu0 %4, %v78_v11  }
  0x19   :  { %164 = vperm.xlu1 %291, %v84_v12   ;;  %158 = vperm.xlu0 %4, %v82_v13  }
  0x1d   :  { %176 = vperm.xlu1 %291, %v88_v14   ;;  %170 = vperm.xlu0 %4, %v86_v15  }
  0x21   :  { %188 = vperm.xlu1 %291, %v92_v16   ;;  %182 = vperm.xlu0 %4, %v90_v17  }
  0x84   :  { %v111_v18 = vpop.permute.xlu1 %110  ;;  %v99_v19 = vpop.permute.xlu0 %98 }
  0x85   :  { %253 = vst [vmem:[%s399_s1 + $0x10] sm:$0xff] %v111_v18  ;;  %249 = vst [vmem:[%s399_s1] sm:$0xff] %v99_v19 }
  0x88   :  { %v117_v20 = vpop.permute.xlu1 %116  ;;  %v105_v21 = vpop.permute.xlu0 %104 }
  0x89   :  { %255 = vst [vmem:[%s399_s1 + $0x18] sm:$0xff] %v117_v20  ;;  %251 = vst [vmem:[%s399_s1 + $0x8] sm:$0xff] %v105_v21 }
  0x8c   :  { %v129_v22 = vpop.permute.xlu1 %128  ;;  %v123_v23 = vpop.permute.xlu0 %122 }
  0x8d   :  { %259 = vst [vmem:[%s399_s1 + $0x28] sm:$0xff] %v129_v22  ;;  %257 = vst [vmem:[%s399_s1 + $0x20] sm:$0xff] %v123_v23 }
  0x90   :  { %v141_v24 = vpop.permute.xlu1 %140  ;;  %v135_v25 = vpop.permute.xlu0 %134 }
  0x91   :  { %263 = vst [vmem:[%s399_s1 + $0x38] sm:$0xff] %v141_v24  ;;  %261 = vst [vmem:[%s399_s1 + $0x30] sm:$0xff] %v135_v25 }
  0x94   :  { %v153_v26 = vpop.permute.xlu1 %152  ;;  %v147_v27 = vpop.permute.xlu0 %146 }
  0x95   :  { %267 = vst [vmem:[%s399_s1 + $0x48] sm:$0xff] %v153_v26  ;;  %265 = vst [vmem:[%s399_s1 + $0x40] sm:$0xff] %v147_v27 }
  0x98   :  { %v165_v28 = vpop.permute.xlu1 %164  ;;  %v159_v29 = vpop.permute.xlu0 %158 }
  0x99   :  { %271 = vst [vmem:[%s399_s1 + $0x58] sm:$0xff] %v165_v28  ;;  %269 = vst [vmem:[%s399_s1 + $0x50] sm:$0xff] %v159_v29 }
  0x9c   :  { %v177_v30 = vpop.permute.xlu1 %176  ;;  %v171_v31 = vpop.permute.xlu0 %170 }
  0x9d   :  { %275 = vst [vmem:[%s399_s1 + $0x68] sm:$0xff] %v177_v30  ;;  %273 = vst [vmem:[%s399_s1 + $0x60] sm:$0xff] %v171_v31 }
  0xa0   :  { %v189_v32 = vpop.permute.xlu1 %188  ;;  %v183_v33 = vpop.permute.xlu0 %182 }
  0xa1   :  { %279 = vst [vmem:[%s399_s1 + $0x78] sm:$0xff] %v189_v32  ;;  %277 = vst [vmem:[%s399_s1 + $0x70] sm:$0xff] %v183_v33 }

// kernel: autoformer_forward.19
= control target key start
LH: loop header
LB: loop body
LE: loop exit
PB: predicated region body
PF: predicated region fallthrough
CT: control target
= control target key end

     0   :  { %s589_s24 = smov 0   ;;  %s631_s0 = inlined_call_operand.vmem [shape: f32[2,16,1], index: 0, kind: input, shape index: {}]   ;;  %s632_s1 = inlined_call_operand.vmem [shape: f32[2,16,1], index: 1, kind: input, shape index: {}]   ;;  %s633_s2 = inlined_call_operand.vmem [shape: f32[2,16,1], index: 2, kind: input, shape index: {}]   ;;  %s634_s3 = inlined_call_operand.vmem [shape: f32[1,64], index: 3, kind: input, shape index: {}]   ;;  %s635_s4 = inlined_call_operand.vmem [shape: f32[1,64], index: 4, kind: input, shape index: {}]   ;;  %s636_s5 = inlined_call_operand.vmem [shape: f32[1,64], index: 5, kind: input, shape index: {}]   ;;  %s637_s6 = inlined_call_operand.vmem [shape: f32[2,16,64], index: 6, kind: input, shape index: {}]   ;;  %s638_s7 = inlined_call_operand.vmem [shape: f32[2,16,64], index: 7, kind: output, shape index: {}]  }
   0x1 LB: > { %s504_s25 = sadd.s32 4294967295, %s546_s24   ;;  %p508_p0 = scmp.ge.s32.totalorder %s546_s24, 1  ;;  %s546_s24 = sphi %s589_s24, %s17_s24  }
   0x2   : > { %p267_p1 = scmp.lt.s32.totalorder %s546_s24, 3 }
   0x4   : > { %p268_p2 = pnand %p508_p0, %p267_p1 }
   0x5   : > { %p314_p3 = scmp.lt.s32.totalorder (!%p268_p2), %s504_s25, 1  ;;  %v548_v0 = vmov (!%p268_p2), 0   ;;  %v520_v9 = vld [vmem:[%s635_s4] ss:$0 sm:$0xff] (!%p268_p2)  ;;  %vm410_vm0 = vcmask (!%p268_p2), 523264  }
   0x6   : > { %271 = sbr.rel (%p268_p2) target bundleno = 161 (0xa1), region = 48  ;;  %539 = vset.pattern.permute.xlu1 (!%p268_p2), %v548_v0  ;;  %538 = vset.pattern.permute.xlu0 (!%p268_p2), %v548_v0  ;;  %v519_v10 = vld [vmem:[%s634_s3] ss:$0 sm:$0xff] (!%p268_p2) }
   0x7   : > { %v521_v17 = vld [vmem:[%s636_s5] ss:$0 sm:$0xff] (!%p268_p2) }
   0xd   : > { %s640_s25 = smov (!%p314_p3, %s504_s25), 1 }
   0xe   : > { %s597_s26 = sshll.u32 %s640_s25, 4 }
   0xf   : > { %s323_s29 = scalar_lea.vmem %s632_s1, %s597_s26  ;;  %s318_s9 = scalar_lea.vmem %s631_s0, %s597_s26 }
  0x10   : > { %v360_v1 = vld [vmem:[%s323_s29] sm:$0xff]  ;;  %v361_v3 = vld [vmem:[%s323_s29 + $0x8] sm:$0xff]  ;;  %s328_s12 = scalar_lea.vmem %s633_s2, %s597_s26  ;;  %s333_s21 = scalar_lea.vmem %s637_s6, %s597_s26 }
  0x11   : > { %v339_v2 = vld [vmem:[%s318_s9] sm:$0xff]  ;;  %365 = vperm.xlu1 %539, %v360_v1   ;;  %v340_v4 = vld [vmem:[%s318_s9 + $0x8] sm:$0xff]  ;;  %s338_s25 = scalar_lea.vmem %s638_s7, %s597_s26 }
  0x12   : > { %344 = vperm.xlu0 %538, %v339_v2   ;;  %v384_v5 = vld [vmem:[%s328_s12 + $0x8] sm:$0xff]  ;;  %v383_v6 = vld [vmem:[%s328_s12] sm:$0xff] }
  0x13   : > { %v407_v24 = vld [vmem:[%s333_s21 + $0x8] sm:$0xff]  ;;  %v406_v25 = vld [vmem:[%s333_s21] sm:$0xff] }
  0x15   : > { %370 = vperm.xlu1 %539, %v361_v3  }
  0x16   : > { %349 = vperm.xlu0 %538, %v340_v4  }
  0x19   : > { %393 = vperm.xlu1 %539, %v384_v5  }
  0x1a   : > { %388 = vperm.xlu0 %538, %v383_v6  }
  0x90   : > { %v366_v7 = vpop.permute.xlu1 %365 }
  0x91   : > { %v345_v8 = vpop.permute.xlu0 %344  ;;  %v379_v13 = vmul.f32 %v520_v9, %v366_v7 }
  0x92   : > { %v358_v14 = vmul.f32 %v519_v10, %v345_v8 }
  0x94   : > { %v371_v11 = vpop.permute.xlu1 %370  ;;  %v381_v20 = vadd.f32 %v379_v13, %v358_v14 }
  0x95   : > { %v350_v12 = vpop.permute.xlu0 %349  ;;  %v380_v15 = vmul.f32 %v520_v9, %v371_v11 }
  0x96   : > { %v359_v16 = vmul.f32 %v519_v10, %v350_v12 }
  0x98   : > { %v394_v18 = vpop.permute.xlu1 %393  ;;  %v382_v21 = vadd.f32 %v380_v15, %v359_v16 }
  0x99   : > { %v389_v19 = vpop.permute.xlu0 %388  ;;  %v403_v22 = vmul.f32 %v521_v17, %v394_v18 }
  0x9a   : > { %v402_v23 = vmul.f32 %v521_v17, %v389_v19 }
  0x9b   : > { %v405_v26 = vadd.f32 %v403_v22, %v382_v21 }
  0x9c   : > { %v404_v27 = vadd.f32 %v402_v23, %v381_v20 }
  0x9d   : > { %v409_v28 = vadd.f32 %v407_v24, %v405_v26 }
  0x9e   : > { %v408_v29 = vadd.f32 %v406_v25, %v404_v27 }
  0x9f   : > { %412 = vst.msk [vmem:[%s338_s25 + $0x8] sm:$0xff] %vm410_vm0, %v409_v28 }
  0xa0   : > { %411 = vst.msk [vmem:[%s338_s25] sm:$0xff] %vm410_vm0, %v408_v29 }
  0xa1 PF: > { %s17_s24 = sadd.s32 1, %s546_s24  }
  0xa2   : > { %p14_p4 = scmp.ge.s32.totalorder %s17_s24, 4  }
  0xa4   :  { %16 = sbr.rel (!%p14_p4) target bundleno = 1 (0x1), region = 87 }

// kernel: autoformer_forward.20
= control target key start
LH: loop header
LB: loop body
LE: loop exit
PB: predicated region body
PF: predicated region fallthrough
CT: control target
= control target key end

     0   :  { %s578_s12 = smov 0   ;;  %s580_s13 = smov 0   ;;  %s641_s0 = inlined_call_operand.vmem [shape: bf16[32,64], index: 0, kind: input, shape index: {}]   ;;  %s642_s1 = inlined_call_operand.vmem [shape: bf16[64,192], index: 1, kind: input, shape index: {}]   ;;  %s643_s2 = inlined_call_operand.vmem [shape: f32[1,192], index: 2, kind: input, shape index: {}]   ;;  %s644_s3 = inlined_call_operand.vmem [shape: f32[32,192], index: 3, kind: output, shape index: {}]  }
   0x1   :  { %s582_s14 = smov 0  }
   0x2 LB: > { %s25_s15 = sadd.s32 1, %s551_s13  ;;  %p476_p0 = scmp.ge.s32.totalorder %s555_s14, 1  ;;  %s555_s14 = sphi %s582_s14, %s13_s14   ;;  %s551_s13 = sphi %s580_s13, %s646_s13   ;;  %s547_s12 = sphi %s578_s12, %s645_s12  }
   0x3   : > { %p27_p1 = scmp.ge.s32.totalorder %s25_s15, 2  ;;  %p173_p2 = scmp.lt.s32.totalorder %s555_s14, 3 }
   0x5   : > { %s648_s15 = smov (%p27_p1, %s25_s15), 0  ;;  %p174_p3 = pnand %p476_p0, %p173_p2 }
   0x6   : > { %v520_v0 = vld [vmem:[%s642_s1 + $0x4] ss:$8 sps:$4 sm:$0xff] (!%p174_p3)   ;;  %s477_s18 = sshll.u32 (!%p174_p3), %s547_s12, 1  ;;  %v522_v1 = vld [vmem:[%s642_s1] ss:$8 sps:$4 sm:$0xff] (!%p174_p3)   ;;  %v557_v2 = vmov (!%p174_p3), 0   ;;  %v253_v10 = vlaneseq (!%p174_p3) }
   0x7   : > { %177 = sbr.rel (%p174_p3) target bundleno = 241 (0xf1), region = 32  ;;  %344 = vmatprep.mubr.bf16.mxu0 (!%p174_p3), %v557_v2  ;;  %p212_p4 = scmp.lt.s32.totalorder (!%p174_p3), %s477_s18, 3  ;;  %312 = vmatprep.subr.bf16.mxu0 (!%p174_p3), %v520_v0  ;;  %v523_v3 = vld [vmem:[%s642_s1 + $0x14] ss:$8 sps:$4 sm:$0xff] (!%p174_p3)   ;;  %v525_v4 = vld [vmem:[%s642_s1 + $0x10] ss:$8 sps:$4 sm:$0xff] (!%p174_p3)  }
   0x8   : > { %313 = vmatpush1.bf16.msra.mxu0 (!%p174_p3), %v522_v1  ;;  %v526_v5 = vld [vmem:[%s642_s1 + $0x24] ss:$8 sps:$4 sm:$0xff] (!%p174_p3)   ;;  %v528_v6 = vld [vmem:[%s642_s1 + $0x20] ss:$8 sps:$4 sm:$0xff] (!%p174_p3)   ;;  %v529_v7 = vld [vmem:[%s642_s1 + $0x34] ss:$8 sps:$4 sm:$0xff] (!%p174_p3)  }
   0x9   : > { %314 = vmatprep.subr.bf16.mxu0 (!%p174_p3), %v523_v3  ;;  %v531_v8 = vld [vmem:[%s642_s1 + $0x30] ss:$8 sps:$4 sm:$0xff] (!%p174_p3)   ;;  %vm308_vm0 = vcmask (!%p174_p3), 523264   ;;  %v254_v11 = vshrl.u32 (!%p174_p3), %v253_v10, 7  ;;  %v251_v13 = vld [vmem:[%s643_s2] sm:$0x3] (!%p174_p3) }
   0xb   : > { %v255_v12 = vsub.s32 (!%p174_p3), 0, %v254_v11  ;;  %v259_v14 = vsub.s32 (!%p174_p3), 1, %v254_v11 }
   0xc   : > { %315 = vmatpush1.bf16.msra.mxu0 (!%p174_p3), %v525_v4 }
   0xd   : > { %316 = vmatprep.subr.bf16.mxu0 (!%p174_p3), %v526_v5  ;;  %v256_v15 = vrot.slane (!%p174_p3), %v251_v13, %v255_v12  ;;  %v260_v16 = vrot.slane (!%p174_p3), %v251_v13, %v259_v14 }
   0xe   : > { %s650_s18 = smov (!%p212_p4, %s477_s18), 3 }
   0xf   : > { %s478_s27 = sshll.u32 %s650_s18, 2  ;;  %s494_s12 = sshll.u32 %s650_s18, 4 }
  0x10   : > { %s215_s30 = scalar_lea.vmem %s641_s0, %s478_s27  ;;  %317 = vmatpush1.bf16.msra.mxu0 %v528_v6  ;;  %s237_s19 = scalar_lea.vmem %s644_s3, %s494_s12 }
  0x11   : > { %318 = vmatprep.subr.bf16.mxu0 %v529_v7  ;;  %v532_v9 = vld [vmem:[%s215_s30] sm:$0xff]  }
  0x14   : > { %319 = vmatpush1.bf16.msra.mxu0 %v531_v8 }
  0x17   : > { %491 = vmatmul.mubr.msk.bf16.vlgmr.msra.gmra.mrb[0].mxu0 %vm308_vm0, %v532_v9 }
  0xea   : > { %v346_v17 = vpop.f32.mrb[0].mxu0 }
  0xeb   : > { %v347_v18 = vadd.f32 %v346_v17, %v256_v15  ;;  %v348_v19 = vpop.f32.mrb[1].mxu0 }
  0xec   : > { %v349_v20 = vadd.f32 %v348_v19, %v260_v16  ;;  %v350_v21 = vpop.f32.mrb[2].mxu0 }
  0xed   : > { %355 = vst [vmem:[%s237_s19] sm:$0xff] %v347_v18  ;;  %v351_v22 = vadd.f32 %v350_v21, %v256_v15  ;;  %v352_v23 = vpop.f32.mrb[3].mxu0 }
  0xee   : > { %356 = vst.msk [vmem:[%s237_s19 + $0x8] sm:$0xff] %vm308_vm0, %v349_v20  ;;  %v353_v24 = vadd.f32 %v352_v23, %v260_v16 }
  0xef   : > { %357 = vst [vmem:[%s237_s19 + $0x10] sm:$0xff] %v351_v22 }
  0xf0   : > { %358 = vst.msk [vmem:[%s237_s19 + $0x18] sm:$0xff] %vm308_vm0, %v353_v24 }
  0xf1 PF: > { %s13_s14 = sadd.s32 1, %s555_s14   ;;  %s645_s12 = smov %s551_s13 }
  0xf2   : > { %p10_p5 = scmp.ge.s32.totalorder %s13_s14, 4   ;;  %s646_s13 = smov %s648_s15 }
  0xf4   :  { %12 = sbr.rel (!%p10_p5) target bundleno = 2 (0x2), region = 68 }

// kernel: reverse.3
= control target key start
LH: loop header
LB: loop body
LE: loop exit
PB: predicated region body
PF: predicated region fallthrough
CT: control target
= control target key end

     0   :  { %v2_v0 = vlaneseq  ;;  %s398_s0 = inlined_call_operand.vmem [shape: f32[2,8,8,7], index: 0, kind: input, shape index: {}]   ;;  %s399_s1 = inlined_call_operand.vmem [shape: f32[2,8,8,7], index: 1, kind: output, shape index: {}]  }
   0x1   :  { %v66_v2 = vld [vmem:[%s398_s0 + $0x10] sm:$0xff]  ;;  %v62_v3 = vld [vmem:[%s398_s0] sm:$0xff]  ;;  %v68_v4 = vld [vmem:[%s398_s0 + $0x18] sm:$0xff] }
   0x2   :  { %v3_v1 = vsub.s32 6, %v2_v0  ;;  %v64_v5 = vld [vmem:[%s398_s0 + $0x8] sm:$0xff]  ;;  %v70_v7 = vld [vmem:[%s398_s0 + $0x20] sm:$0xff]  ;;  %v76_v8 = vld [vmem:[%s398_s0 + $0x38] sm:$0xff] }
   0x3   :  { %v72_v6 = vld [vmem:[%s398_s0 + $0x28] sm:$0xff]  ;;  %v74_v9 = vld [vmem:[%s398_s0 + $0x30] sm:$0xff]  ;;  %v78_v11 = vld [vmem:[%s398_s0 + $0x40] sm:$0xff] }
   0x4   :  { %4 = vset.pattern.permute.xlu0 %v3_v1  ;;  %291 = vset.pattern.permute.xlu1 %v3_v1  ;;  %v80_v10 = vld [vmem:[%s398_s0 + $0x48] sm:$0xff]  ;;  %v84_v12 = vld [vmem:[%s398_s0 + $0x58] sm:$0xff]  ;;  %v82_v13 = vld [vmem:[%s398_s0 + $0x50] sm:$0xff] }
   0x5   :  { %110 = vperm.xlu1 %291, %v66_v2   ;;  %98 = vperm.xlu0 %4, %v62_v3   ;;  %v88_v14 = vld [vmem:[%s398_s0 + $0x68] sm:$0xff]  ;;  %v86_v15 = vld [vmem:[%s398_s0 + $0x60] sm:$0xff]  ;;  %v92_v16 = vld [vmem:[%s398_s0 + $0x78] sm:$0xff] }
   0x6   :  { %v90_v17 = vld [vmem:[%s398_s0 + $0x70] sm:$0xff] }
   0x9   :  { %116 = vperm.xlu1 %291, %v68_v4   ;;  %104 = vperm.xlu0 %4, %v64_v5  }
   0xd   :  { %128 = vperm.xlu1 %291, %v72_v6   ;;  %122 = vperm.xlu0 %4, %v70_v7  }
  0x11   :  { %140 = vperm.xlu1 %291, %v76_v8   ;;  %134 = vperm.xlu0 %4, %v74_v9  }
  0x15   :  { %152 = vperm.xlu1 %291, %v80_v10   ;;  %146 = vperm.xlu0 %4, %v78_v11  }
  0x19   :  { %164 = vperm.xlu1 %291, %v84_v12   ;;  %158 = vperm.xlu0 %4, %v82_v13  }
  0x1d   :  { %176 = vperm.xlu1 %291, %v88_v14   ;;  %170 = vperm.xlu0 %4, %v86_v15  }
  0x21   :  { %188 = vperm.xlu1 %291, %v92_v16   ;;  %182 = vperm.xlu0 %4, %v90_v17  }
  0x84   :  { %v111_v18 = vpop.permute.xlu1 %110  ;;  %v99_v19 = vpop.permute.xlu0 %98 }
  0x85   :  { %253 = vst [vmem:[%s399_s1 + $0x10] sm:$0xff] %v111_v18  ;;  %249 = vst [vmem:[%s399_s1] sm:$0xff] %v99_v19 }
  0x88   :  { %v117_v20 = vpop.permute.xlu1 %116  ;;  %v105_v21 = vpop.permute.xlu0 %104 }
  0x89   :  { %255 = vst [vmem:[%s399_s1 + $0x18] sm:$0xff] %v117_v20  ;;  %251 = vst [vmem:[%s399_s1 + $0x8] sm:$0xff] %v105_v21 }
  0x8c   :  { %v129_v22 = vpop.permute.xlu1 %128  ;;  %v123_v23 = vpop.permute.xlu0 %122 }
  0x8d   :  { %259 = vst [vmem:[%s399_s1 + $0x28] sm:$0xff] %v129_v22  ;;  %257 = vst [vmem:[%s399_s1 + $0x20] sm:$0xff] %v123_v23 }
  0x90   :  { %v141_v24 = vpop.permute.xlu1 %140  ;;  %v135_v25 = vpop.permute.xlu0 %134 }
  0x91   :  { %263 = vst [vmem:[%s399_s1 + $0x38] sm:$0xff] %v141_v24  ;;  %261 = vst [vmem:[%s399_s1 + $0x30] sm:$0xff] %v135_v25 }
  0x94   :  { %v153_v26 = vpop.permute.xlu1 %152  ;;  %v147_v27 = vpop.permute.xlu0 %146 }
  0x95   :  { %267 = vst [vmem:[%s399_s1 + $0x48] sm:$0xff] %v153_v26  ;;  %265 = vst [vmem:[%s399_s1 + $0x40] sm:$0xff] %v147_v27 }
  0x98   :  { %v165_v28 = vpop.permute.xlu1 %164  ;;  %v159_v29 = vpop.permute.xlu0 %158 }
  0x99   :  { %271 = vst [vmem:[%s399_s1 + $0x58] sm:$0xff] %v165_v28  ;;  %269 = vst [vmem:[%s399_s1 + $0x50] sm:$0xff] %v159_v29 }
  0x9c   :  { %v177_v30 = vpop.permute.xlu1 %176  ;;  %v171_v31 = vpop.permute.xlu0 %170 }
  0x9d   :  { %275 = vst [vmem:[%s399_s1 + $0x68] sm:$0xff] %v177_v30  ;;  %273 = vst [vmem:[%s399_s1 + $0x60] sm:$0xff] %v171_v31 }
  0xa0   :  { %v189_v32 = vpop.permute.xlu1 %188  ;;  %v183_v33 = vpop.permute.xlu0 %182 }
  0xa1   :  { %279 = vst [vmem:[%s399_s1 + $0x78] sm:$0xff] %v189_v32  ;;  %277 = vst [vmem:[%s399_s1 + $0x70] sm:$0xff] %v183_v33 }

// kernel: autoformer_forward.25
= control target key start
LH: loop header
LB: loop body
LE: loop exit
PB: predicated region body
PF: predicated region fallthrough
CT: control target
= control target key end

     0   :  { %s548_s12 = smov 0   ;;  %s550_s13 = smov 0   ;;  %s601_s0 = inlined_call_operand.vmem [shape: bf16[48,64], index: 0, kind: input, shape index: {}]   ;;  %s602_s1 = inlined_call_operand.vmem [shape: bf16[64,64], index: 1, kind: input, shape index: {}]   ;;  %s603_s2 = inlined_call_operand.vmem [shape: f32[1,64], index: 2, kind: input, shape index: {}]   ;;  %s604_s3 = inlined_call_operand.vmem [shape: f32[48,64], index: 3, kind: output, shape index: {}]  }
   0x1   :  { %s552_s14 = smov 0  }
   0x2 LB: > { %s25_s15 = sadd.s32 1, %s522_s13  ;;  %p442_p0 = scmp.ge.s32.totalorder %s526_s14, 1  ;;  %s526_s14 = sphi %s552_s14, %s13_s14   ;;  %s522_s13 = sphi %s550_s13, %s606_s13   ;;  %s518_s12 = sphi %s548_s12, %s605_s12  }
   0x3   : > { %p27_p1 = scmp.ge.s32.totalorder %s25_s15, 2  ;;  %p169_p2 = scmp.lt.s32.totalorder %s526_s14, 3 }
   0x5   : > { %s608_s15 = smov (%p27_p1, %s25_s15), 0  ;;  %p170_p3 = pnand %p442_p0, %p169_p2 }
   0x6   : > { %v498_v0 = vld [vmem:[%s602_s1] sm:$0xff] (!%p170_p3)   ;;  %s203_s18 = smul.u32 (!%p170_p3), 3, %s518_s12  ;;  %v499_v1 = vld [vmem:[%s602_s1 + $0x8] sm:$0xff] (!%p170_p3)   ;;  %v500_v2 = vld [vmem:[%s602_s1 + $0x10] sm:$0xff] (!%p170_p3)   ;;  %vm276_vm0 = vcmask (!%p170_p3), 523264  }
   0x7   : > { %173 = sbr.rel (%p170_p3) target bundleno = 241 (0xf1), region = 32  ;;  %462 = vmatprep.subr.bf16.mxu0 (!%p170_p3), %v498_v0  ;;  %v501_v3 = vld [vmem:[%s602_s1 + $0x18] sm:$0xff] (!%p170_p3)   ;;  %v445_v6 = vld [vmem:[%s603_s2] ss:$0 sm:$0xff] (!%p170_p3) }
   0x8   : > { %p204_p4 = scmp.lt.s32.totalorder (!%p170_p3), %s203_s18, 5  ;;  %463 = vmatpush3.bf16.msra.mxu0 (!%p170_p3), %v498_v0 }
   0x9   : > { %464 = vmatprep.subr.bf16.mxu0 (!%p170_p3), %v499_v1 }
   0xc   : > { %465 = vmatpush3.bf16.msra.mxu0 (!%p170_p3), %v499_v1 }
   0xd   : > { %466 = vmatprep.subr.bf16.mxu0 (!%p170_p3), %v500_v2 }
   0xe   : > { %s610_s18 = smov (!%p204_p4, %s203_s18), 5 }
   0xf   : > { %s443_s23 = sshll.u32 %s610_s18, 2  ;;  %s444_s29 = sshll.u32 %s610_s18, 3 }
  0x10   : > { %s207_s28 = scalar_lea.vmem %s601_s0, %s443_s23  ;;  %467 = vmatpush3.bf16.msra.mxu0 %v500_v2  ;;  %s223_s7 = scalar_lea.vmem %s604_s3, %s444_s29 }
  0x11   : > { %v502_v4 = vld [vmem:[%s207_s28] sm:$0xff]   ;;  %468 = vmatprep.subr.bf16.mxu0 %v501_v3  ;;  %v503_v5 = vld [vmem:[%s207_s28 + $0x8] ss:$0 sps:$4 sm:$0xff]  }
  0x12   : > { %470 = vmatprep.mubr.msk.bf16.mxu0 %vm276_vm0, %v502_v4 }
  0x14   : > { %469 = vmatpush3.bf16.msra.mxu0 %v501_v3 }
  0x17   : > { %471 = vmatmul.mubr.msk.bf16.vlgmr.msra.gmra.mrb[0].mxu0 %vm276_vm0, %v503_v5 }
  0xea   : > { %v472_v7 = vpop.f32.mrb[0].mxu0 }
  0xeb   : > { %v317_v8 = vpop.f32.mrb[1].mxu0  ;;  %v326_v13 = vadd.f32 %v472_v7, %v445_v6 }
  0xec   : > { %v318_v9 = vadd.f32 %v445_v6, %v317_v8  ;;  %v473_v10 = vpop.f32.mrb[2].mxu0 }
  0xed   : > { %v320_v11 = vpop.f32.mrb[3].mxu0  ;;  %333 = vst.msk [vmem:[%s223_s7 + $0x10] sm:$0xff] %vm276_vm0, %v326_v13 }
  0xee   : > { %331 = vst.msk [vmem:[%s223_s7] sm:$0xff] %vm276_vm0, %v318_v9  ;;  %v321_v12 = vadd.f32 %v445_v6, %v320_v11 }
  0xf0   : > { %332 = vst.msk [vmem:[%s223_s7 + $0x8] sm:$0xff] %vm276_vm0, %v321_v12 }
  0xf1 PF: > { %s13_s14 = sadd.s32 1, %s526_s14   ;;  %s605_s12 = smov %s522_s13 }
  0xf2   : > { %p10_p5 = scmp.ge.s32.totalorder %s13_s14, 4   ;;  %s606_s13 = smov %s608_s15 }
  0xf4   :  { %12 = sbr.rel (!%p10_p5) target bundleno = 2 (0x2), region = 68 }

// kernel: autoformer_forward.18
= control target key start
LH: loop header
LB: loop body
LE: loop exit
PB: predicated region body
PF: predicated region fallthrough
CT: control target
= control target key end

     0   :  { %12 = vsyncpa [#allocation3], 0  ;;  %s1002_s0 = inlined_call_operand.vmem [shape: f32[24,24], index: 0, kind: input, shape index: {}]   ;;  %s1003_s1 = inlined_call_operand.vmem [shape: bf16[2,24,64], index: 1, kind: input, shape index: {}]   ;;  %s1004_s2 = inlined_call_operand.vmem [shape: bf16[64,64], index: 2, kind: input, shape index: {}]   ;;  %s1005_s3 = inlined_call_operand.vmem [shape: f32[1,64], index: 3, kind: input, shape index: {}]   ;;  %s1006_s4 = inlined_call_operand.vmem [shape: f32[2,24,64], index: 4, kind: input, shape index: {}]   ;;  %s1007_s5 = inlined_call_operand.vmem [shape: f32[2,24,64], index: 5, kind: output, shape index: {0}]   ;;  %s1008_s6 = inlined_call_operand.hbm [shape: f32[2,24,64], index: 6, kind: output, shape index: {1}]  }
   0x1   :  { %14 = vsyncpa [#allocation3 + $0x1], 0  ;;  %s841_s21 = smov 0   ;;  %s843_s22 = smov 0  }
   0x2   :  { %s845_s23 = smov 0   ;;  %s847_s24 = smov 0  }
   0x3 LB: > { %s862_s25 = sadd.s32 4294967295, %s798_s24   ;;  %s618_s26 = sadd.s32 4294967294, %s798_s24   ;;  %s798_s24 = sphi %s847_s24, %s1014_s24   ;;  %s794_s23 = sphi %s845_s23, %s1013_s23   ;;  %s790_s22 = sphi %s843_s22, %s1012_s22   ;;  %s786_s21 = sphi %s841_s21, %s1011_s21  }
   0x4   : > { %s866_s27 = sadd.s32 1, %s798_s24   ;;  %s168_s28 = sadd.s32 1, %s794_s23 }
   0x5   : > { %s165_s29 = ssub.s32 %s798_s24, %s866_s27  ;;  %p178_p0 = scmp.ne.s32.totalorder %s794_s23, %s790_s22 }
   0x6   : > { %p166_p1 = scmp.eq.s32.totalorder %s165_s29, 0  ;;  %p179_p2 = scmp.eq.s32.totalorder %s862_s25, 1 }
   0x7   : > { %p184_p3 = scmp.ne.s32.totalorder %s790_s22, %s786_s21  ;;  %p185_p4 = scmp.eq.s32.totalorder %s618_s26, 1 }
   0x8   : > { %s877_s30 = scalar_select %p166_p1, %s794_s23, %s168_s28  }
   0x9   : > { %p879_p5 = por %p179_p2, %p178_p0  ;;  %p883_p6 = por %p185_p4, %p184_p3 }
   0xa   : > { %p621_p7 = scmp.ge.s32.totalorder %s798_s24, 1  ;;  %p228_p8 = scmp.lt.s32.totalorder %s798_s24, 3 }
   0xc   : > { %p229_p9 = pnand %p621_p7, %p228_p8 }
   0xd   : > { %v730_v0 = vld [vmem:[%s1004_s2] sm:$0xff] (!%p229_p9)   ;;  %p268_p10 = scmp.lt.s32.totalorder (!%p229_p9), %s862_s25, 1  ;;  %v731_v1 = vld [vmem:[%s1004_s2 + $0x8] sm:$0xff] (!%p229_p9)   ;;  %v732_v2 = vld [vmem:[%s1004_s2 + $0x10] sm:$0xff] (!%p229_p9)   ;;  %vm334_vm0 = vcmask (!%p229_p9), 523264   ;;  %v800_v6 = vmov (!%p229_p9), 0.0|0.0  }
   0xe   : > { %232 = sbr.rel (%p229_p9) target bundleno = 491 (0x1eb), region = 40  ;;  %652 = vmatprep.subr.bf16.mxu0 (!%p229_p9), %v730_v0  ;;  %v733_v3 = vld [vmem:[%s1004_s2 + $0x18] sm:$0xff] (!%p229_p9)   ;;  %679 = vmatprep.subr.bf16.mxu1 (!%p229_p9), %v800_v6  ;;  %vm801_vm1 = vmmov (!%p229_p9), 0   ;;  %v802_v7 = vmov (!%p229_p9), 0.0   ;;  %v625_v8 = vld [vmem:[%s1005_s3] ss:$0 sm:$0xff] (!%p229_p9) }
   0xf   : > { %653 = vmatpush3.bf16.msra.mxu0 (!%p229_p9), %v730_v0  ;;  %670 = vmatprep.mubr.msk.f32.mxu1 (!%p229_p9), %vm801_vm1, %v802_v7  ;;  %v395_v23 = vld [vmem:[%s1002_s0] sm:$0xff] (!%p229_p9)  ;;  %vm398_vm2 = vcmask (!%p229_p9), 195584   ;;  %v396_v24 = vld [vmem:[%s1002_s0 + $0x8] sm:$0xff] (!%p229_p9)  ;;  %v397_v25 = vld [vmem:[%s1002_s0 + $0x10] sm:$0xff] (!%p229_p9)  ;;  %s265_s20 = sand.u32 (!%p229_p9), 1, %s790_s22   ;;  %s803_s17 = smov (!%p229_p9), [#allocation2]  }
  0x10   : > { %654 = vmatprep.subr.bf16.mxu0 (!%p229_p9), %v731_v1  ;;  %s682_s26 = smul.u32 (!%p229_p9), 24, %s265_s20  ;;  %s740_s18 = sshll.u32 (!%p229_p9), %s803_s17, 4  ;;  %s741_s18 = int_to_ptr.vmem [resolvable:$false] %s740_s18 }
  0x12   : > { %s267_s11 = scalar_lea.vmem (!%p229_p9), [#allocation2], %s682_s26 }
  0x13   : > { %655 = vmatpush3.bf16.msra.mxu0 (!%p229_p9), %v731_v1  ;;  %s519_s14 = sshll.u32 (!%p229_p9), %s267_s11, 4  ;;  %s948_s14 = int_to_ptr.vmem [resolvable:$true] %s519_s14 }
  0x14   : > { %656 = vmatprep.subr.bf16.mxu0 (!%p229_p9), %v732_v2  ;;  %p743_p0 = scmp.lt.s32.totalorder (!%p229_p9), %s948_s14, %s741_s18 }
  0x15   : > { %s897_s13 = scalar_select %p268_p10, %s862_s25, 1 }
  0x17   : > { %s683_s16 = smul.u32 12, %s897_s13  ;;  %657 = vmatpush3.bf16.msra.mxu0 %v732_v2 }
  0x18   : > { %658 = vmatprep.subr.bf16.mxu0 %v733_v3  ;;  %s684_s28 = smul.u32 24, %s897_s13 }
  0x19   : > { %s272_s19 = scalar_lea.vmem %s1003_s1, %s683_s16  ;;  %s736_s16 = scalar_lea.vmem %s948_s14, 384 }
  0x1a   : > { %v734_v4 = vld [vmem:[%s272_s19] sm:$0xff]   ;;  %v735_v5 = vld [vmem:[%s272_s19 + $0x8] ss:$0 sps:$4 sm:$0xff]   ;;  %s277_s12 = scalar_lea.vmem %s1006_s4, %s684_s28  ;;  %s941_s10 = scalar_lea.vmem %s1007_s5, %s684_s28 }
  0x1b   : > { %660 = vmatprep.mubr.msk.bf16.mxu0 %vm334_vm0, %v734_v4  ;;  %659 = vmatpush3.bf16.msra.mxu0 %v733_v3  ;;  %v389_v13 = vld [vmem:[%s277_s12] sm:$0xff]  ;;  %v390_v15 = vld [vmem:[%s277_s12 + $0x8] sm:$0xff]  ;;  %v391_v21 = vld [vmem:[%s277_s12 + $0x10] sm:$0xff]  ;;  %s685_s12 = smul.u32 384, %s862_s25  ;;  %s959_s25 = scalar_lea.sflag [#allocation3], %s265_s20 }
  0x1c   : > { %p737_p11 = scmp.ne.s32.totalorder %s948_s14, %s736_s16  ;;  %s742_s19 = scalar_lea.vmem %s741_s18, 768 }
  0x1d   : > { %s953_s15 = scalar_lea.hbm %s1008_s6, %s685_s12  ;;  %p744_p1 = scmp.lt.s32.totalorder %s742_s19, %s736_s16 }
  0x1e   : > { %661 = vmatmul.mubr.msk.bf16.vlgmr.msra.gmra.mrb[0].mxu0 %vm334_vm0, %v735_v5  ;;  %p738_p12 = pnand %p737_p11, %p879_p5 }
  0x1f   : > { %p745_p2 = por %p744_p1, %p743_p0 }
  0x20   : > { %p739_p13 = pneg %p738_p12 }
  0x22   : > { %p746_p3 = pnand %p745_p2, %p739_p13 }
  0xf1   : > { %v662_v9 = vpop.f32.mrb[0].mxu0 }
  0xf2   : > { %v375_v10 = vpop.f32.mrb[1].mxu0  ;;  %v384_v19 = vadd.f32 %v662_v9, %v625_v8 }
  0xf3   : > { %v376_v11 = vadd.f32 %v625_v8, %v375_v10  ;;  %v663_v12 = vpop.f32.mrb[2].mxu0 }
  0xf4   : > { %v378_v14 = vpop.f32.mrb[3].mxu0  ;;  %v921_v22 = vadd.f32 %v391_v21, %v384_v19 }
  0xf5   : > { %v379_v16 = vadd.f32 %v625_v8, %v378_v14  ;;  %v392_v17 = vadd.f32 %v389_v13, %v376_v11 }
  0xf7   : > { %v393_v18 = vadd.f32 %v390_v15, %v379_v16 }
  0xf9   : > { %v680_v20 = vpack.c.bf16 %v393_v18, %v392_v17 }
  0xfb   : > { %681 = vmatpush3.bf16.msra.mxu1 %v680_v20 }
  0xfc   : > { %668 = vmatprep.subr.mxu1 %v802_v7 }
  0xff   : > { %669 = vmatpush3.msra.mxu1 %v921_v22 }
 0x100   : > { %671 = vmatmul.mubr.msk.f32.vlgmr.msra.gmra.mrb[0].mxu1 %vm398_vm2, %v395_v23 }
 0x101   : > { %673 = vmatprep.mubr.msk.f32.mxu1 %vm801_vm1, %v802_v7 }
 0x104   : > { %674 = vmatmul.mubr.msk.f32.gmra.mrb[2].mxu1 %vm398_vm2, %v396_v24 }
 0x105   : > { %676 = vmatprep.mubr.msk.f32.mxu1 %vm801_vm1, %v802_v7 }
 0x108   : > { %677 = vmatmul.mubr.msk.f32.gmra.mrb[4].mxu1 %vm398_vm2, %v397_v25 }
 0x1d3   : > { %v474_v26 = vpop.f32.mrb[0].mxu1 }
 0x1d4   : > { %488 = vst.msk [vmem:[%s267_s11] sm:$0xff] %vm334_vm0, %v474_v26  ;;  %v491_v27 = vsub.f32 %v392_v17, %v474_v26  ;;  %v672_v28 = vpop.f32.mrb[1].mxu1 }
 0x1d6   : > { %494 = vst.msk [vmem:[%s941_s10] sm:$0xff] %vm334_vm0, %v491_v27 }
 0x1d7   : > { %v479_v29 = vpop.f32.mrb[2].mxu1 }
 0x1d8   : > { %489 = vst.msk [vmem:[%s267_s11 + $0x8] sm:$0xff] %vm334_vm0, %v479_v29  ;;  %v492_v30 = vsub.f32 %v393_v18, %v479_v29  ;;  %v675_v31 = vpop.f32.mrb[3].mxu1 }
 0x1da   : > { %495 = vst.msk [vmem:[%s941_s10 + $0x8] sm:$0xff] %vm334_vm0, %v492_v30 }
 0x1db   : > { %v484_v32 = vpop.f32.mrb[4].mxu1 }
 0x1dc   : > { %490 = vst.msk [vmem:[%s267_s11 + $0x10] sm:$0xff] %vm334_vm0, %v484_v32  ;;  %v493_v33 = vsub.f32 %v921_v22, %v484_v32  ;;  %v678_v34 = vpop.f32.mrb[5].mxu1 }
 0x1dd   : > { %749 = shalt.err (!%p746_p3)
}
 0x1de   : > { %s750_s20 = scalar_lea.hbm %s953_s15, 384  ;;  %s754_s9 = scalar_lea.hbm %s1008_s6, 768 }
 0x1df   : > { %p751_p4 = scmp.ne.s32.totalorder %s953_s15, %s750_s20  ;;  %p755_p9 = scmp.lt.u32.totalorder %s953_s15, %s1008_s6 }
 0x1e0   : > { %p756_p10 = scmp.lt.u32.totalorder %s754_s9, %s750_s20  ;;  %p758_p12 = scmp.lt.u32.totalorder %s750_s20, %s953_s15 }
 0x1e1   : > { %p752_p7 = pnand %p751_p4, %p879_p5 }
 0x1e2   : > { %p757_p11 = por %p756_p10, %p755_p9 }
 0x1e3   : > { %p753_p8 = pneg %p752_p7 }
 0x1e4   : > { %p759_p13 = por %p758_p12, %p757_p11 }
 0x1e6   : > { %p760_p0 = pnand %p759_p13, %p753_p8 }
 0x1e8   : > { %763 = shalt.err (!%p760_p0)
}
 0x1e9   : > { %s804_s13 = smov 128   ;;  %s805_s28 = smov 8   ;;  %496 = vst.msk [vmem:[%s941_s10 + $0x10] sm:$0xff] %vm334_vm0, %v493_v33 }
 0x1ea   : > { %686 = dma.vmem_to_hbm [thread:$0]  (%p879_p5), %s948_s14, 384, %s953_s15, %s959_s25, %s804_s13, %s804_s13, %s805_s28  }
 0x1eb PF: > { %p692_p1 = scmp.ge.s32.totalorder %s798_s24, 2  ;;  %s542_s16 = sand.u32 1, %s786_s21  }
 0x1ec   : > { %s543_s17 = scalar_lea.sflag [#allocation3], %s542_s16 }
 0x1ed   : > { %p689_p2 = pnand %p692_p1, %p883_p6 }
 0x1ef   : > { %781 = dma.done.wait (!%p689_p2), %s543_s17, 384  }
 0x1f0   : > { %783 = vsyncadd (!%p689_p2), %s543_s17, 4294966912  ;;  %p17_p3 = scmp.ge.s32.totalorder %s866_s27, 4   ;;  %s1011_s21 = smov %s790_s22 }
 0x1f1   : > { %s1012_s22 = smov %s794_s23  ;;  %s1013_s23 = smov %s877_s30 }
 0x1f2   : > { %s1014_s24 = smov %s866_s27  ;;  %19 = sbr.rel (!%p17_p3) target bundleno = 3 (0x3), region = 90 }
 0x1f9   :  { %548 = vsyncpa [#allocation3], 1 }
 0x1fa   :  { %550 = vsyncpa [#allocation3 + $0x1], 1 }

// kernel: autoformer_forward.23
= control target key start
LH: loop header
LB: loop body
LE: loop exit
PB: predicated region body
PF: predicated region fallthrough
CT: control target
= control target key end

     0   :  { %s344_s12 = smov 0   ;;  %s382_s0 = inlined_call_operand.vmem [shape: f32[2,16,64], index: 0, kind: input, shape index: {}]   ;;  %s383_s1 = inlined_call_operand.vmem [shape: f32[1,64], index: 1, kind: input, shape index: {}]   ;;  %s384_s2 = inlined_call_operand.vmem [shape: f32[1,64], index: 2, kind: input, shape index: {}]   ;;  %s385_s3 = inlined_call_operand.vmem [shape: f32[2,16,64], index: 3, kind: output, shape index: {}]  }
   0x1 LB: > { %s289_s13 = sadd.s32 4294967295, %s322_s12   ;;  %p293_p0 = scmp.ge.s32.totalorder %s322_s12, 1  ;;  %s322_s12 = sphi %s344_s12, %s13_s12  }
   0x2   : > { %p137_p1 = scmp.lt.s32.totalorder %s322_s12, 3 }
   0x4   : > { %p138_p2 = pnand %p293_p0, %p137_p1 }
   0x5   : > { %p161_p3 = scmp.lt.s32.totalorder (!%p138_p2), %s289_s13, 1  ;;  %vm173_vm0 = vcmask (!%p138_p2), 523264   ;;  %v298_v21 = vld [vmem:[%s383_s1] ss:$0 sm:$0xff] (!%p138_p2) }
   0x6   : > { %141 = sbr.rel (%p138_p2) target bundleno = 354 (0x162), region = 32  ;;  %v299_v25 = vld [vmem:[%s384_s2] ss:$0 sm:$0xff] (!%p138_p2) }
   0xd   : > { %s387_s13 = smov (!%p161_p3, %s289_s13), 1 }
   0xe   : > { %s302_s14 = sshll.u32 %s387_s13, 4 }
   0xf   : > { %s165_s17 = scalar_lea.vmem %s382_s0, %s302_s14  ;;  %s170_s24 = scalar_lea.vmem %s385_s3, %s302_s14 }
  0x10   : > { %v171_v0 = vld [vmem:[%s165_s17] sm:$0xff]  ;;  %v172_v1 = vld [vmem:[%s165_s17 + $0x8] sm:$0xff] }
  0x11   : > { %v174_v2 = vsel %vm173_vm0, %v171_v0, 0.0  ;;  %v177_v3 = vsel %vm173_vm0, %v172_v1, 0.0 }
  0x12   : > { %175 = vadd.xlane.f32.xlu0 %v174_v2 }
  0x16   : > { %178 = vadd.xlane.f32.xlu0 %v177_v3 }
  0x9f   : > { %v176_v4 = vpop.xlane.xlu0 %175 }
  0xa0   : > { %v181_v5 = vmul.f32 0.015625, %v176_v4 }
  0xa2   : > { %v183_v6 = vsub.f32 %v171_v0, %v181_v5 }
  0xa3   : > { %v179_v7 = vpop.xlane.xlu0 %178 }
  0xa4   : > { %v182_v8 = vmul.f32 0.015625, %v179_v7  ;;  %v185_v9 = vmul.f32 %v183_v6, %v183_v6 }
  0xa6   : > { %v184_v10 = vsub.f32 %v172_v1, %v182_v8  ;;  %v187_v11 = vsel %vm173_vm0, %v185_v9, 0.0 }
  0xa7   : > { %188 = vadd.xlane.f32.xlu1 %v187_v11 }
  0xa8   : > { %v186_v12 = vmul.f32 %v184_v10, %v184_v10 }
  0xaa   : > { %v190_v13 = vsel %vm173_vm0, %v186_v12, 0.0 }
  0xab   : > { %191 = vadd.xlane.f32.xlu1 %v190_v13 }
 0x134   : > { %v189_v14 = vpop.xlane.xlu1 %188 }
 0x135   : > { %v193_v15 = vmul.f32 0.015625, %v189_v14 }
 0x137   : > { %v195_v16 = vadd.f32 1e-05, %v193_v15 }
 0x138   : > { %v192_v17 = vpop.xlane.xlu1 %191 }
 0x139   : > { %312 = vrsqrt.f32 %v195_v16  ;;  %v194_v18 = vmul.f32 0.015625, %v192_v17 }
 0x13b   : > { %v196_v19 = vadd.f32 1e-05, %v194_v18 }
 0x13d   : > { %314 = vrsqrt.f32 %v196_v19 }
 0x143   : > { %v313_v20 = vpop.eup %312 }
 0x144   : > { %v199_v22 = vmul.f32 %v313_v20, %v183_v6 }
 0x146   : > { %v208_v23 = vmul.f32 %v298_v21, %v199_v22 }
 0x147   : > { %v315_v24 = vpop.eup %314 }
 0x148   : > { %v200_v26 = vmul.f32 %v315_v24, %v184_v10  ;;  %v217_v27 = vadd.f32 %v299_v25, %v208_v23 }
 0x14a   : > { %v209_v28 = vmul.f32 %v298_v21, %v200_v26  ;;  %v219_v30 = vsel %vm173_vm0, %v217_v27, 0.0 }
 0x14c   : > { %v218_v29 = vadd.f32 %v299_v25, %v209_v28 }
 0x14e   : > { %v220_v31 = vsel %vm173_vm0, %v218_v29, 0.0 }
 0x14f   : > { %v221_v32 = vadd.f32 %v220_v31, %v219_v30 }
 0x151   : > { %v222_v33 = vrot.slane %v221_v32, 4 }
 0x153   : > { %v223_v34 = vadd.f32 %v222_v33, %v221_v32 }
 0x155   : > { %v224_v35 = vrot.slane %v223_v34, 2 }
 0x157   : > { %v225_v36 = vadd.f32 %v224_v35, %v223_v34 }
 0x159   : > { %v226_v37 = vrot.slane %v225_v36, 1 }
 0x15b   : > { %v227_v38 = vadd.f32 %v226_v37, %v225_v36 }
 0x15d   : > { %v229_v39 = vmul.f32 0.0625, %v227_v38 }
 0x15f   : > { %v230_v40 = vsub.f32 %v217_v27, %v229_v39  ;;  %v231_v41 = vsub.f32 %v218_v29, %v229_v39 }
 0x161   : > { %232 = vst.msk [vmem:[%s170_s24] sm:$0xff] %vm173_vm0, %v230_v40  ;;  %233 = vst.msk [vmem:[%s170_s24 + $0x8] sm:$0xff] %vm173_vm0, %v231_v41 }
 0x162 PF: > { %s13_s12 = sadd.s32 1, %s322_s12  }
 0x163   : > { %p10_p4 = scmp.ge.s32.totalorder %s13_s12, 4  }
 0x165   :  { %12 = sbr.rel (!%p10_p4) target bundleno = 1 (0x1), region = 62 }

// kernel: autoformer_forward.21
= control target key start
LH: loop header
LB: loop body
LE: loop exit
PB: predicated region body
PF: predicated region fallthrough
CT: control target
= control target key end

     0   :  { %12 = vsyncpa [#allocation3], 0  ;;  %s948_s0 = inlined_call_operand.vmem [shape: f32[16,16], index: 0, kind: input, shape index: {}]   ;;  %s949_s1 = inlined_call_operand.vmem [shape: bf16[2,16,64], index: 1, kind: input, shape index: {}]   ;;  %s950_s2 = inlined_call_operand.vmem [shape: bf16[64,64], index: 2, kind: input, shape index: {}]   ;;  %s951_s3 = inlined_call_operand.vmem [shape: f32[1,64], index: 3, kind: input, shape index: {}]   ;;  %s952_s4 = inlined_call_operand.vmem [shape: f32[2,16,64], index: 4, kind: input, shape index: {}]   ;;  %s953_s5 = inlined_call_operand.vmem [shape: f32[2,16,64], index: 5, kind: output, shape index: {0}]   ;;  %s954_s6 = inlined_call_operand.hbm [shape: f32[2,16,64], index: 6, kind: output, shape index: {1}]  }
   0x1   :  { %14 = vsyncpa [#allocation3 + $0x1], 0  ;;  %s803_s21 = smov 0   ;;  %s805_s22 = smov 0  }
   0x2   :  { %s807_s23 = smov 0   ;;  %s809_s24 = smov 0  }
   0x3 LB: > { %s824_s25 = sadd.s32 4294967295, %s761_s24   ;;  %s590_s26 = sadd.s32 4294967294, %s761_s24   ;;  %s761_s24 = sphi %s809_s24, %s960_s24   ;;  %s757_s23 = sphi %s807_s23, %s959_s23   ;;  %s753_s22 = sphi %s805_s22, %s958_s22   ;;  %s749_s21 = sphi %s803_s21, %s957_s21  }
   0x4   : > { %s828_s27 = sadd.s32 1, %s761_s24   ;;  %s168_s28 = sadd.s32 1, %s757_s23 }
   0x5   : > { %s165_s29 = ssub.s32 %s761_s24, %s828_s27  ;;  %p178_p0 = scmp.ne.s32.totalorder %s757_s23, %s753_s22 }
   0x6   : > { %p166_p1 = scmp.eq.s32.totalorder %s165_s29, 0  ;;  %p179_p2 = scmp.eq.s32.totalorder %s824_s25, 1 }
   0x7   : > { %p184_p3 = scmp.ne.s32.totalorder %s753_s22, %s749_s21  ;;  %p185_p4 = scmp.eq.s32.totalorder %s590_s26, 1 }
   0x8   : > { %s839_s30 = scalar_select %p166_p1, %s757_s23, %s168_s28  }
   0x9   : > { %p841_p5 = por %p179_p2, %p178_p0  ;;  %p845_p6 = por %p185_p4, %p184_p3 }
   0xa   : > { %p593_p7 = scmp.ge.s32.totalorder %s761_s24, 1  ;;  %p228_p8 = scmp.lt.s32.totalorder %s761_s24, 3 }
   0xc   : > { %p229_p9 = pnand %p593_p7, %p228_p8 }
   0xd   : > { %v694_v0 = vld [vmem:[%s950_s2] sm:$0xff] (!%p229_p9)   ;;  %v763_v1 = vmov (!%p229_p9), 0.0   ;;  %v695_v2 = vld [vmem:[%s950_s2 + $0x8] sm:$0xff] (!%p229_p9)   ;;  %vm764_vm0 = vmmov (!%p229_p9), 0   ;;  %p268_p10 = scmp.lt.s32.totalorder (!%p229_p9), %s824_s25, 1  ;;  %v696_v3 = vld [vmem:[%s950_s2 + $0x10] sm:$0xff] (!%p229_p9)  }
   0xe   : > { %232 = sbr.rel (%p229_p9) target bundleno = 483 (0x1e3), region = 40  ;;  %628 = vmatprep.subr.bf16.mxu0 (!%p229_p9), %v763_v1  ;;  %636 = vmatprep.mubr.msk.bf16.mxu0 (!%p229_p9), %vm764_vm0, %v763_v1  ;;  %v697_v4 = vld [vmem:[%s950_s2 + $0x18] sm:$0xff] (!%p229_p9)   ;;  %vm330_vm1 = vcmask (!%p229_p9), 523264   ;;  %v379_v6 = vld [vmem:[%s948_s0] sm:$0xff] (!%p229_p9)  ;;  %vm381_vm2 = vcmask (!%p229_p9), 130048   ;;  %v380_v19 = vld [vmem:[%s948_s0 + $0x8] sm:$0xff] (!%p229_p9) }
   0xf   : > { %629 = vmatpush3.bf16.msra.mxu0 (!%p229_p9), %v694_v0  ;;  %644 = vmatprep.mubr.msk.f32.mxu1 (!%p229_p9), %vm381_vm2, %v379_v6  ;;  %v601_v7 = vld [vmem:[%s951_s3] ss:$0 sm:$0xff] (!%p229_p9)  ;;  %s265_s17 = sand.u32 (!%p229_p9), 1, %s753_s22   ;;  %s618_s26 = sshll.u32 (!%p229_p9), %s824_s25, 8 }
  0x10   : > { %630 = vmatprep.subr.bf16.mxu0 (!%p229_p9), %v763_v1  ;;  %s594_s18 = sshll.u32 (!%p229_p9), %s265_s17, 4  ;;  %s899_s14 = scalar_lea.hbm (!%p229_p9), %s954_s6, %s618_s26 }
  0x11   : > { %s765_s15 = smov (!%p229_p9), [#allocation2]  }
  0x13   : > { %631 = vmatpush3.bf16.msra.mxu0 (!%p229_p9), %v695_v2 }
  0x14   : > { %632 = vmatprep.subr.bf16.mxu0 (!%p229_p9), %v763_v1 }
  0x15   : > { %s859_s13 = scalar_select %p268_p10, %s824_s25, 1 }
  0x16   : > { %s905_s25 = scalar_lea.sflag [#allocation3], %s265_s17 }
  0x17   : > { %s615_s16 = sshll.u32 %s859_s13, 3  ;;  %633 = vmatpush3.bf16.msra.mxu0 %v696_v3  ;;  %s616_s9 = sshll.u32 %s859_s13, 4 }
  0x18   : > { %s272_s19 = scalar_lea.vmem %s949_s1, %s615_s16  ;;  %634 = vmatprep.subr.bf16.mxu0 %v763_v1  ;;  %s277_s12 = scalar_lea.vmem %s952_s4, %s616_s9 }
  0x19   : > { %v698_v5 = vld [vmem:[%s272_s19] sm:$0xff]   ;;  %v376_v13 = vld [vmem:[%s277_s12 + $0x8] sm:$0xff]  ;;  %s267_s19 = scalar_lea.vmem [#allocation2], %s594_s18  ;;  %s892_s10 = scalar_lea.vmem %s953_s5, %s616_s9 }
  0x1a   : > { %v375_v9 = vld [vmem:[%s277_s12] sm:$0xff]  ;;  %s491_s20 = sshll.u32 %s267_s19, 4  ;;  %s703_s13 = sshll.u32 %s765_s15, 4  ;;  %s894_s20 = int_to_ptr.vmem [resolvable:$true] %s491_s20  ;;  %s704_s13 = int_to_ptr.vmem [resolvable:$false] %s703_s13 }
  0x1b   : > { %635 = vmatpush3.bf16.msra.mxu0 %v697_v4  ;;  %s699_s9 = scalar_lea.vmem %s894_s20, 256  ;;  %s705_s16 = scalar_lea.vmem %s704_s13, 512 }
  0x1c   : > { %p700_p11 = scmp.ne.s32.totalorder %s894_s20, %s699_s9  ;;  %p706_p0 = scmp.lt.s32.totalorder %s894_s20, %s704_s13 }
  0x1d   : > { %p707_p1 = scmp.lt.s32.totalorder %s705_s16, %s699_s9 }
  0x1e   : > { %637 = vmatmul.mubr.msk.bf16.vlgmr.msra.gmra.mrb[0].mxu0 %vm330_vm1, %v698_v5  ;;  %p701_p12 = pnand %p700_p11, %p841_p5 }
  0x1f   : > { %p708_p2 = por %p707_p1, %p706_p0 }
  0x20   : > { %p702_p13 = pneg %p701_p12 }
  0x22   : > { %p709_p3 = pnand %p708_p2, %p702_p13 }
  0xf1   : > { %v368_v8 = vpop.f32.mrb[0].mxu0 }
  0xf2   : > { %v369_v10 = vadd.f32 %v601_v7, %v368_v8  ;;  %v638_v11 = vpop.f32.mrb[1].mxu0 }
  0xf3   : > { %v371_v12 = vpop.f32.mrb[2].mxu0 }
  0xf4   : > { %v377_v14 = vadd.f32 %v375_v9, %v369_v10  ;;  %v372_v15 = vadd.f32 %v601_v7, %v371_v12  ;;  %v639_v16 = vpop.f32.mrb[3].mxu0 }
  0xf6   : > { %v378_v17 = vadd.f32 %v376_v13, %v372_v15 }
  0xf8   : > { %v647_v18 = vpack.c.bf16 %v378_v17, %v377_v14 }
  0xfa   : > { %648 = vmatprep.subr.bf16.mxu1 %v647_v18 }
  0xfb   : > { %650 = vmatpush3.bf16.msra.mxu1 %v647_v18 }
  0xfe   : > { %645 = vmatmul.mubr.msk.f32.vlgmr.msra.gmra.mrb[0].mxu1 %vm381_vm2, %v380_v19 }
 0x1d1   : > { %v646_v20 = vpop.f32.mrb[0].mxu1 }
 0x1d2   : > { %464 = vst.msk [vmem:[%s267_s19 + $0x8] sm:$0xff] %vm330_vm1, %v646_v20  ;;  %v466_v21 = vsub.f32 %v378_v17, %v646_v20  ;;  %v454_v22 = vpop.f32.mrb[1].mxu1 }
 0x1d3   : > { %463 = vst.msk [vmem:[%s267_s19] sm:$0xff] %vm330_vm1, %v454_v22  ;;  %v465_v23 = vsub.f32 %v377_v14, %v454_v22 }
 0x1d4   : > { %468 = vst.msk [vmem:[%s892_s10 + $0x8] sm:$0xff] %vm330_vm1, %v466_v21 }
 0x1d5   : > { %712 = shalt.err (!%p709_p3)
}
 0x1d6   : > { %s713_s17 = scalar_lea.hbm %s899_s14, 256  ;;  %s717_s26 = scalar_lea.hbm %s954_s6, 512 }
 0x1d7   : > { %p714_p4 = scmp.ne.s32.totalorder %s899_s14, %s713_s17  ;;  %p718_p9 = scmp.lt.u32.totalorder %s899_s14, %s954_s6 }
 0x1d8   : > { %p719_p10 = scmp.lt.u32.totalorder %s717_s26, %s713_s17  ;;  %p721_p12 = scmp.lt.u32.totalorder %s713_s17, %s899_s14 }
 0x1d9   : > { %p715_p7 = pnand %p714_p4, %p841_p5 }
 0x1da   : > { %p720_p11 = por %p719_p10, %p718_p9 }
 0x1db   : > { %p716_p8 = pneg %p715_p7 }
 0x1dc   : > { %p722_p13 = por %p721_p12, %p720_p11 }
 0x1de   : > { %p723_p0 = pnand %p722_p13, %p716_p8 }
 0x1e0   : > { %726 = shalt.err (!%p723_p0)
}
 0x1e1   : > { %s766_s11 = smov 128   ;;  %s767_s12 = smov 8   ;;  %467 = vst.msk [vmem:[%s892_s10] sm:$0xff] %vm330_vm1, %v465_v23 }
 0x1e2   : > { %651 = dma.vmem_to_hbm [thread:$0]  (%p841_p5), %s894_s20, 256, %s899_s14, %s905_s25, %s766_s11, %s766_s11, %s767_s12  }
 0x1e3 PF: > { %p657_p1 = scmp.ge.s32.totalorder %s761_s24, 2  ;;  %s514_s9 = sand.u32 1, %s749_s21  }
 0x1e4   : > { %s515_s15 = scalar_lea.sflag [#allocation3], %s514_s9 }
 0x1e5   : > { %p654_p2 = pnand %p657_p1, %p845_p6 }
 0x1e7   : > { %744 = dma.done.wait (!%p654_p2), %s515_s15, 256  }
 0x1e8   : > { %746 = vsyncadd (!%p654_p2), %s515_s15, 4294967040  ;;  %p17_p3 = scmp.ge.s32.totalorder %s828_s27, 4   ;;  %s957_s21 = smov %s753_s22 }
 0x1e9   : > { %s958_s22 = smov %s757_s23  ;;  %s959_s23 = smov %s839_s30 }
 0x1ea   : > { %s960_s24 = smov %s828_s27  ;;  %19 = sbr.rel (!%p17_p3) target bundleno = 3 (0x3), region = 90 }
 0x1f1   :  { %520 = vsyncpa [#allocation3], 1 }
 0x1f2   :  { %522 = vsyncpa [#allocation3 + $0x1], 1 }

// kernel: autoformer_forward.22
= control target key start
LH: loop header
LB: loop body
LE: loop exit
PB: predicated region body
PF: predicated region fallthrough
CT: control target
= control target key end

     0   :  { %11 = vsyncpa [#allocation3], 0  ;;  %s966_s0 = inlined_call_operand.vmem [shape: f32[16,16], index: 0, kind: input, shape index: {}]   ;;  %s967_s1 = inlined_call_operand.vmem [shape: f32[2,16,64], index: 1, kind: input, shape index: {}]   ;;  %s968_s2 = inlined_call_operand.vmem [shape: bf16[64,32], index: 2, kind: input, shape index: {}]   ;;  %s969_s3 = inlined_call_operand.vmem [shape: bf16[32,64], index: 3, kind: input, shape index: {}]   ;;  %s970_s4 = inlined_call_operand.vmem [shape: f32[2,16,64], index: 4, kind: output, shape index: {0}]   ;;  %s971_s5 = inlined_call_operand.hbm [shape: f32[2,16,64], index: 5, kind: output, shape index: {1}]  }
   0x1   :  { %13 = vsyncpa [#allocation3 + $0x1], 0  ;;  %s820_s18 = smov 0   ;;  %s822_s19 = smov 0  }
   0x2   :  { %s824_s20 = smov 0   ;;  %s826_s21 = smov 0  }
   0x3 LB: > { %s841_s22 = sadd.s32 4294967295, %s783_s21   ;;  %s598_s23 = sadd.s32 4294967294, %s783_s21   ;;  %s783_s21 = sphi %s826_s21, %s977_s21   ;;  %s779_s20 = sphi %s824_s20, %s976_s20   ;;  %s775_s19 = sphi %s822_s19, %s975_s19   ;;  %s771_s18 = sphi %s820_s18, %s974_s18  }
   0x4   : > { %s845_s24 = sadd.s32 1, %s783_s21   ;;  %s141_s25 = sadd.s32 1, %s779_s20 }
   0x5   : > { %s138_s26 = ssub.s32 %s783_s21, %s845_s24  ;;  %p151_p0 = scmp.ne.s32.totalorder %s779_s20, %s775_s19 }
   0x6   : > { %p139_p1 = scmp.eq.s32.totalorder %s138_s26, 0  ;;  %p152_p2 = scmp.eq.s32.totalorder %s841_s22, 1 }
   0x7   : > { %p157_p3 = scmp.ne.s32.totalorder %s775_s19, %s771_s18  ;;  %p158_p4 = scmp.eq.s32.totalorder %s598_s23, 1 }
   0x8   : > { %s856_s27 = scalar_select %p139_p1, %s779_s20, %s141_s25  }
   0x9   : > { %p858_p5 = por %p152_p2, %p151_p0  ;;  %p862_p6 = por %p158_p4, %p157_p3 }
   0xa   : > { %p601_p7 = scmp.ge.s32.totalorder %s783_s21, 1  ;;  %p193_p8 = scmp.lt.s32.totalorder %s783_s21, 3 }
   0xc   : > { %p194_p9 = pnand %p601_p7, %p193_p8 }
   0xd   : > { %v711_v0 = vld [vmem:[%s968_s2] sm:$0xff] (!%p194_p9)   ;;  %v785_v1 = vmov (!%p194_p9), 0.0   ;;  %v712_v2 = vld [vmem:[%s968_s2 + $0x8] sm:$0xff] (!%p194_p9)   ;;  %vm786_vm0 = vmmov (!%p194_p9), 0   ;;  %p226_p10 = scmp.lt.s32.totalorder (!%p194_p9), %s841_s22, 1  ;;  %v713_v3 = vld [vmem:[%s968_s2 + $0x10] sm:$0xff] (!%p194_p9)  }
   0xe   : > { %197 = sbr.rel (%p194_p9) target bundleno = 722 (0x2d2), region = 36  ;;  %637 = vmatprep.subr.bf16.mxu0 (!%p194_p9), %v785_v1  ;;  %649 = vmatprep.subr.bf16.mxu1 (!%p194_p9), %v785_v1  ;;  %v714_v4 = vld [vmem:[%s968_s2 + $0x18] sm:$0xff] (!%p194_p9)   ;;  %vm272_vm1 = vcmask (!%p194_p9), 523264   ;;  %v715_v8 = vld [vmem:[%s969_s3] sm:$0xff] (!%p194_p9)   ;;  %v716_v9 = vld [vmem:[%s969_s3 + $0x8] sm:$0xff] (!%p194_p9)   ;;  %vm352_vm2 = vcmask (!%p194_p9), 261120  }
   0xf   : > { %638 = vmatpush3.bf16.msra.mxu0 (!%p194_p9), %v711_v0  ;;  %645 = vmatprep.mubr.msk.bf16.mxu0 (!%p194_p9), %vm786_vm0, %v785_v1  ;;  %v399_v33 = vld [vmem:[%s966_s0] sm:$0xff] (!%p194_p9)  ;;  %vm401_vm3 = vcmask (!%p194_p9), 130048   ;;  %v400_v41 = vld [vmem:[%s966_s0 + $0x8] sm:$0xff] (!%p194_p9)  ;;  %s223_s11 = sand.u32 (!%p194_p9), 1, %s775_s19   ;;  %s624_s16 = sshll.u32 (!%p194_p9), %s841_s22, 8 }
  0x10   : > { %639 = vmatprep.subr.bf16.mxu0 (!%p194_p9), %v785_v1  ;;  %653 = vmatprep.mubr.msk.bf16.mxu1 (!%p194_p9), %vm786_vm0, %v785_v1  ;;  %s602_s13 = sshll.u32 (!%p194_p9), %s223_s11, 4  ;;  %s917_s6 = scalar_lea.hbm (!%p194_p9), %s971_s5, %s624_s16 }
  0x11   : > { %650 = vmatpush3.bf16.msra.mxu1 (!%p194_p9), %v715_v8  ;;  %s225_s14 = scalar_lea.vmem (!%p194_p9), [#allocation2], %s602_s13 }
  0x12   : > { %651 = vmatprep.subr.bf16.mxu1 (!%p194_p9), %v785_v1 }
  0x13   : > { %640 = vmatpush3.bf16.msra.mxu0 (!%p194_p9), %v712_v2 }
  0x14   : > { %641 = vmatprep.subr.bf16.mxu0 (!%p194_p9), %v785_v1 }
  0x15   : > { %s876_s9 = scalar_select %p226_p10, %s841_s22, 1  ;;  %652 = vmatpush3.bf16.msra.mxu1 %v716_v9 }
  0x16   : > { %s923_s22 = scalar_lea.sflag [#allocation3], %s223_s11 }
  0x17   : > { %s622_s12 = sshll.u32 %s876_s9, 4  ;;  %642 = vmatpush3.bf16.msra.mxu0 %v713_v3 }
  0x18   : > { %s230_s15 = scalar_lea.vmem %s967_s1, %s622_s12  ;;  %643 = vmatprep.subr.bf16.mxu0 %v785_v1  ;;  %s910_s25 = scalar_lea.vmem %s970_s4, %s622_s12 }
  0x19   : > { %v237_v5 = vld [vmem:[%s230_s15] sm:$0xff]  ;;  %v238_v6 = vld [vmem:[%s230_s15 + $0x8] sm:$0xff]  ;;  %s511_s15 = sshll.u32 %s225_s14, 4  ;;  %s787_s12 = smov [#allocation2]   ;;  %s912_s15 = int_to_ptr.vmem [resolvable:$true] %s511_s15 }
  0x1a   : > { %v239_v7 = vpack.c.bf16 %v238_v6, %v237_v5  ;;  %s721_s9 = scalar_lea.vmem %s912_s15, 256  ;;  %s725_s7 = sshll.u32 %s787_s12, 4  ;;  %s726_s7 = int_to_ptr.vmem [resolvable:$false] %s725_s7 }
  0x1b   : > { %644 = vmatpush3.bf16.msra.mxu0 %v714_v4  ;;  %p722_p11 = scmp.ne.s32.totalorder %s912_s15, %s721_s9  ;;  %s727_s8 = scalar_lea.vmem %s726_s7, 512 }
  0x1c   : > { %p728_p0 = scmp.lt.s32.totalorder %s912_s15, %s726_s7  ;;  %p729_p1 = scmp.lt.s32.totalorder %s727_s8, %s721_s9 }
  0x1d   : > { %p723_p12 = pnand %p722_p11, %p858_p5 }
  0x1e   : > { %646 = vmatmul.mubr.msk.bf16.vlgmr.msra.gmra.mrb[0].mxu0 %vm272_vm1, %v239_v7  ;;  %p730_p2 = por %p729_p1, %p728_p0 }
  0x1f   : > { %p724_p13 = pneg %p723_p12 }
  0x21   : > { %p731_p3 = pnand %p730_p2, %p724_p13 }
  0xf1   : > { %v310_v10 = vpop.f32.mrb[0].mxu0 }
  0xf2   : > { %v319_v11 = vmul.f32 0.044715, %v310_v10  ;;  %v647_v12 = vpop.f32.mrb[1].mxu0  ;;  %v317_v27 = vmul.f32 0.5, %v310_v10 }
  0xf3   : > { %v313_v13 = vpop.f32.mrb[2].mxu0 }
  0xf4   : > { %v321_v14 = vmul.f32 %v319_v11, %v310_v10  ;;  %v320_v15 = vmul.f32 0.044715, %v313_v13  ;;  %v648_v16 = vpop.f32.mrb[3].mxu0  ;;  %v318_v28 = vmul.f32 0.5, %v313_v13 }
  0xf6   : > { %v323_v17 = vmul.f32 %v321_v14, %v310_v10  ;;  %v322_v18 = vmul.f32 %v320_v15, %v313_v13 }
  0xf8   : > { %v325_v19 = vadd.f32 %v323_v17, %v310_v10  ;;  %v324_v20 = vmul.f32 %v322_v18, %v313_v13 }
  0xfa   : > { %v327_v21 = vmul.f32 0.7978846, %v325_v19  ;;  %v326_v22 = vadd.f32 %v324_v20, %v313_v13 }
  0xfc   : > { %717 = vtanh.f32 %v327_v21  ;;  %v328_v23 = vmul.f32 0.7978846, %v326_v22 }
  0xfe   : > { %719 = vtanh.f32 %v328_v23 }
 0x106   : > { %v718_v24 = vpop.eup %717 }
 0x107   : > { %v331_v25 = vadd.f32 1.0, %v718_v24 }
 0x108   : > { %v720_v26 = vpop.eup %719 }
 0x109   : > { %v332_v29 = vadd.f32 1.0, %v720_v26  ;;  %v333_v30 = vmul.f32 %v331_v25, %v317_v27 }
 0x10b   : > { %v334_v31 = vmul.f32 %v332_v29, %v318_v28 }
 0x10d   : > { %v335_v32 = vpack.c.bf16 %v334_v31, %v333_v30 }
 0x10f   : > { %654 = vmatmul.mubr.msk.bf16.vlgmr.msra.gmra.mrb[0].mxu1 %vm352_vm2, %v335_v32 }
 0x110   : > { %661 = vmatprep.mubr.msk.f32.mxu1 %vm401_vm3, %v399_v33 }
 0x1e2   : > { %v390_v34 = vpop.f32.mrb[0].mxu1 }
 0x1e3   : > { %v655_v35 = vpop.f32.mrb[1].mxu1  ;;  %v397_v37 = vadd.f32 %v390_v34, %v237_v5 }
 0x1e4   : > { %v393_v36 = vpop.f32.mrb[2].mxu1 }
 0x1e5   : > { %v398_v38 = vadd.f32 %v393_v36, %v238_v6  ;;  %v656_v39 = vpop.f32.mrb[3].mxu1 }
 0x1e7   : > { %v664_v40 = vpack.c.bf16 %v398_v38, %v397_v37 }
 0x1e9   : > { %665 = vmatprep.subr.bf16.mxu1 %v664_v40 }
 0x1ea   : > { %667 = vmatpush3.bf16.msra.mxu1 %v664_v40 }
 0x1ed   : > { %662 = vmatmul.mubr.msk.f32.vlgmr.msra.gmra.mrb[4].mxu1 %vm401_vm3, %v400_v41 }
 0x2c0   : > { %v663_v42 = vpop.f32.mrb[4].mxu1 }
 0x2c1   : > { %484 = vst.msk [vmem:[%s225_s14 + $0x8] sm:$0xff] %vm272_vm1, %v663_v42  ;;  %v486_v43 = vsub.f32 %v398_v38, %v663_v42  ;;  %v474_v44 = vpop.f32.mrb[5].mxu1 }
 0x2c2   : > { %483 = vst.msk [vmem:[%s225_s14] sm:$0xff] %vm272_vm1, %v474_v44  ;;  %v485_v45 = vsub.f32 %v397_v37, %v474_v44 }
 0x2c3   : > { %488 = vst.msk [vmem:[%s910_s25 + $0x8] sm:$0xff] %vm272_vm1, %v486_v43 }
 0x2c4   : > { %734 = shalt.err (!%p731_p3)
}
 0x2c5   : > { %s735_s10 = scalar_lea.hbm %s917_s6, 256  ;;  %s739_s14 = scalar_lea.hbm %s971_s5, 512 }
 0x2c6   : > { %p736_p4 = scmp.ne.s32.totalorder %s917_s6, %s735_s10  ;;  %p740_p9 = scmp.lt.u32.totalorder %s917_s6, %s971_s5 }
 0x2c7   : > { %p741_p10 = scmp.lt.u32.totalorder %s739_s14, %s735_s10  ;;  %p743_p12 = scmp.lt.u32.totalorder %s735_s10, %s917_s6 }
 0x2c8   : > { %p737_p7 = pnand %p736_p4, %p858_p5 }
 0x2c9   : > { %p742_p11 = por %p741_p10, %p740_p9 }
 0x2ca   : > { %p738_p8 = pneg %p737_p7 }
 0x2cb   : > { %p744_p13 = por %p743_p12, %p742_p11 }
 0x2cd   : > { %p745_p0 = pnand %p744_p13, %p738_p8 }
 0x2cf   : > { %748 = shalt.err (!%p745_p0)
}
 0x2d0   : > { %s788_s23 = smov 128   ;;  %s789_s26 = smov 8   ;;  %487 = vst.msk [vmem:[%s910_s25] sm:$0xff] %vm272_vm1, %v485_v45 }
 0x2d1   : > { %668 = dma.vmem_to_hbm [thread:$0]  (%p858_p5), %s912_s15, 256, %s917_s6, %s923_s22, %s788_s23, %s788_s23, %s789_s26  }
 0x2d2 PF: > { %p674_p1 = scmp.ge.s32.totalorder %s783_s21, 2  ;;  %s534_s30 = sand.u32 1, %s771_s18  }
 0x2d3   : > { %s535_s9 = scalar_lea.sflag [#allocation3], %s534_s30 }
 0x2d4   : > { %p671_p2 = pnand %p674_p1, %p862_p6 }
 0x2d6   : > { %766 = dma.done.wait (!%p671_p2), %s535_s9, 256  }
 0x2d7   : > { %768 = vsyncadd (!%p671_p2), %s535_s9, 4294967040  ;;  %p16_p3 = scmp.ge.s32.totalorder %s845_s24, 4   ;;  %s974_s18 = smov %s775_s19 }
 0x2d8   : > { %s975_s19 = smov %s779_s20  ;;  %s976_s20 = smov %s856_s27 }
 0x2d9   : > { %s977_s21 = smov %s845_s24  ;;  %18 = sbr.rel (!%p16_p3) target bundleno = 3 (0x3), region = 83 }
 0x2e0   :  { %540 = vsyncpa [#allocation3], 1 }
 0x2e1   :  { %542 = vsyncpa [#allocation3 + $0x1], 1 }

// kernel: autoformer_forward.24
= control target key start
LH: loop header
LB: loop body
LE: loop exit
PB: predicated region body
PF: predicated region fallthrough
CT: control target
= control target key end

     0   :  { %s535_s12 = smov 0   ;;  %s537_s13 = smov 0   ;;  %s583_s0 = inlined_call_operand.vmem [shape: bf16[32,64], index: 0, kind: input, shape index: {}]   ;;  %s584_s1 = inlined_call_operand.vmem [shape: bf16[64,128], index: 1, kind: input, shape index: {}]   ;;  %s585_s2 = inlined_call_operand.vmem [shape: f32[1,128], index: 2, kind: input, shape index: {}]   ;;  %s586_s3 = inlined_call_operand.vmem [shape: f32[32,128], index: 3, kind: output, shape index: {}]  }
   0x1   :  { %s539_s14 = smov 0  }
   0x2 LB: > { %s25_s15 = sadd.s32 1, %s507_s13  ;;  %p427_p0 = scmp.ge.s32.totalorder %s511_s14, 1  ;;  %s511_s14 = sphi %s539_s14, %s13_s14   ;;  %s507_s13 = sphi %s537_s13, %s588_s13   ;;  %s503_s12 = sphi %s535_s12, %s587_s12  }
   0x3   : > { %p27_p1 = scmp.ge.s32.totalorder %s25_s15, 2  ;;  %p169_p2 = scmp.lt.s32.totalorder %s511_s14, 3 }
   0x5   : > { %s590_s15 = smov (%p27_p1, %s25_s15), 0  ;;  %p170_p3 = pnand %p427_p0, %p169_p2 }
   0x6   : > { %v484_v0 = vld [vmem:[%s584_s1] sm:$0xff] (!%p170_p3)   ;;  %v513_v1 = vmov (!%p170_p3), 0.0   ;;  %v485_v2 = vld [vmem:[%s584_s1 + $0x8] sm:$0xff] (!%p170_p3)   ;;  %vm514_vm0 = vmmov (!%p170_p3), 0   ;;  %s428_s20 = sshll.u32 (!%p170_p3), %s503_s12, 1  ;;  %v486_v3 = vld [vmem:[%s584_s1 + $0x10] sm:$0xff] (!%p170_p3)  }
   0x7   : > { %173 = sbr.rel (%p170_p3) target bundleno = 240 (0xf0), region = 32  ;;  %446 = vmatprep.subr.bf16.mxu0 (!%p170_p3), %v513_v1  ;;  %454 = vmatprep.mubr.msk.bf16.mxu0 (!%p170_p3), %vm514_vm0, %v513_v1  ;;  %p204_p4 = scmp.lt.s32.totalorder (!%p170_p3), %s428_s20, 3  ;;  %v487_v4 = vld [vmem:[%s584_s1 + $0x18] sm:$0xff] (!%p170_p3)   ;;  %vm272_vm1 = vcmask (!%p170_p3), 523264   ;;  %v432_v6 = vld [vmem:[%s585_s2] ss:$0 sm:$0xff] (!%p170_p3) }
   0x8   : > { %447 = vmatpush3.bf16.msra.mxu0 (!%p170_p3), %v484_v0 }
   0x9   : > { %448 = vmatprep.subr.bf16.mxu0 (!%p170_p3), %v513_v1 }
   0xc   : > { %449 = vmatpush3.bf16.msra.mxu0 (!%p170_p3), %v485_v2 }
   0xd   : > { %450 = vmatprep.subr.bf16.mxu0 (!%p170_p3), %v513_v1 }
   0xe   : > { %s592_s20 = smov (!%p204_p4, %s428_s20), 3 }
   0xf   : > { %s429_s23 = sshll.u32 %s592_s20, 2  ;;  %s431_s29 = sshll.u32 %s592_s20, 3 }
  0x10   : > { %s207_s26 = scalar_lea.vmem %s583_s0, %s429_s23  ;;  %451 = vmatpush3.bf16.msra.mxu0 %v486_v3  ;;  %s223_s7 = scalar_lea.vmem %s586_s3, %s431_s29 }
  0x11   : > { %452 = vmatprep.subr.bf16.mxu0 %v513_v1  ;;  %v488_v5 = vld [vmem:[%s207_s26] sm:$0xff]  }
  0x14   : > { %453 = vmatpush3.bf16.msra.mxu0 %v487_v4 }
  0x17   : > { %455 = vmatmul.mubr.msk.bf16.vlgmr.msra.gmra.mrb[0].mxu0 %vm272_vm1, %v488_v5 }
  0xea   : > { %v310_v7 = vpop.f32.mrb[0].mxu0 }
  0xeb   : > { %v311_v8 = vadd.f32 %v432_v6, %v310_v7  ;;  %v456_v9 = vpop.f32.mrb[1].mxu0 }
  0xec   : > { %v313_v10 = vpop.f32.mrb[2].mxu0 }
  0xed   : > { %317 = vst [vmem:[%s223_s7] sm:$0xff] %v311_v8  ;;  %v314_v11 = vadd.f32 %v432_v6, %v313_v10  ;;  %v457_v12 = vpop.f32.mrb[3].mxu0 }
  0xef   : > { %318 = vst [vmem:[%s223_s7 + $0x8] sm:$0xff] %v314_v11 }
  0xf0 PF: > { %s13_s14 = sadd.s32 1, %s511_s14   ;;  %s587_s12 = smov %s507_s13 }
  0xf1   : > { %p10_p5 = scmp.ge.s32.totalorder %s13_s14, 4   ;;  %s588_s13 = smov %s590_s15 }
  0xf3   :  { %12 = sbr.rel (!%p10_p5) target bundleno = 2 (0x2), region = 68 }

// kernel: autoformer_forward.26
= control target key start
LH: loop header
LB: loop body
LE: loop exit
PB: predicated region body
PF: predicated region fallthrough
CT: control target
= control target key end

     0   :  { %s729_s21 = smov 0   ;;  %s792_s0 = inlined_call_operand.vmem [shape: f32[24,24], index: 0, kind: input, shape index: {}]   ;;  %s793_s1 = inlined_call_operand.vmem [shape: bf16[2,24,64], index: 1, kind: input, shape index: {}]   ;;  %s794_s2 = inlined_call_operand.vmem [shape: bf16[64,64], index: 2, kind: input, shape index: {}]   ;;  %s795_s3 = inlined_call_operand.vmem [shape: f32[1,64], index: 3, kind: input, shape index: {}]   ;;  %s796_s4 = inlined_call_operand.vmem [shape: f32[2,24,64], index: 4, kind: input, shape index: {}]   ;;  %s797_s5 = inlined_call_operand.vmem [shape: f32[2,24,64], index: 5, kind: output, shape index: {0}]   ;;  %s798_s6 = inlined_call_operand.vmem [shape: f32[2,24,64], index: 6, kind: output, shape index: {1}]  }
   0x1 LB: > { %s599_s22 = sadd.s32 4294967295, %s689_s21   ;;  %p603_p0 = scmp.ge.s32.totalorder %s689_s21, 1  ;;  %s689_s21 = sphi %s729_s21, %s17_s21  }
   0x2   : > { %p225_p1 = scmp.lt.s32.totalorder %s689_s21, 3 }
   0x4   : > { %p226_p2 = pnand %p603_p0, %p225_p1 }
   0x5   : > { %v677_v0 = vld [vmem:[%s794_s2] sm:$0xff] (!%p226_p2)   ;;  %p265_p3 = scmp.lt.s32.totalorder (!%p226_p2), %s599_s22, 1  ;;  %v678_v1 = vld [vmem:[%s794_s2 + $0x8] sm:$0xff] (!%p226_p2)   ;;  %v679_v2 = vld [vmem:[%s794_s2 + $0x10] sm:$0xff] (!%p226_p2)   ;;  %vm336_vm0 = vcmask (!%p226_p2), 523264   ;;  %v691_v6 = vmov (!%p226_p2), 0.0|0.0  }
   0x6   : > { %229 = sbr.rel (%p226_p2) target bundleno = 471 (0x1d7), region = 40  ;;  %634 = vmatprep.subr.bf16.mxu0 (!%p226_p2), %v677_v0  ;;  %v680_v3 = vld [vmem:[%s794_s2 + $0x18] sm:$0xff] (!%p226_p2)   ;;  %661 = vmatprep.subr.bf16.mxu1 (!%p226_p2), %v691_v6  ;;  %vm692_vm1 = vmmov (!%p226_p2), 0   ;;  %v693_v7 = vmov (!%p226_p2), 0.0   ;;  %v608_v8 = vld [vmem:[%s795_s3] ss:$0 sm:$0xff] (!%p226_p2) }
   0x7   : > { %635 = vmatpush3.bf16.msra.mxu0 (!%p226_p2), %v677_v0  ;;  %652 = vmatprep.mubr.msk.f32.mxu1 (!%p226_p2), %vm692_vm1, %v693_v7  ;;  %v397_v23 = vld [vmem:[%s792_s0] sm:$0xff] (!%p226_p2)  ;;  %vm400_vm2 = vcmask (!%p226_p2), 195584   ;;  %v398_v24 = vld [vmem:[%s792_s0 + $0x8] sm:$0xff] (!%p226_p2)  ;;  %v399_v25 = vld [vmem:[%s792_s0 + $0x10] sm:$0xff] (!%p226_p2) }
   0x8   : > { %636 = vmatprep.subr.bf16.mxu0 (!%p226_p2), %v678_v1 }
   0xb   : > { %637 = vmatpush3.bf16.msra.mxu0 (!%p226_p2), %v678_v1 }
   0xc   : > { %638 = vmatprep.subr.bf16.mxu0 (!%p226_p2), %v679_v2 }
   0xd   : > { %s800_s22 = smov (!%p265_p3, %s599_s22), 1 }
   0xe   : > { %s664_s29 = smul.u32 12, %s800_s22 }
   0xf   : > { %639 = vmatpush3.bf16.msra.mxu0 %v679_v2  ;;  %s755_s11 = smul.u32 24, %s800_s22 }
  0x10   : > { %s269_s8 = scalar_lea.vmem %s793_s1, %s664_s29  ;;  %640 = vmatprep.subr.bf16.mxu0 %v680_v3 }
  0x11   : > { %v681_v4 = vld [vmem:[%s269_s8] sm:$0xff]   ;;  %v682_v5 = vld [vmem:[%s269_s8 + $0x8] ss:$0 sps:$4 sm:$0xff]   ;;  %s274_s16 = scalar_lea.vmem %s796_s4, %s755_s11  ;;  %s284_s26 = scalar_lea.vmem %s798_s6, %s755_s11 }
  0x12   : > { %642 = vmatprep.mubr.msk.bf16.mxu0 %vm336_vm0, %v681_v4  ;;  %v391_v13 = vld [vmem:[%s274_s16] sm:$0xff]  ;;  %v392_v15 = vld [vmem:[%s274_s16 + $0x8] sm:$0xff]  ;;  %v393_v21 = vld [vmem:[%s274_s16 + $0x10] sm:$0xff]  ;;  %s279_s29 = scalar_lea.vmem %s797_s5, %s755_s11 }
  0x13   : > { %641 = vmatpush3.bf16.msra.mxu0 %v680_v3 }
  0x16   : > { %643 = vmatmul.mubr.msk.bf16.vlgmr.msra.gmra.mrb[0].mxu0 %vm336_vm0, %v682_v5 }
  0xe9   : > { %v644_v9 = vpop.f32.mrb[0].mxu0 }
  0xea   : > { %v377_v10 = vpop.f32.mrb[1].mxu0  ;;  %v386_v19 = vadd.f32 %v644_v9, %v608_v8 }
  0xeb   : > { %v378_v11 = vadd.f32 %v608_v8, %v377_v10  ;;  %v645_v12 = vpop.f32.mrb[2].mxu0 }
  0xec   : > { %v380_v14 = vpop.f32.mrb[3].mxu0  ;;  %v396_v22 = vadd.f32 %v393_v21, %v386_v19 }
  0xed   : > { %v381_v16 = vadd.f32 %v608_v8, %v380_v14  ;;  %v394_v17 = vadd.f32 %v391_v13, %v378_v11 }
  0xef   : > { %v395_v18 = vadd.f32 %v392_v15, %v381_v16 }
  0xf1   : > { %v662_v20 = vpack.c.bf16 %v395_v18, %v394_v17 }
  0xf3   : > { %663 = vmatpush3.bf16.msra.mxu1 %v662_v20 }
  0xf4   : > { %650 = vmatprep.subr.mxu1 %v693_v7 }
  0xf7   : > { %651 = vmatpush3.msra.mxu1 %v396_v22 }
  0xf8   : > { %653 = vmatmul.mubr.msk.f32.vlgmr.msra.gmra.mrb[0].mxu1 %vm400_vm2, %v397_v23 }
  0xf9   : > { %655 = vmatprep.mubr.msk.f32.mxu1 %vm692_vm1, %v693_v7 }
  0xfc   : > { %656 = vmatmul.mubr.msk.f32.gmra.mrb[2].mxu1 %vm400_vm2, %v398_v24 }
  0xfd   : > { %658 = vmatprep.mubr.msk.f32.mxu1 %vm692_vm1, %v693_v7 }
 0x100   : > { %659 = vmatmul.mubr.msk.f32.gmra.mrb[4].mxu1 %vm400_vm2, %v399_v25 }
 0x1cb   : > { %v476_v26 = vpop.f32.mrb[0].mxu1 }
 0x1cc   : > { %490 = vst.msk [vmem:[%s284_s26] sm:$0xff] %vm336_vm0, %v476_v26  ;;  %v493_v27 = vsub.f32 %v394_v17, %v476_v26  ;;  %v654_v28 = vpop.f32.mrb[1].mxu1 }
 0x1ce   : > { %496 = vst.msk [vmem:[%s279_s29] sm:$0xff] %vm336_vm0, %v493_v27 }
 0x1cf   : > { %v481_v29 = vpop.f32.mrb[2].mxu1 }
 0x1d0   : > { %491 = vst.msk [vmem:[%s284_s26 + $0x8] sm:$0xff] %vm336_vm0, %v481_v29  ;;  %v494_v30 = vsub.f32 %v395_v18, %v481_v29  ;;  %v657_v31 = vpop.f32.mrb[3].mxu1 }
 0x1d2   : > { %497 = vst.msk [vmem:[%s279_s29 + $0x8] sm:$0xff] %vm336_vm0, %v494_v30 }
 0x1d3   : > { %v486_v32 = vpop.f32.mrb[4].mxu1 }
 0x1d4   : > { %492 = vst.msk [vmem:[%s284_s26 + $0x10] sm:$0xff] %vm336_vm0, %v486_v32  ;;  %v495_v33 = vsub.f32 %v396_v22, %v486_v32  ;;  %v660_v34 = vpop.f32.mrb[5].mxu1 }
 0x1d6   : > { %498 = vst.msk [vmem:[%s279_s29 + $0x10] sm:$0xff] %vm336_vm0, %v495_v33 }
 0x1d7 PF: > { %s17_s21 = sadd.s32 1, %s689_s21  }
 0x1d8   : > { %p14_p4 = scmp.ge.s32.totalorder %s17_s21, 4  }
 0x1da   :  { %16 = sbr.rel (!%p14_p4) target bundleno = 1 (0x1), region = 85 }

// kernel: autoformer_forward.27
= control target key start
LH: loop header
LB: loop body
LE: loop exit
PB: predicated region body
PF: predicated region fallthrough
CT: control target
= control target key end

     0   :  { %s766_s18 = smov 0   ;;  %s842_s0 = inlined_call_operand.vmem [shape: f32[24,24], index: 0, kind: input, shape index: {}]   ;;  %s843_s1 = inlined_call_operand.vmem [shape: f32[2,24,64], index: 1, kind: input, shape index: {}]   ;;  %s844_s2 = inlined_call_operand.vmem [shape: bf16[64,32], index: 2, kind: input, shape index: {}]   ;;  %s845_s3 = inlined_call_operand.vmem [shape: bf16[32,64], index: 3, kind: input, shape index: {}]   ;;  %s846_s4 = inlined_call_operand.vmem [shape: f32[2,24,64], index: 4, kind: output, shape index: {0}]   ;;  %s847_s5 = inlined_call_operand.vmem [shape: f32[2,24,64], index: 5, kind: output, shape index: {1}]  }
   0x1 LB: > { %s624_s19 = sadd.s32 4294967295, %s731_s18   ;;  %p628_p0 = scmp.ge.s32.totalorder %s731_s18, 1  ;;  %s731_s18 = sphi %s766_s18, %s16_s18  }
   0x2   : > { %p190_p1 = scmp.lt.s32.totalorder %s731_s18, 3 }
   0x4   : > { %p191_p2 = pnand %p628_p0, %p190_p1 }
   0x5   : > { %v713_v0 = vld [vmem:[%s844_s2] sm:$0xff] (!%p191_p2)   ;;  %p223_p3 = scmp.lt.s32.totalorder (!%p191_p2), %s624_s19, 1  ;;  %v714_v1 = vld [vmem:[%s844_s2 + $0x8] sm:$0xff] (!%p191_p2)   ;;  %v715_v2 = vld [vmem:[%s844_s2 + $0x10] sm:$0xff] (!%p191_p2)   ;;  %vm276_vm0 = vcmask (!%p191_p2), 523264   ;;  %vm376_vm1 = vcmask (!%p191_p2), 261120  }
   0x6   : > { %194 = sbr.rel (%p191_p2) target bundleno = 712 (0x2c8), region = 36  ;;  %663 = vmatprep.subr.bf16.mxu0 (!%p191_p2), %v713_v0  ;;  %v716_v5 = vld [vmem:[%s844_s2 + $0x18] sm:$0xff] (!%p191_p2)   ;;  %v717_v9 = vld [vmem:[%s845_s3] sm:$0xff] (!%p191_p2)   ;;  %v718_v10 = vld [vmem:[%s845_s3 + $0x8] sm:$0xff] (!%p191_p2)   ;;  %v733_v44 = vmov (!%p191_p2), 0.0|0.0   ;;  %vm734_vm2 = vmmov (!%p191_p2), 0  }
   0x7   : > { %664 = vmatpush3.bf16.msra.mxu0 (!%p191_p2), %v713_v0  ;;  %675 = vmatprep.subr.bf16.mxu1 (!%p191_p2), %v717_v9  ;;  %v735_v45 = vmov (!%p191_p2), 0.0   ;;  %v434_v54 = vld [vmem:[%s842_s0] sm:$0xff] (!%p191_p2)  ;;  %vm437_vm3 = vcmask (!%p191_p2), 195584   ;;  %v435_v55 = vld [vmem:[%s842_s0 + $0x8] sm:$0xff] (!%p191_p2)  ;;  %v436_v56 = vld [vmem:[%s842_s0 + $0x10] sm:$0xff] (!%p191_p2) }
   0x8   : > { %665 = vmatprep.subr.bf16.mxu0 (!%p191_p2), %v714_v1  ;;  %676 = vmatpush3.bf16.msra.mxu1 (!%p191_p2), %v717_v9 }
   0x9   : > { %677 = vmatprep.subr.bf16.mxu1 (!%p191_p2), %v718_v10 }
   0xb   : > { %666 = vmatpush3.bf16.msra.mxu0 (!%p191_p2), %v714_v1 }
   0xc   : > { %667 = vmatprep.subr.bf16.mxu0 (!%p191_p2), %v715_v2  ;;  %678 = vmatpush3.bf16.msra.mxu1 (!%p191_p2), %v718_v10 }
   0xd   : > { %s849_s19 = smov (!%p223_p3, %s624_s19), 1  ;;  %698 = vmatprep.subr.bf16.mxu1 %v733_v44 }
   0xe   : > { %s783_s26 = smul.u32 24, %s849_s19 }
   0xf   : > { %668 = vmatpush3.bf16.msra.mxu0 %v715_v2 }
  0x10   : > { %s227_s29 = scalar_lea.vmem %s843_s1, %s783_s26  ;;  %669 = vmatprep.subr.bf16.mxu0 %v716_v5  ;;  %s237_s20 = scalar_lea.vmem %s847_s5, %s783_s26 }
  0x11   : > { %v789_v3 = vld [vmem:[%s227_s29] sm:$0xff]  ;;  %v791_v4 = vld [vmem:[%s227_s29 + $0x8] sm:$0xff]  ;;  %v799_v7 = vld [vmem:[%s227_s29 + $0x10] sm:$0xff]  ;;  %s232_s23 = scalar_lea.vmem %s846_s4, %s783_s26 }
  0x12   : > { %v242_v6 = vpack.c.bf16 %v791_v4, %v789_v3  ;;  %v243_v8 = vpack.c.bf16 %v799_v7, %v799_v7 }
  0x13   : > { %670 = vmatpush3.bf16.msra.mxu0 %v716_v5 }
  0x14   : > { %671 = vmatprep.mubr.msk.bf16.mxu0 %vm276_vm0, %v242_v6 }
  0x16   : > { %672 = vmatmul.mubr.msk.bf16.vlgmr.msra.gmra.mrb[0].mxu0 %vm276_vm0, %v243_v8 }
  0xe9   : > { %v673_v11 = vpop.f32.mrb[0].mxu0 }
  0xea   : > { %v336_v12 = vmul.f32 0.044715, %v673_v11  ;;  %v317_v13 = vpop.f32.mrb[1].mxu0  ;;  %v333_v35 = vmul.f32 0.5, %v673_v11 }
  0xeb   : > { %v334_v14 = vmul.f32 0.044715, %v317_v13  ;;  %v674_v15 = vpop.f32.mrb[2].mxu0  ;;  %v331_v36 = vmul.f32 0.5, %v317_v13 }
  0xec   : > { %v339_v16 = vmul.f32 %v673_v11, %v336_v12  ;;  %v320_v17 = vpop.f32.mrb[3].mxu0 }
  0xed   : > { %v337_v18 = vmul.f32 %v334_v14, %v317_v13  ;;  %v335_v19 = vmul.f32 0.044715, %v320_v17  ;;  %v332_v37 = vmul.f32 0.5, %v320_v17 }
  0xee   : > { %v342_v20 = vmul.f32 %v673_v11, %v339_v16 }
  0xef   : > { %v340_v21 = vmul.f32 %v337_v18, %v317_v13  ;;  %v338_v22 = vmul.f32 %v335_v19, %v320_v17 }
  0xf0   : > { %v345_v23 = vadd.f32 %v673_v11, %v342_v20 }
  0xf1   : > { %v343_v24 = vadd.f32 %v340_v21, %v317_v13  ;;  %v341_v25 = vmul.f32 %v338_v22, %v320_v17 }
  0xf2   : > { %v348_v26 = vmul.f32 0.7978846, %v345_v23 }
  0xf3   : > { %v344_v27 = vadd.f32 %v341_v25, %v320_v17  ;;  %v346_v28 = vmul.f32 0.7978846, %v343_v24 }
  0xf4   : > { %719 = vtanh.f32 %v348_v26 }
  0xf5   : > { %v347_v29 = vmul.f32 0.7978846, %v344_v27  ;;  %721 = vtanh.f32 %v346_v28 }
  0xf7   : > { %723 = vtanh.f32 %v347_v29 }
  0xfe   : > { %v720_v30 = vpop.eup %719 }
  0xff   : > { %v722_v31 = vpop.eup %721  ;;  %v354_v32 = vadd.f32 1.0, %v720_v30 }
 0x100   : > { %v352_v33 = vadd.f32 1.0, %v722_v31 }
 0x101   : > { %v724_v34 = vpop.eup %723  ;;  %v357_v39 = vmul.f32 %v354_v32, %v333_v35 }
 0x102   : > { %v353_v38 = vadd.f32 1.0, %v724_v34  ;;  %v355_v40 = vmul.f32 %v352_v33, %v331_v36 }
 0x103   : > { %v359_v43 = vpack.c.bf16 %v357_v39, %v357_v39 }
 0x104   : > { %v356_v41 = vmul.f32 %v353_v38, %v332_v37 }
 0x106   : > { %v358_v42 = vpack.c.bf16 %v356_v41, %v355_v40 }
 0x108   : > { %679 = vmatprep.mubr.msk.bf16.mxu1 %vm376_vm1, %v358_v42 }
 0x109   : > { %680 = vmatmul.mubr.msk.bf16.vlgmr.msra.gmra.mrb[0].mxu1 %vm376_vm1, %v359_v43 }
 0x10a   : > { %689 = vmatprep.mubr.msk.f32.mxu1 %vm734_vm2, %v735_v45 }
 0x1dc   : > { %v681_v46 = vpop.f32.mrb[0].mxu1 }
 0x1dd   : > { %v417_v47 = vpop.f32.mrb[1].mxu1  ;;  %v433_v53 = vadd.f32 %v681_v46, %v799_v7 }
 0x1de   : > { %v682_v48 = vpop.f32.mrb[2].mxu1  ;;  %v431_v50 = vadd.f32 %v417_v47, %v789_v3 }
 0x1df   : > { %v420_v49 = vpop.f32.mrb[3].mxu1 }
 0x1e0   : > { %v432_v51 = vadd.f32 %v420_v49, %v791_v4 }
 0x1e2   : > { %v699_v52 = vpack.c.bf16 %v432_v51, %v431_v50 }
 0x1e4   : > { %700 = vmatpush3.bf16.msra.mxu1 %v699_v52 }
 0x1e5   : > { %687 = vmatprep.subr.mxu1 %v735_v45 }
 0x1e8   : > { %688 = vmatpush3.msra.mxu1 %v433_v53 }
 0x1e9   : > { %690 = vmatmul.mubr.msk.f32.vlgmr.msra.gmra.mrb[4].mxu1 %vm437_vm3, %v434_v54 }
 0x1ea   : > { %692 = vmatprep.mubr.msk.f32.mxu1 %vm734_vm2, %v735_v45 }
 0x1ed   : > { %693 = vmatmul.mubr.msk.f32.gmra.mrb[6].mxu1 %vm437_vm3, %v435_v55 }
 0x1ee   : > { %695 = vmatprep.mubr.msk.f32.mxu1 %vm734_vm2, %v735_v45 }
 0x1f1   : > { %696 = vmatmul.mubr.msk.f32.gmra.mrb[8].mxu1 %vm437_vm3, %v436_v56 }
 0x2bc   : > { %v513_v57 = vpop.f32.mrb[4].mxu1 }
 0x2bd   : > { %527 = vst.msk [vmem:[%s237_s20] sm:$0xff] %vm276_vm0, %v513_v57  ;;  %v530_v58 = vsub.f32 %v431_v50, %v513_v57  ;;  %v691_v59 = vpop.f32.mrb[5].mxu1 }
 0x2bf   : > { %533 = vst.msk [vmem:[%s232_s23] sm:$0xff] %vm276_vm0, %v530_v58 }
 0x2c0   : > { %v518_v60 = vpop.f32.mrb[6].mxu1 }
 0x2c1   : > { %528 = vst.msk [vmem:[%s237_s20 + $0x8] sm:$0xff] %vm276_vm0, %v518_v60  ;;  %v531_v61 = vsub.f32 %v432_v51, %v518_v60  ;;  %v694_v62 = vpop.f32.mrb[7].mxu1 }
 0x2c3   : > { %534 = vst.msk [vmem:[%s232_s23 + $0x8] sm:$0xff] %vm276_vm0, %v531_v61 }
 0x2c4   : > { %v523_v63 = vpop.f32.mrb[8].mxu1 }
 0x2c5   : > { %529 = vst.msk [vmem:[%s237_s20 + $0x10] sm:$0xff] %vm276_vm0, %v523_v63  ;;  %v532_v0 = vsub.f32 %v433_v53, %v523_v63  ;;  %v697_v1 = vpop.f32.mrb[9].mxu1 }
 0x2c7   : > { %535 = vst.msk [vmem:[%s232_s23 + $0x10] sm:$0xff] %vm276_vm0, %v532_v0 }
 0x2c8 PF: > { %s16_s18 = sadd.s32 1, %s731_s18  }
 0x2c9   : > { %p13_p4 = scmp.ge.s32.totalorder %s16_s18, 4  }
 0x2cb   :  { %15 = sbr.rel (!%p13_p4) target bundleno = 1 (0x1), region = 78 }

// kernel: autoformer_forward.28
= control target key start
LH: loop header
LB: loop body
LE: loop exit
PB: predicated region body
PF: predicated region fallthrough
CT: control target
= control target key end

     0   :  { %s496_s21 = smov 0   ;;  %s534_s0 = inlined_call_operand.vmem [shape: f32[2,24,64], index: 0, kind: input, shape index: {}]   ;;  %s535_s1 = inlined_call_operand.vmem [shape: f32[2,24,64], index: 1, kind: input, shape index: {}]   ;;  %s536_s2 = inlined_call_operand.vmem [shape: f32[2,24,64], index: 2, kind: input, shape index: {}]   ;;  %s537_s3 = inlined_call_operand.vmem [shape: f32[1,64], index: 3, kind: input, shape index: {}]   ;;  %s538_s4 = inlined_call_operand.vmem [shape: f32[1,64], index: 4, kind: input, shape index: {}]   ;;  %s539_s5 = inlined_call_operand.vmem [shape: f32[1,64], index: 5, kind: input, shape index: {}]   ;;  %s540_s6 = inlined_call_operand.vmem [shape: f32[2,24,1], index: 6, kind: output, shape index: {}]  }
   0x1 LB: > { %s430_s22 = sadd.s32 4294967295, %s459_s21   ;;  %p434_p0 = scmp.ge.s32.totalorder %s459_s21, 1  ;;  %s459_s21 = sphi %s496_s21, %s16_s21  }
   0x2   : > { %p232_p1 = scmp.lt.s32.totalorder %s459_s21, 3 }
   0x4   : > { %p233_p2 = pnand %p434_p0, %p232_p1 }
   0x5   : > { %p272_p3 = scmp.lt.s32.totalorder (!%p233_p2), %s430_s22, 1  ;;  %v439_v0 = vld [vmem:[%s537_s3] ss:$0 sm:$0xff] (!%p233_p2)  ;;  %vm337_vm0 = vcmask (!%p233_p2), 523264   ;;  %vm347_vm1 = vcmask (!%p233_p2), 7168  }
   0x6   : > { %236 = sbr.rel (%p233_p2) target bundleno = 173 (0xad), region = 44  ;;  %v440_v1 = vld [vmem:[%s538_s4] ss:$0 sm:$0xff] (!%p233_p2) }
   0x7   : > { %v441_v2 = vld [vmem:[%s539_s5] ss:$0 sm:$0xff] (!%p233_p2) }
   0xd   : > { %s542_s22 = smov (!%p272_p3, %s430_s22), 1 }
   0xe   : > { %s504_s23 = smul.u32 24, %s542_s22 }
  0x10   : > { %s276_s30 = scalar_lea.vmem %s534_s0, %s504_s23  ;;  %s281_s9 = scalar_lea.vmem %s535_s1, %s504_s23 }
  0x11   : > { %s286_s14 = scalar_lea.vmem %s536_s2, %s504_s23  ;;  %v292_v3 = vld [vmem:[%s276_s30] sm:$0xff]  ;;  %v294_v5 = vld [vmem:[%s276_s30 + $0x10] sm:$0xff]  ;;  %v293_v15 = vld [vmem:[%s276_s30 + $0x8] sm:$0xff]  ;;  %s291_s17 = scalar_lea.vmem %s540_s6, %s504_s23 }
  0x12   : > { %v305_v4 = vld [vmem:[%s281_s9] sm:$0xff]  ;;  %v302_v6 = vmul.f32 %v439_v0, %v292_v3  ;;  %v304_v9 = vmul.f32 %v439_v0, %v294_v5  ;;  %v307_v10 = vld [vmem:[%s281_s9 + $0x10] sm:$0xff]  ;;  %v306_v16 = vld [vmem:[%s281_s9 + $0x8] sm:$0xff]  ;;  %v303_v19 = vmul.f32 %v439_v0, %v293_v15 }
  0x13   : > { %v315_v7 = vmul.f32 %v440_v1, %v305_v4  ;;  %v321_v8 = vld [vmem:[%s286_s14] sm:$0xff]  ;;  %v323_v11 = vld [vmem:[%s286_s14 + $0x10] sm:$0xff]  ;;  %v317_v13 = vmul.f32 %v440_v1, %v307_v10  ;;  %v322_v17 = vld [vmem:[%s286_s14 + $0x8] sm:$0xff]  ;;  %v316_v20 = vmul.f32 %v440_v1, %v306_v16 }
  0x14   : > { %v331_v12 = vmul.f32 %v441_v2, %v321_v8  ;;  %v333_v14 = vmul.f32 %v441_v2, %v323_v11  ;;  %v332_v21 = vmul.f32 %v441_v2, %v322_v17 }
  0x15   : > { %v318_v18 = vadd.f32 %v315_v7, %v302_v6  ;;  %v320_v22 = vadd.f32 %v317_v13, %v304_v9  ;;  %v319_v24 = vadd.f32 %v316_v20, %v303_v19 }
  0x17   : > { %v334_v23 = vadd.f32 %v331_v12, %v318_v18  ;;  %v336_v25 = vadd.f32 %v333_v14, %v320_v22  ;;  %v335_v27 = vadd.f32 %v332_v21, %v319_v24 }
  0x19   : > { %v338_v26 = vsel %vm337_vm0, %v334_v23, 0.0  ;;  %v344_v28 = vsel %vm337_vm0, %v336_v25, 0.0  ;;  %v341_v29 = vsel %vm337_vm0, %v335_v27, 0.0 }
  0x1a   : > { %339 = vadd.xlane.f32.xlu0 %v338_v26  ;;  %345 = vadd.xlane.f32.xlu1 %v344_v28 }
  0x1e   : > { %342 = vadd.xlane.f32.xlu0 %v341_v29 }
  0xa7   : > { %v340_v30 = vpop.xlane.xlu0 %339  ;;  %v346_v31 = vpop.xlane.xlu1 %345 }
  0xa8   : > { %348 = vst.msk [vmem:[%s291_s17] sm:$0xff] %vm347_vm1, %v340_v30  ;;  %350 = vst.msk [vmem:[%s291_s17 + $0x10] sm:$0xff] %vm347_vm1, %v346_v31 }
  0xab   : > { %v343_v32 = vpop.xlane.xlu0 %342 }
  0xac   : > { %349 = vst.msk [vmem:[%s291_s17 + $0x8] sm:$0xff] %vm347_vm1, %v343_v32 }
  0xad PF: > { %s16_s21 = sadd.s32 1, %s459_s21  }
  0xae   : > { %p13_p4 = scmp.ge.s32.totalorder %s16_s21, 4  }
  0xb0   :  { %15 = sbr.rel (!%p13_p4) target bundleno = 1 (0x1), region = 80 }

// kernel: autoformer_forward.29
= control target key start
LH: loop header
LB: loop body
LE: loop exit
PB: predicated region body
PF: predicated region fallthrough
CT: control target
= control target key end

     0   :  { %s464_s20 = smov 0   ;;  %s509_s0 = inlined_call_operand.vmem [shape: f32[2,24,64], index: 0, kind: input, shape index: {}]   ;;  %s510_s1 = inlined_call_operand.vmem [shape: f32[1,64], index: 1, kind: input, shape index: {}]   ;;  %s511_s2 = inlined_call_operand.vmem [shape: f32[1,64], index: 2, kind: input, shape index: {}]   ;;  %s512_s3 = inlined_call_operand.vmem [shape: f32[1,64], index: 3, kind: input, shape index: {}]   ;;  %s513_s4 = inlined_call_operand.<no memory space> [shape: f32[1,1], index: 4, kind: input, shape index: {}]   ;;  %s514_s5 = inlined_call_operand.vmem [shape: f32[2,24,1], index: 5, kind: output, shape index: {}]  }
   0x1   :  { %v10_v0 = vstv %s513_s4 }
   0x2   :  { %11 = vst [vmem:[#allocation2] sm:$0x1] %v10_v0 }
   0x3 LB: > { %s395_s21 = sadd.s32 4294967295, %s429_s20   ;;  %p399_p0 = scmp.ge.s32.totalorder %s429_s20, 1  ;;  %s429_s20 = sphi %s464_s20, %s17_s20  }
   0x4   : > { %p189_p1 = scmp.lt.s32.totalorder %s429_s20, 3 }
   0x6   : > { %p190_p2 = pnand %p399_p0, %p189_p1 }
   0x7   : > { %p217_p3 = scmp.lt.s32.totalorder (!%p190_p2), %s395_s21, 1  ;;  %vm230_vm0 = vcmask (!%p190_p2), 523264   ;;  %v402_v33 = vld [vmem:[%s510_s1] ss:$0 sm:$0xff] (!%p190_p2)  ;;  %vm336_vm1 = vcmask (!%p190_p2), 7168  }
   0x8   : > { %193 = sbr.rel (%p190_p2) target bundleno = 511 (0x1ff), region = 40  ;;  %v403_v38 = vld [vmem:[%s511_s2] ss:$0 sm:$0xff] (!%p190_p2) }
   0x9   : > { %v404_v57 = vld [vmem:[%s512_s3] ss:$0 sm:$0xff] (!%p190_p2) }
   0xf   : > { %s516_s21 = smov (!%p217_p3, %s395_s21), 1 }
  0x10   : > { %s408_s4 = smul.u32 24, %s516_s21 }
  0x12   : > { %s221_s24 = scalar_lea.vmem %s509_s0, %s408_s4  ;;  %s226_s8 = scalar_lea.vmem %s514_s5, %s408_s4 }
  0x13   : > { %v227_v1 = vld [vmem:[%s221_s24] sm:$0xff]  ;;  %v229_v2 = vld [vmem:[%s221_s24 + $0x10] sm:$0xff]  ;;  %v228_v3 = vld [vmem:[%s221_s24 + $0x8] sm:$0xff] }
  0x14   : > { %v231_v4 = vsel %vm230_vm0, %v227_v1, 0.0  ;;  %v237_v5 = vsel %vm230_vm0, %v229_v2, 0.0  ;;  %v234_v6 = vsel %vm230_vm0, %v228_v3, 0.0 }
  0x15   : > { %232 = vadd.xlane.f32.xlu0 %v231_v4  ;;  %238 = vadd.xlane.f32.xlu1 %v237_v5 }
  0x19   : > { %235 = vadd.xlane.f32.xlu0 %v234_v6 }
  0xa2   : > { %v233_v7 = vpop.xlane.xlu0 %232  ;;  %v239_v8 = vpop.xlane.xlu1 %238 }
  0xa3   : > { %v241_v9 = vmul.f32 0.015625, %v233_v7  ;;  %v243_v10 = vmul.f32 0.015625, %v239_v8 }
  0xa5   : > { %v244_v11 = vsub.f32 %v227_v1, %v241_v9  ;;  %v246_v12 = vsub.f32 %v229_v2, %v243_v10 }
  0xa6   : > { %v236_v13 = vpop.xlane.xlu0 %235 }
  0xa7   : > { %v242_v14 = vmul.f32 0.015625, %v236_v13  ;;  %v247_v15 = vmul.f32 %v244_v11, %v244_v11  ;;  %v249_v16 = vmul.f32 %v246_v12, %v246_v12 }
  0xa9   : > { %v245_v17 = vsub.f32 %v228_v3, %v242_v14  ;;  %v250_v18 = vsel %vm230_vm0, %v247_v15, 0.0  ;;  %v256_v19 = vsel %vm230_vm0, %v249_v16, 0.0  ;;  %v405_v3 = vld [vmem:[#allocation2] ss:$0 sm:$0xff] }
  0xaa   : > { %251 = vadd.xlane.f32.xlu1 %v250_v18 }
  0xab   : > { %v248_v20 = vmul.f32 %v245_v17, %v245_v17 }
  0xad   : > { %v253_v21 = vsel %vm230_vm0, %v248_v20, 0.0 }
  0xae   : > { %257 = vadd.xlane.f32.xlu1 %v256_v19  ;;  %254 = vadd.xlane.f32.xlu0 %v253_v21 }
 0x137   : > { %v252_v22 = vpop.xlane.xlu1 %251 }
 0x138   : > { %v259_v23 = vmul.f32 0.015625, %v252_v22 }
 0x13a   : > { %v262_v24 = vadd.f32 1e-05, %v259_v23 }
 0x13b   : > { %v258_v25 = vpop.xlane.xlu1 %257  ;;  %v255_v26 = vpop.xlane.xlu0 %254 }
 0x13c   : > { %417 = vrsqrt.f32 %v262_v24  ;;  %v261_v27 = vmul.f32 0.015625, %v258_v25  ;;  %v260_v28 = vmul.f32 0.015625, %v255_v26 }
 0x13e   : > { %v264_v29 = vadd.f32 1e-05, %v261_v27  ;;  %v263_v30 = vadd.f32 1e-05, %v260_v28 }
 0x140   : > { %419 = vrsqrt.f32 %v264_v29 }
 0x141   : > { %421 = vrsqrt.f32 %v263_v30 }
 0x146   : > { %v418_v31 = vpop.eup %417 }
 0x147   : > { %v268_v32 = vmul.f32 %v418_v31, %v244_v11 }
 0x149   : > { %v278_v35 = vmul.f32 %v402_v33, %v268_v32 }
 0x14a   : > { %v420_v34 = vpop.eup %419 }
 0x14b   : > { %v422_v36 = vpop.eup %421  ;;  %v270_v37 = vmul.f32 %v420_v34, %v246_v12  ;;  %v288_v42 = vadd.f32 %v403_v38, %v278_v35 }
 0x14c   : > { %v269_v39 = vmul.f32 %v422_v36, %v245_v17 }
 0x14d   : > { %v280_v40 = vmul.f32 %v402_v33, %v270_v37  ;;  %v291_v45 = vsel %vm230_vm0, %v288_v42, 0.0 }
 0x14e   : > { %v279_v41 = vmul.f32 %v402_v33, %v269_v39 }
 0x14f   : > { %v290_v44 = vadd.f32 %v403_v38, %v280_v40 }
 0x150   : > { %v289_v43 = vadd.f32 %v403_v38, %v279_v41 }
 0x151   : > { %v294_v48 = vsel %vm230_vm0, %v290_v44, 0.0 }
 0x152   : > { %v292_v46 = vsel %vm230_vm0, %v289_v43, 0.0 }
 0x153   : > { %v293_v47 = vadd.f32 %v292_v46, %v291_v45 }
 0x155   : > { %v295_v49 = vadd.f32 %v294_v48, %v293_v47 }
 0x157   : > { %v296_v50 = vrot.slane %v295_v49, 4 }
 0x159   : > { %v297_v51 = vadd.f32 %v296_v50, %v295_v49 }
 0x15b   : > { %v298_v52 = vrot.slane %v297_v51, 2 }
 0x15d   : > { %v299_v53 = vadd.f32 %v298_v52, %v297_v51 }
 0x15f   : > { %v300_v54 = vrot.slane %v299_v53, 1 }
 0x161   : > { %v301_v55 = vadd.f32 %v300_v54, %v299_v53 }
 0x163   : > { %v303_v56 = vmul.f32 0.041666668, %v301_v55 }
 0x165   : > { %v305_v58 = vsub.f32 %v289_v43, %v303_v56  ;;  %v304_v59 = vsub.f32 %v288_v42, %v303_v56  ;;  %v306_v60 = vsub.f32 %v290_v44, %v303_v56 }
 0x167   : > { %v315_v61 = vmul.f32 %v404_v57, %v305_v58  ;;  %v314_v62 = vmul.f32 %v404_v57, %v304_v59  ;;  %v316_v1 = vmul.f32 %v404_v57, %v306_v60 }
 0x169   : > { %v320_v63 = vsel %vm230_vm0, %v315_v61, 0.0  ;;  %v317_v0 = vsel %vm230_vm0, %v314_v62, 0.0  ;;  %v323_v2 = vsel %vm230_vm0, %v316_v1, 0.0 }
 0x16a   : > { %321 = vadd.xlane.f32.xlu1 %v320_v63  ;;  %318 = vadd.xlane.f32.xlu0 %v317_v0 }
 0x16e   : > { %324 = vadd.xlane.f32.xlu0 %v323_v2 }
 0x1f7   : > { %v322_v4 = vpop.xlane.xlu1 %321  ;;  %v319_v5 = vpop.xlane.xlu0 %318 }
 0x1f8   : > { %v334_v6 = vadd.f32 %v405_v3, %v322_v4  ;;  %v333_v7 = vadd.f32 %v405_v3, %v319_v5 }
 0x1fa   : > { %338 = vst.msk [vmem:[%s226_s8 + $0x8] sm:$0xff] %vm336_vm1, %v334_v6  ;;  %337 = vst.msk [vmem:[%s226_s8] sm:$0xff] %vm336_vm1, %v333_v7 }
 0x1fb   : > { %v325_v8 = vpop.xlane.xlu0 %324 }
 0x1fc   : > { %v335_v9 = vadd.f32 %v405_v3, %v325_v8 }
 0x1fe   : > { %339 = vst.msk [vmem:[%s226_s8 + $0x10] sm:$0xff] %vm336_vm1, %v335_v9 }
 0x1ff PF: > { %s17_s20 = sadd.s32 1, %s429_s20  }
 0x200   : > { %p14_p4 = scmp.ge.s32.totalorder %s17_s20, 4  }
 0x202   :  { %16 = sbr.rel (!%p14_p4) target bundleno = 3 (0x3), region = 70 }

</bundles_post_ra>
